<compile_context>
chip_gen: v5e
topology: v5e:2x2
jax: 0.10.0
libtpu: 0.0.40
codegen_flags: <defaults>
</compile_context>

<pallas_src>
import functools

import jax
import jax.numpy as jnp
from jax import lax
from jax.experimental import pallas as pl
from jax.experimental.pallas import tpu as pltpu

KSIZE = 3      # synthesized conv body: 3x3 kernels
STRIDE = 2     # synthesized conv body: stride 2, VALID padding


def _round_up(x, m):
    return ((x + m - 1) // m) * m


# ----------------------------------------------------------------------------
# Kernel A: conv body + GRU, one sequence (batch element) per grid step.
# ----------------------------------------------------------------------------
def _body_gru_kernel(x_ref, w1_ref, b1_ref, w2_ref, b2_ref,
                     wih_ref, bih_ref, whh_ref, bhh_ref, h0_ref, hout_ref,
                     *, seq_len):
    S = seq_len
    hin = x_ref.shape[1] // S
    oh1 = (hin - KSIZE) // STRIDE + 1
    oh2 = (oh1 - KSIZE) // STRIDE + 1
    H = hout_ref.shape[-1]
    half_rows = (hin // 2) * S       # start of odd-height rows in x layout
    rows1 = oh1 * S

    # x rows are laid out (height-parity, height//2, seq); lanes are (w, c).
    x2 = x_ref[0].astype(jnp.bfloat16)                       # (hin*S, Win*C)

    # --- conv1 + ReLU: one MXU dot per kernel-row offset dy.  Thanks to the
    #     parity-major row layout, each dy's LHS is a contiguous slice.
    f1 = b1_ref[...]                                          # (1, ow1*c1)
    for dy in range(KSIZE):
        start = (dy % 2) * half_rows + (dy // 2) * S
        f1 = f1 + jnp.dot(x2[start:start + rows1], w1_ref[dy],
                          preferred_element_type=jnp.float32)
    f1 = jnp.maximum(f1, 0.0)                                 # (oh1*S, ow1*c1), rows (i, s)

    # --- conv2 + ReLU: gather the 3 needed conv1 rows per output row.
    f2 = b2_ref[...]                                          # (1, ow2*c2)
    for dy in range(KSIZE):
        lhs = jnp.concatenate(
            [f1[(STRIDE * y + dy) * S:(STRIDE * y + dy + 1) * S]
             for y in range(oh2)], axis=0).astype(jnp.bfloat16)
        f2 = f2 + jnp.dot(lhs, w2_ref[dy], preferred_element_type=jnp.float32)
    f2 = jnp.maximum(f2, 0.0)                                 # (oh2*S, ow2*c2), rows (y, s)

    # --- GRU input projection: gx[s] = feats[s] @ W_ih^T + b_ih.  The NHWC
    #     flatten is realised as a sum over the oh2 row-chunks of f2.
    gx = bih_ref[...]                                         # (1, 3H)
    for y in range(oh2):
        gx = gx + jnp.dot(f2[y * S:(y + 1) * S].astype(jnp.bfloat16),
                          wih_ref[y], preferred_element_type=jnp.float32)

    # --- GRU recurrence, fully unrolled (S static, tiny).  One merged 3H-wide
    #     recurrent dot per step; all gate math in f32 (v5e has no bf16 VPU/EUP).
    whh = whh_ref[...]                                        # (H, 3H) f32
    bhh = bhh_ref[...]                                        # (1, 3H)
    h = h0_ref[0]                                             # (1, H) f32
    for t in range(S):
        gxt = gx[t:t + 1]
        gh = jnp.dot(h, whh, preferred_element_type=jnp.float32) + bhh
        r = jax.nn.sigmoid(gxt[:, :H] + gh[:, :H])
        z = jax.nn.sigmoid(gxt[:, H:2 * H] + gh[:, H:2 * H])
        n = jnp.tanh(gxt[:, 2 * H:] + r * gh[:, 2 * H:])
        h = (1.0 - z) * n + z * h
    hout_ref[0] = h


def fused_body_gru(p, x_rows, h0, seq_len):
    """Conv body + GRU last hidden; grid over batch elements ("parallel")."""
    B, R, L = x_rows.shape
    H = p["gru_whh_t"].shape[0]
    kernel = functools.partial(_body_gru_kernel, seq_len=seq_len)
    return pl.pallas_call(
        kernel,
        out_shape=jax.ShapeDtypeStruct((B, 1, H), jnp.float32),
        grid=(B,),
        in_specs=[
            pl.BlockSpec((1, R, L), lambda b: (b, 0, 0)),
            pl.BlockSpec(p["conv1_wd"].shape, lambda b: (0, 0, 0)),
            pl.BlockSpec(p["conv1_bt"].shape, lambda b: (0, 0)),
            pl.BlockSpec(p["conv2_wd"].shape, lambda b: (0, 0, 0)),
            pl.BlockSpec(p["conv2_bt"].shape, lambda b: (0, 0)),
            pl.BlockSpec(p["gru_wih_c"].shape, lambda b: (0, 0, 0)),
            pl.BlockSpec(p["gru_bih"].shape, lambda b: (0, 0)),
            pl.BlockSpec(p["gru_whh_t"].shape, lambda b: (0, 0)),
            pl.BlockSpec(p["gru_bhh"].shape, lambda b: (0, 0)),
            pl.BlockSpec((1, 1, H), lambda b: (b, 0, 0)),
        ],
        out_specs=pl.BlockSpec((1, 1, H), lambda b: (b, 0, 0)),
        compiler_params=pltpu.CompilerParams(
            dimension_semantics=("parallel",)),
    )(x_rows, p["conv1_wd"], p["conv1_bt"], p["conv2_wd"], p["conv2_bt"],
      p["gru_wih_c"], p["gru_bih"], p["gru_whh_t"], p["gru_bhh"], h0)


# ----------------------------------------------------------------------------
# Kernel B: dueling head.  Single block (adv.mean() is a GLOBAL scalar, so the
# whole problem must live in one block); output is a lane-dense (M, 128) slab.
# ----------------------------------------------------------------------------
def _dueling_head_kernel(x_ref, w_ref, b_ref, o_ref, *, num_actions):
    y = jnp.dot(x_ref[...].astype(jnp.bfloat16), w_ref[...],
                preferred_element_type=jnp.float32) + b_ref[...]
    adv = y[:, :num_actions]
    val = y[:, num_actions:num_actions + 1]
    # Columns [0, num_actions) hold q = adv + val - mean(adv); the padded
    # columns hold don't-care values and are sliced off in the wrapper.
    o_ref[...] = y + val - jnp.mean(adv)


def dueling_head(x_flat, head_w, head_b, num_actions):
    M = x_flat.shape[0]
    npad = head_w.shape[1]
    return pl.pallas_call(
        functools.partial(_dueling_head_kernel, num_actions=num_actions),
        out_shape=jax.ShapeDtypeStruct((M, npad), jnp.float32),
    )(x_flat, head_w, head_b)


# ----------------------------------------------------------------------------
# One-time parameter preparation (all layout work hoisted out of the forward)
# ----------------------------------------------------------------------------
def _scatter_conv_weights(w_oihw, in_w, stride):
    """Fold conv window extraction into the weights.

    Returns mats of shape (kh, in_w*I, out_w*O) with
      mats[dy][wi*I + ci, xo*O + co] = w[co, ci, dy, dx]  iff  wi == stride*xo + dx
    so that an activation row with lanes laid out as (w, c), matmul'ed against
    mats[dy] and summed over dy, yields the conv output row with lanes (x, c).
    """
    O, I, kh, kw = w_oihw.shape
    out_w = (in_w - kw) // stride + 1
    wi = jnp.arange(in_w)[:, None]
    xo = jnp.arange(out_w)[None, :]
    mats = []
    for dy in range(kh):
        m = jnp.zeros((in_w, I, out_w, O), jnp.float32)
        for dx in range(kw):
            sel = (wi == stride * xo + dx).astype(jnp.float32)     # (in_w, out_w)
            wt = jnp.transpose(w_oihw[:, :, dy, dx])               # (I, O)
            m = m + sel[:, None, :, None] * wt[None, :, None, :]
        mats.append(m.reshape(in_w * I, out_w * O))
    return jnp.stack(mats).astype(jnp.bfloat16)


def prepare_kernel_params(raw, input_shape, num_actions):
    C, Hin, Win = input_shape
    c1 = raw["conv1_w"].shape[0]
    c2 = raw["conv2_w"].shape[0]
    oh1, ow1 = (Hin - KSIZE) // STRIDE + 1, (Win - KSIZE) // STRIDE + 1
    oh2, ow2 = (oh1 - KSIZE) // STRIDE + 1, (ow1 - KSIZE) // STRIDE + 1
    H = raw["gru_w_hh"].shape[1]

    # W_ih columns come in torch NCHW flatten order (c2, oh2, ow2); regroup to
    # per-output-row chunks with lanes ordered (x, c) to match the kernel's f2.
    wih_c = (raw["gru_w_ih"].reshape(3 * H, c2, oh2, ow2)
             .transpose(2, 3, 1, 0)
             .reshape(oh2, ow2 * c2, 3 * H)
             .astype(jnp.bfloat16))

    A = num_actions
    npad = _round_up(A + 1, 128)     # lane-dense head output
    head_w = jnp.concatenate([raw["adv_w"], raw["val_w"]], axis=0).T  # (H, A+1)
    head_w = jnp.pad(head_w, ((0, 0), (0, npad - (A + 1)))).astype(jnp.bfloat16)
    head_b = jnp.pad(jnp.concatenate([raw["adv_b"], raw["val_b"]]),
                     (0, npad - (A + 1)))[None, :]

    return {
        "conv1_wd": _scatter_conv_weights(raw["conv1_w"], Win, STRIDE),
        "conv1_bt": jnp.tile(raw["conv1_b"], ow1)[None, :],
        "conv2_wd": _scatter_conv_weights(raw["conv2_w"], ow1, STRIDE),
        "conv2_bt": jnp.tile(raw["conv2_b"], ow2)[None, :],
        "gru_wih_c": wih_c,                                    # (oh2, ow2*c2, 3H) bf16
        "gru_bih": raw["gru_b_ih"][None, :],                   # (1, 3H)
        "gru_whh_t": raw["gru_w_hh"].T.astype(jnp.float32),    # (H, 3H) f32 (accuracy)
        "gru_bhh": raw["gru_b_hh"][None, :],                   # (1, 3H)
        "head_w": head_w,                                      # (H, npad) bf16
        "head_b": head_b,                                      # (1, npad)
        "num_actions": A,
    }


# ----------------------------------------------------------------------------
# DuelingDRQN forward
# ----------------------------------------------------------------------------
def dueling_drqn_forward(p, input_seq, hx=None):
    B, S, C, Hin, Win = input_seq.shape
    H = p["gru_whh_t"].shape[0]
    assert Hin % 2 == 0, "fused conv kernel assumes an even input height"

    # Single entry layout transform: rows ordered (height-parity, height//2,
    # seq), lanes ordered (width, channel) -> Win*C lanes (lane-dense here).
    x_rows = (input_seq
              .reshape(B, S, C, Hin // 2, 2, Win)
              .transpose(0, 4, 3, 1, 5, 2)
              .reshape(B, Hin * S, Win * C))

    h0 = (jnp.zeros((B, 1, H), jnp.float32) if hx is None
          else hx[0][:, None, :].astype(jnp.float32))
    h_last = fused_body_gru(p, x_rows, h0, S)                 # (B, 1, H)
    hidden = jnp.transpose(h_last, (1, 0, 2))                 # (1, B, H)

    # Dueling heads applied to the RAW reshaped input, as in the reference code.
    A = p["num_actions"]
    x_flat = input_seq.reshape(-1, Win)                       # (B*S*C*Hin, Win==H)
    q_pad = dueling_head(x_flat, p["head_w"], p["head_b"], A)
    q = q_pad[:, :A].reshape(B * S, C, Hin, A)
    return q, hidden


# ----------------------------------------------------------------------------
# Pure-JAX reference (for correctness checking; highest precision)
# ----------------------------------------------------------------------------
def reference_forward(params, input_seq, hx=None):
    HP = lax.Precision.HIGHEST
    B, S = input_seq.shape[0], input_seq.shape[1]
    x = input_seq.reshape((B * S,) + input_seq.shape[2:])
    dn = ("NCHW", "OIHW", "NCHW")
    f = jax.nn.relu(lax.conv_general_dilated(
        x, params["conv1_w"], (2, 2), "VALID", dimension_numbers=dn, precision=HP)
        + params["conv1_b"][None, :, None, None])
    f = jax.nn.relu(lax.conv_general_dilated(
        f, params["conv2_w"], (2, 2), "VALID", dimension_numbers=dn, precision=HP)
        + params["conv2_b"][None, :, None, None])
    feats = f.reshape(B, S, -1)

    H = params["gru_w_hh"].shape[1]
    h0 = jnp.zeros((B, H), jnp.float32) if hx is None else hx[0]
    w_ih, w_hh = params["gru_w_ih"], params["gru_w_hh"]
    b_ih, b_hh = params["gru_b_ih"], params["gru_b_hh"]

    def step(h, x_t):
        gx = jnp.dot(x_t, w_ih.T, precision=HP) + b_ih
        gh = jnp.dot(h, w_hh.T, precision=HP) + b_hh
        r = jax.nn.sigmoid(gx[:, :H] + gh[:, :H])
        z = jax.nn.sigmoid(gx[:, H:2 * H] + gh[:, H:2 * H])
        n = jnp.tanh(gx[:, 2 * H:] + r * gh[:, 2 * H:])
        return (1.0 - z) * n + z * h, None

    h_last, _ = lax.scan(step, h0, jnp.transpose(feats, (1, 0, 2)))
    adv = jnp.dot(x, params["adv_w"].T, precision=HP) + params["adv_b"]
    val = jnp.dot(x, params["val_w"].T, precision=HP) + params["val_b"]
    return adv + val - adv.mean(), h_last[None]


# ----------------------------------------------------------------------------
# Deterministic parameter init (synthetic; PyTorch-style uniform bounds)
# ----------------------------------------------------------------------------
def init_params(key, input_shape, num_actions, hidden_dim):
    C, Hin, Win = input_shape
    assert Win == hidden_dim, "module requires inputShape[-1] == hiddenDimensions"
    ks = jax.random.split(key, 12)

    def u(k, shape, fan_in):
        b = 1.0 / jnp.sqrt(jnp.float32(fan_in))
        return jax.random.uniform(k, shape, jnp.float32, -b, b)

    c1, c2, ksz = 16, 32, KSIZE
    oh1, ow1 = (Hin - ksz) // 2 + 1, (Win - ksz) // 2 + 1
    oh2, ow2 = (oh1 - ksz) // 2 + 1, (ow1 - ksz) // 2 + 1
    feat_size = c2 * oh2 * ow2

    return {
        "conv1_w": u(ks[0], (c1, C, ksz, ksz), C * ksz * ksz),
        "conv1_b": u(ks[1], (c1,), C * ksz * ksz),
        "conv2_w": u(ks[2], (c2, c1, ksz, ksz), c1 * ksz * ksz),
        "conv2_b": u(ks[3], (c2,), c1 * ksz * ksz),
        "gru_w_ih": u(ks[4], (3 * hidden_dim, feat_size), hidden_dim),
        "gru_w_hh": u(ks[5], (3 * hidden_dim, hidden_dim), hidden_dim),
        "gru_b_ih": u(ks[6], (3 * hidden_dim,), hidden_dim),
        "gru_b_hh": u(ks[7], (3 * hidden_dim,), hidden_dim),
        "adv_w": u(ks[8], (num_actions, hidden_dim), hidden_dim),
        "adv_b": u(ks[9], (num_actions,), hidden_dim),
        "val_w": u(ks[10], (1, hidden_dim), hidden_dim),
        "val_b": u(ks[11], (1,), hidden_dim),
    }


if __name__ == "__main__":
    key = jax.random.PRNGKey(0)
    B, S = 2, 4
    num_actions, hidden_dim = 6, 32
    input_shape = (4, 16, 32)                 # (C, H, W); W == hiddenDimensions

    pkey, xkey = jax.random.split(key)
    raw_params = init_params(pkey, input_shape, num_actions, hidden_dim)
    prepared = prepare_kernel_params(raw_params, input_shape, num_actions)
    input_seq = jax.random.normal(xkey, (B, S) + input_shape, jnp.float32)

    fwd = jax.jit(functools.partial(dueling_drqn_forward, prepared))
    q, hidden = fwd(input_seq)
    jax.block_until_ready((q, hidden))

    q_ref, h_ref = reference_forward(raw_params, input_seq)
    assert q.shape == (B * S,) + input_shape[:2] + (num_actions,)
    assert hidden.shape == (1, B, hidden_dim)
    assert jnp.allclose(q, q_ref, rtol=2e-2, atol=2e-2), \
        float(jnp.max(jnp.abs(q - q_ref)))
    assert jnp.allclose(hidden, h_ref, rtol=2e-2, atol=2e-2), \
        float(jnp.max(jnp.abs(hidden - h_ref)))
    print("KERNEL_OK")
</pallas_src>

<mosaic_0001>
module attributes {stable_mosaic.version = 11 : i64} {
  func.func @_body_gru_kernel(%arg0: i32, %arg1: memref<1x64x128xf32, #tpu.memory_space<vmem>>, %arg2: memref<3x128x240xbf16, #tpu.memory_space<vmem>>, %arg3: memref<1x240xf32, #tpu.memory_space<vmem>>, %arg4: memref<3x240x224xbf16, #tpu.memory_space<vmem>>, %arg5: memref<1x224xf32, #tpu.memory_space<vmem>>, %arg6: memref<3x224x96xbf16, #tpu.memory_space<vmem>>, %arg7: memref<1x96xf32, #tpu.memory_space<vmem>>, %arg8: memref<32x96xf32, #tpu.memory_space<vmem>>, %arg9: memref<1x96xf32, #tpu.memory_space<vmem>>, %arg10: memref<1x1x32xf32, #tpu.memory_space<vmem>>, %arg11: memref<1x1x32xf32, #tpu.memory_space<vmem>>) attributes {dimension_semantics = [#tpu.dimension_semantics<parallel>], iteration_bounds = array<i64: 2>, scalar_prefetch = 0 : i64, scratch_operands = 0 : i64, tpu.core_type = #tpu.core_type<tc>, window_params = [{transform_indices = @transform_0, window_bounds = array<i64: 1, 64, 128>}, {pipeline_mode = #tpu.pipeline_mode<synchronous>, transform_indices = @transform_1, window_bounds = array<i64: 3, 128, 240>}, {pipeline_mode = #tpu.pipeline_mode<synchronous>, transform_indices = @transform_2, window_bounds = array<i64: 1, 240>}, {pipeline_mode = #tpu.pipeline_mode<synchronous>, transform_indices = @transform_3, window_bounds = array<i64: 3, 240, 224>}, {pipeline_mode = #tpu.pipeline_mode<synchronous>, transform_indices = @transform_4, window_bounds = array<i64: 1, 224>}, {pipeline_mode = #tpu.pipeline_mode<synchronous>, transform_indices = @transform_5, window_bounds = array<i64: 3, 224, 96>}, {pipeline_mode = #tpu.pipeline_mode<synchronous>, transform_indices = @transform_6, window_bounds = array<i64: 1, 96>}, {pipeline_mode = #tpu.pipeline_mode<synchronous>, transform_indices = @transform_7, window_bounds = array<i64: 32, 96>}, {pipeline_mode = #tpu.pipeline_mode<synchronous>, transform_indices = @transform_8, window_bounds = array<i64: 1, 96>}, {transform_indices = @transform_9, window_bounds = array<i64: 1, 1, 32>}, {transform_indices = @transform_10, window_bounds = array<i64: 1, 1, 32>}]} {
    %c0 = arith.constant 0 : index
    %c0_0 = arith.constant 0 : index
    %c0_1 = arith.constant 0 : index
    %0 = vector.load %arg1[%c0, %c0_0, %c0_1] : memref<1x64x128xf32, #tpu.memory_space<vmem>>, vector<1x64x128xf32>
    %1 = vector.shape_cast %0 : vector<1x64x128xf32> to vector<64x128xf32>
    %2 = arith.truncf %1 : vector<64x128xf32> to vector<64x128xbf16>
    %c0_2 = arith.constant 0 : index
    %c0_3 = arith.constant 0 : index
    %3 = vector.load %arg3[%c0_2, %c0_3] : memref<1x240xf32, #tpu.memory_space<vmem>>, vector<1x240xf32>
    %4 = vector.extract_strided_slice %2 {offsets = [0, 0], sizes = [28, 128], strides = [1, 1]} : vector<64x128xbf16> to vector<28x128xbf16>
    %c0_4 = arith.constant 0 : index
    %c0_5 = arith.constant 0 : index
    %c0_6 = arith.constant 0 : index
    %5 = vector.load %arg2[%c0_4, %c0_5, %c0_6] : memref<3x128x240xbf16, #tpu.memory_space<vmem>>, vector<1x128x240xbf16>
    %6 = vector.shape_cast %5 : vector<1x128x240xbf16> to vector<128x240xbf16>
    %cst = arith.constant dense<0.000000e+00> : vector<28x240xf32>
    %7 = tpu.matmul %4, %6, %cst {dimension_numbers = #tpu.dot_dimension_numbers<[1], [0], [0], [1], [0, 0, 1, 1], [], []>} : vector<28x128xbf16>, vector<128x240xbf16>, vector<28x240xf32> -> vector<28x240xf32>
    %8 = vector.broadcast %3 : vector<1x240xf32> to vector<28x240xf32>
    %9 = arith.addf %8, %7 : vector<28x240xf32>
    %10 = vector.extract_strided_slice %2 {offsets = [32, 0], sizes = [28, 128], strides = [1, 1]} : vector<64x128xbf16> to vector<28x128xbf16>
    %c1 = arith.constant 1 : index
    %c0_7 = arith.constant 0 : index
    %c0_8 = arith.constant 0 : index
    %11 = vector.load %arg2[%c1, %c0_7, %c0_8] : memref<3x128x240xbf16, #tpu.memory_space<vmem>>, vector<1x128x240xbf16>
    %12 = vector.shape_cast %11 : vector<1x128x240xbf16> to vector<128x240xbf16>
    %cst_9 = arith.constant dense<0.000000e+00> : vector<28x240xf32>
    %13 = tpu.matmul %10, %12, %cst_9 {dimension_numbers = #tpu.dot_dimension_numbers<[1], [0], [0], [1], [0, 0, 1, 1], [], []>} : vector<28x128xbf16>, vector<128x240xbf16>, vector<28x240xf32> -> vector<28x240xf32>
    %14 = arith.addf %9, %13 : vector<28x240xf32>
    %15 = vector.extract_strided_slice %2 {offsets = [4, 0], sizes = [28, 128], strides = [1, 1]} : vector<64x128xbf16> to vector<28x128xbf16>
    %c2 = arith.constant 2 : index
    %c0_10 = arith.constant 0 : index
    %c0_11 = arith.constant 0 : index
    %16 = vector.load %arg2[%c2, %c0_10, %c0_11] : memref<3x128x240xbf16, #tpu.memory_space<vmem>>, vector<1x128x240xbf16>
    %17 = vector.shape_cast %16 : vector<1x128x240xbf16> to vector<128x240xbf16>
    %cst_12 = arith.constant dense<0.000000e+00> : vector<28x240xf32>
    %18 = tpu.matmul %15, %17, %cst_12 {dimension_numbers = #tpu.dot_dimension_numbers<[1], [0], [0], [1], [0, 0, 1, 1], [], []>} : vector<28x128xbf16>, vector<128x240xbf16>, vector<28x240xf32> -> vector<28x240xf32>
    %19 = arith.addf %14, %18 : vector<28x240xf32>
    %cst_13 = arith.constant 0.000000e+00 : f32
    %20 = vector.broadcast %cst_13 : f32 to vector<28x240xf32>
    %21 = arith.maximumf %19, %20 : vector<28x240xf32>
    %c0_14 = arith.constant 0 : index
    %c0_15 = arith.constant 0 : index
    %22 = vector.load %arg5[%c0_14, %c0_15] : memref<1x224xf32, #tpu.memory_space<vmem>>, vector<1x224xf32>
    %23 = vector.extract_strided_slice %21 {offsets = [0, 0], sizes = [4, 240], strides = [1, 1]} : vector<28x240xf32> to vector<4x240xf32>
    %24 = vector.extract_strided_slice %21 {offsets = [8, 0], sizes = [4, 240], strides = [1, 1]} : vector<28x240xf32> to vector<4x240xf32>
    %25 = vector.extract_strided_slice %21 {offsets = [16, 0], sizes = [4, 240], strides = [1, 1]} : vector<28x240xf32> to vector<4x240xf32>
    %26 = tpu.concatenate %23, %24, %25 in 0 : vector<4x240xf32>, vector<4x240xf32>, vector<4x240xf32> -> vector<12x240xf32>
    %27 = arith.truncf %26 : vector<12x240xf32> to vector<12x240xbf16>
    %c0_16 = arith.constant 0 : index
    %c0_17 = arith.constant 0 : index
    %c0_18 = arith.constant 0 : index
    %28 = vector.load %arg4[%c0_16, %c0_17, %c0_18] : memref<3x240x224xbf16, #tpu.memory_space<vmem>>, vector<1x240x224xbf16>
    %29 = vector.shape_cast %28 : vector<1x240x224xbf16> to vector<240x224xbf16>
    %cst_19 = arith.constant dense<0.000000e+00> : vector<12x224xf32>
    %30 = tpu.matmul %27, %29, %cst_19 {dimension_numbers = #tpu.dot_dimension_numbers<[1], [0], [0], [1], [0, 0, 1, 1], [], []>} : vector<12x240xbf16>, vector<240x224xbf16>, vector<12x224xf32> -> vector<12x224xf32>
    %31 = vector.broadcast %22 : vector<1x224xf32> to vector<12x224xf32>
    %32 = arith.addf %31, %30 : vector<12x224xf32>
    %33 = vector.extract_strided_slice %21 {offsets = [4, 0], sizes = [4, 240], strides = [1, 1]} : vector<28x240xf32> to vector<4x240xf32>
    %34 = vector.extract_strided_slice %21 {offsets = [12, 0], sizes = [4, 240], strides = [1, 1]} : vector<28x240xf32> to vector<4x240xf32>
    %35 = vector.extract_strided_slice %21 {offsets = [20, 0], sizes = [4, 240], strides = [1, 1]} : vector<28x240xf32> to vector<4x240xf32>
    %36 = tpu.concatenate %33, %34, %35 in 0 : vector<4x240xf32>, vector<4x240xf32>, vector<4x240xf32> -> vector<12x240xf32>
    %37 = arith.truncf %36 : vector<12x240xf32> to vector<12x240xbf16>
    %c1_20 = arith.constant 1 : index
    %c0_21 = arith.constant 0 : index
    %c0_22 = arith.constant 0 : index
    %38 = vector.load %arg4[%c1_20, %c0_21, %c0_22] : memref<3x240x224xbf16, #tpu.memory_space<vmem>>, vector<1x240x224xbf16>
    %39 = vector.shape_cast %38 : vector<1x240x224xbf16> to vector<240x224xbf16>
    %cst_23 = arith.constant dense<0.000000e+00> : vector<12x224xf32>
    %40 = tpu.matmul %37, %39, %cst_23 {dimension_numbers = #tpu.dot_dimension_numbers<[1], [0], [0], [1], [0, 0, 1, 1], [], []>} : vector<12x240xbf16>, vector<240x224xbf16>, vector<12x224xf32> -> vector<12x224xf32>
    %41 = arith.addf %32, %40 : vector<12x224xf32>
    %42 = vector.extract_strided_slice %21 {offsets = [8, 0], sizes = [4, 240], strides = [1, 1]} : vector<28x240xf32> to vector<4x240xf32>
    %43 = vector.extract_strided_slice %21 {offsets = [16, 0], sizes = [4, 240], strides = [1, 1]} : vector<28x240xf32> to vector<4x240xf32>
    %44 = vector.extract_strided_slice %21 {offsets = [24, 0], sizes = [4, 240], strides = [1, 1]} : vector<28x240xf32> to vector<4x240xf32>
    %45 = tpu.concatenate %42, %43, %44 in 0 : vector<4x240xf32>, vector<4x240xf32>, vector<4x240xf32> -> vector<12x240xf32>
    %46 = arith.truncf %45 : vector<12x240xf32> to vector<12x240xbf16>
    %c2_24 = arith.constant 2 : index
    %c0_25 = arith.constant 0 : index
    %c0_26 = arith.constant 0 : index
    %47 = vector.load %arg4[%c2_24, %c0_25, %c0_26] : memref<3x240x224xbf16, #tpu.memory_space<vmem>>, vector<1x240x224xbf16>
    %48 = vector.shape_cast %47 : vector<1x240x224xbf16> to vector<240x224xbf16>
    %cst_27 = arith.constant dense<0.000000e+00> : vector<12x224xf32>
    %49 = tpu.matmul %46, %48, %cst_27 {dimension_numbers = #tpu.dot_dimension_numbers<[1], [0], [0], [1], [0, 0, 1, 1], [], []>} : vector<12x240xbf16>, vector<240x224xbf16>, vector<12x224xf32> -> vector<12x224xf32>
    %50 = arith.addf %41, %49 : vector<12x224xf32>
    %cst_28 = arith.constant 0.000000e+00 : f32
    %51 = vector.broadcast %cst_28 : f32 to vector<12x224xf32>
    %52 = arith.maximumf %50, %51 : vector<12x224xf32>
    %c0_29 = arith.constant 0 : index
    %c0_30 = arith.constant 0 : index
    %53 = vector.load %arg7[%c0_29, %c0_30] : memref<1x96xf32, #tpu.memory_space<vmem>>, vector<1x96xf32>
    %54 = vector.extract_strided_slice %52 {offsets = [0, 0], sizes = [4, 224], strides = [1, 1]} : vector<12x224xf32> to vector<4x224xf32>
    %55 = arith.truncf %54 : vector<4x224xf32> to vector<4x224xbf16>
    %c0_31 = arith.constant 0 : index
    %c0_32 = arith.constant 0 : index
    %c0_33 = arith.constant 0 : index
    %56 = vector.load %arg6[%c0_31, %c0_32, %c0_33] : memref<3x224x96xbf16, #tpu.memory_space<vmem>>, vector<1x224x96xbf16>
    %57 = vector.shape_cast %56 : vector<1x224x96xbf16> to vector<224x96xbf16>
    %cst_34 = arith.constant dense<0.000000e+00> : vector<4x96xf32>
    %58 = tpu.matmul %55, %57, %cst_34 {dimension_numbers = #tpu.dot_dimension_numbers<[1], [0], [0], [1], [0, 0, 1, 1], [], []>} : vector<4x224xbf16>, vector<224x96xbf16>, vector<4x96xf32> -> vector<4x96xf32>
    %59 = vector.broadcast %53 : vector<1x96xf32> to vector<4x96xf32>
    %60 = arith.addf %59, %58 : vector<4x96xf32>
    %61 = vector.extract_strided_slice %52 {offsets = [4, 0], sizes = [4, 224], strides = [1, 1]} : vector<12x224xf32> to vector<4x224xf32>
    %62 = arith.truncf %61 : vector<4x224xf32> to vector<4x224xbf16>
    %c1_35 = arith.constant 1 : index
    %c0_36 = arith.constant 0 : index
    %c0_37 = arith.constant 0 : index
    %63 = vector.load %arg6[%c1_35, %c0_36, %c0_37] : memref<3x224x96xbf16, #tpu.memory_space<vmem>>, vector<1x224x96xbf16>
    %64 = vector.shape_cast %63 : vector<1x224x96xbf16> to vector<224x96xbf16>
    %cst_38 = arith.constant dense<0.000000e+00> : vector<4x96xf32>
    %65 = tpu.matmul %62, %64, %cst_38 {dimension_numbers = #tpu.dot_dimension_numbers<[1], [0], [0], [1], [0, 0, 1, 1], [], []>} : vector<4x224xbf16>, vector<224x96xbf16>, vector<4x96xf32> -> vector<4x96xf32>
    %66 = arith.addf %60, %65 : vector<4x96xf32>
    %67 = vector.extract_strided_slice %52 {offsets = [8, 0], sizes = [4, 224], strides = [1, 1]} : vector<12x224xf32> to vector<4x224xf32>
    %68 = arith.truncf %67 : vector<4x224xf32> to vector<4x224xbf16>
    %c2_39 = arith.constant 2 : index
    %c0_40 = arith.constant 0 : index
    %c0_41 = arith.constant 0 : index
    %69 = vector.load %arg6[%c2_39, %c0_40, %c0_41] : memref<3x224x96xbf16, #tpu.memory_space<vmem>>, vector<1x224x96xbf16>
    %70 = vector.shape_cast %69 : vector<1x224x96xbf16> to vector<224x96xbf16>
    %cst_42 = arith.constant dense<0.000000e+00> : vector<4x96xf32>
    %71 = tpu.matmul %68, %70, %cst_42 {dimension_numbers = #tpu.dot_dimension_numbers<[1], [0], [0], [1], [0, 0, 1, 1], [], []>} : vector<4x224xbf16>, vector<224x96xbf16>, vector<4x96xf32> -> vector<4x96xf32>
    %72 = arith.addf %66, %71 : vector<4x96xf32>
    %c0_43 = arith.constant 0 : index
    %c0_44 = arith.constant 0 : index
    %73 = vector.load %arg8[%c0_43, %c0_44] : memref<32x96xf32, #tpu.memory_space<vmem>>, vector<32x96xf32>
    %c0_45 = arith.constant 0 : index
    %c0_46 = arith.constant 0 : index
    %74 = vector.load %arg9[%c0_45, %c0_46] : memref<1x96xf32, #tpu.memory_space<vmem>>, vector<1x96xf32>
    %c0_47 = arith.constant 0 : index
    %c0_48 = arith.constant 0 : index
    %c0_49 = arith.constant 0 : index
    %75 = vector.load %arg10[%c0_47, %c0_48, %c0_49] : memref<1x1x32xf32, #tpu.memory_space<vmem>>, vector<1x1x32xf32>
    %76 = vector.shape_cast %75 : vector<1x1x32xf32> to vector<1x32xf32>
    %77 = vector.extract_strided_slice %72 {offsets = [0, 0], sizes = [1, 96], strides = [1, 1]} : vector<4x96xf32> to vector<1x96xf32>
    %cst_50 = arith.constant dense<0.000000e+00> : vector<1x96xf32>
    %78 = tpu.matmul %76, %73, %cst_50 {dimension_numbers = #tpu.dot_dimension_numbers<[1], [0], [0], [1], [0, 0, 1, 1], [], []>} : vector<1x32xf32>, vector<32x96xf32>, vector<1x96xf32> -> vector<1x96xf32>
    %79 = arith.addf %78, %74 : vector<1x96xf32>
    %80 = vector.extract_strided_slice %77 {offsets = [0, 0], sizes = [1, 32], strides = [1, 1]} : vector<1x96xf32> to vector<1x32xf32>
    %81 = vector.extract_strided_slice %79 {offsets = [0, 0], sizes = [1, 32], strides = [1, 1]} : vector<1x96xf32> to vector<1x32xf32>
    %82 = arith.addf %80, %81 : vector<1x32xf32>
    %83 = arith.negf %82 : vector<1x32xf32>
    %84 = math.exp %83 : vector<1x32xf32>
    %cst_51 = arith.constant 1.000000e+00 : f32
    %85 = vector.broadcast %cst_51 : f32 to vector<1x32xf32>
    %86 = arith.addf %85, %84 : vector<1x32xf32>
    %87 = arith.divf %85, %86 : vector<1x32xf32>
    %88 = vector.extract_strided_slice %77 {offsets = [0, 32], sizes = [1, 32], strides = [1, 1]} : vector<1x96xf32> to vector<1x32xf32>
    %89 = vector.extract_strided_slice %79 {offsets = [0, 32], sizes = [1, 32], strides = [1, 1]} : vector<1x96xf32> to vector<1x32xf32>
    %90 = arith.addf %88, %89 : vector<1x32xf32>
    %91 = arith.negf %90 : vector<1x32xf32>
    %92 = math.exp %91 : vector<1x32xf32>
    %cst_52 = arith.constant 1.000000e+00 : f32
    %93 = vector.broadcast %cst_52 : f32 to vector<1x32xf32>
    %94 = arith.addf %93, %92 : vector<1x32xf32>
    %95 = arith.divf %93, %94 : vector<1x32xf32>
    %96 = vector.extract_strided_slice %77 {offsets = [0, 64], sizes = [1, 32], strides = [1, 1]} : vector<1x96xf32> to vector<1x32xf32>
    %97 = vector.extract_strided_slice %79 {offsets = [0, 64], sizes = [1, 32], strides = [1, 1]} : vector<1x96xf32> to vector<1x32xf32>
    %98 = arith.mulf %87, %97 : vector<1x32xf32>
    %99 = arith.addf %96, %98 : vector<1x32xf32>
    %100 = math.tanh %99 : vector<1x32xf32>
    %cst_53 = arith.constant 1.000000e+00 : f32
    %101 = vector.broadcast %cst_53 : f32 to vector<1x32xf32>
    %102 = arith.subf %101, %95 : vector<1x32xf32>
    %103 = arith.mulf %102, %100 : vector<1x32xf32>
    %104 = arith.mulf %95, %76 : vector<1x32xf32>
    %105 = arith.addf %103, %104 : vector<1x32xf32>
    %106 = vector.extract_strided_slice %72 {offsets = [1, 0], sizes = [1, 96], strides = [1, 1]} : vector<4x96xf32> to vector<1x96xf32>
    %cst_54 = arith.constant dense<0.000000e+00> : vector<1x96xf32>
    %107 = tpu.matmul %105, %73, %cst_54 {dimension_numbers = #tpu.dot_dimension_numbers<[1], [0], [0], [1], [0, 0, 1, 1], [], []>} : vector<1x32xf32>, vector<32x96xf32>, vector<1x96xf32> -> vector<1x96xf32>
    %108 = arith.addf %107, %74 : vector<1x96xf32>
    %109 = vector.extract_strided_slice %106 {offsets = [0, 0], sizes = [1, 32], strides = [1, 1]} : vector<1x96xf32> to vector<1x32xf32>
    %110 = vector.extract_strided_slice %108 {offsets = [0, 0], sizes = [1, 32], strides = [1, 1]} : vector<1x96xf32> to vector<1x32xf32>
    %111 = arith.addf %109, %110 : vector<1x32xf32>
    %112 = arith.negf %111 : vector<1x32xf32>
    %113 = math.exp %112 : vector<1x32xf32>
    %cst_55 = arith.constant 1.000000e+00 : f32
    %114 = vector.broadcast %cst_55 : f32 to vector<1x32xf32>
    %115 = arith.addf %114, %113 : vector<1x32xf32>
    %116 = arith.divf %114, %115 : vector<1x32xf32>
    %117 = vector.extract_strided_slice %106 {offsets = [0, 32], sizes = [1, 32], strides = [1, 1]} : vector<1x96xf32> to vector<1x32xf32>
    %118 = vector.extract_strided_slice %108 {offsets = [0, 32], sizes = [1, 32], strides = [1, 1]} : vector<1x96xf32> to vector<1x32xf32>
    %119 = arith.addf %117, %118 : vector<1x32xf32>
    %120 = arith.negf %119 : vector<1x32xf32>
    %121 = math.exp %120 : vector<1x32xf32>
    %cst_56 = arith.constant 1.000000e+00 : f32
    %122 = vector.broadcast %cst_56 : f32 to vector<1x32xf32>
    %123 = arith.addf %122, %121 : vector<1x32xf32>
    %124 = arith.divf %122, %123 : vector<1x32xf32>
    %125 = vector.extract_strided_slice %106 {offsets = [0, 64], sizes = [1, 32], strides = [1, 1]} : vector<1x96xf32> to vector<1x32xf32>
    %126 = vector.extract_strided_slice %108 {offsets = [0, 64], sizes = [1, 32], strides = [1, 1]} : vector<1x96xf32> to vector<1x32xf32>
    %127 = arith.mulf %116, %126 : vector<1x32xf32>
    %128 = arith.addf %125, %127 : vector<1x32xf32>
    %129 = math.tanh %128 : vector<1x32xf32>
    %cst_57 = arith.constant 1.000000e+00 : f32
    %130 = vector.broadcast %cst_57 : f32 to vector<1x32xf32>
    %131 = arith.subf %130, %124 : vector<1x32xf32>
    %132 = arith.mulf %131, %129 : vector<1x32xf32>
    %133 = arith.mulf %124, %105 : vector<1x32xf32>
    %134 = arith.addf %132, %133 : vector<1x32xf32>
    %135 = vector.extract_strided_slice %72 {offsets = [2, 0], sizes = [1, 96], strides = [1, 1]} : vector<4x96xf32> to vector<1x96xf32>
    %cst_58 = arith.constant dense<0.000000e+00> : vector<1x96xf32>
    %136 = tpu.matmul %134, %73, %cst_58 {dimension_numbers = #tpu.dot_dimension_numbers<[1], [0], [0], [1], [0, 0, 1, 1], [], []>} : vector<1x32xf32>, vector<32x96xf32>, vector<1x96xf32> -> vector<1x96xf32>
    %137 = arith.addf %136, %74 : vector<1x96xf32>
    %138 = vector.extract_strided_slice %135 {offsets = [0, 0], sizes = [1, 32], strides = [1, 1]} : vector<1x96xf32> to vector<1x32xf32>
    %139 = vector.extract_strided_slice %137 {offsets = [0, 0], sizes = [1, 32], strides = [1, 1]} : vector<1x96xf32> to vector<1x32xf32>
    %140 = arith.addf %138, %139 : vector<1x32xf32>
    %141 = arith.negf %140 : vector<1x32xf32>
    %142 = math.exp %141 : vector<1x32xf32>
    %cst_59 = arith.constant 1.000000e+00 : f32
    %143 = vector.broadcast %cst_59 : f32 to vector<1x32xf32>
    %144 = arith.addf %143, %142 : vector<1x32xf32>
    %145 = arith.divf %143, %144 : vector<1x32xf32>
    %146 = vector.extract_strided_slice %135 {offsets = [0, 32], sizes = [1, 32], strides = [1, 1]} : vector<1x96xf32> to vector<1x32xf32>
    %147 = vector.extract_strided_slice %137 {offsets = [0, 32], sizes = [1, 32], strides = [1, 1]} : vector<1x96xf32> to vector<1x32xf32>
    %148 = arith.addf %146, %147 : vector<1x32xf32>
    %149 = arith.negf %148 : vector<1x32xf32>
    %150 = math.exp %149 : vector<1x32xf32>
    %cst_60 = arith.constant 1.000000e+00 : f32
    %151 = vector.broadcast %cst_60 : f32 to vector<1x32xf32>
    %152 = arith.addf %151, %150 : vector<1x32xf32>
    %153 = arith.divf %151, %152 : vector<1x32xf32>
    %154 = vector.extract_strided_slice %135 {offsets = [0, 64], sizes = [1, 32], strides = [1, 1]} : vector<1x96xf32> to vector<1x32xf32>
    %155 = vector.extract_strided_slice %137 {offsets = [0, 64], sizes = [1, 32], strides = [1, 1]} : vector<1x96xf32> to vector<1x32xf32>
    %156 = arith.mulf %145, %155 : vector<1x32xf32>
    %157 = arith.addf %154, %156 : vector<1x32xf32>
    %158 = math.tanh %157 : vector<1x32xf32>
    %cst_61 = arith.constant 1.000000e+00 : f32
    %159 = vector.broadcast %cst_61 : f32 to vector<1x32xf32>
    %160 = arith.subf %159, %153 : vector<1x32xf32>
    %161 = arith.mulf %160, %158 : vector<1x32xf32>
    %162 = arith.mulf %153, %134 : vector<1x32xf32>
    %163 = arith.addf %161, %162 : vector<1x32xf32>
    %164 = vector.extract_strided_slice %72 {offsets = [3, 0], sizes = [1, 96], strides = [1, 1]} : vector<4x96xf32> to vector<1x96xf32>
    %cst_62 = arith.constant dense<0.000000e+00> : vector<1x96xf32>
    %165 = tpu.matmul %163, %73, %cst_62 {dimension_numbers = #tpu.dot_dimension_numbers<[1], [0], [0], [1], [0, 0, 1, 1], [], []>} : vector<1x32xf32>, vector<32x96xf32>, vector<1x96xf32> -> vector<1x96xf32>
    %166 = arith.addf %165, %74 : vector<1x96xf32>
    %167 = vector.extract_strided_slice %164 {offsets = [0, 0], sizes = [1, 32], strides = [1, 1]} : vector<1x96xf32> to vector<1x32xf32>
    %168 = vector.extract_strided_slice %166 {offsets = [0, 0], sizes = [1, 32], strides = [1, 1]} : vector<1x96xf32> to vector<1x32xf32>
    %169 = arith.addf %167, %168 : vector<1x32xf32>
    %170 = arith.negf %169 : vector<1x32xf32>
    %171 = math.exp %170 : vector<1x32xf32>
    %cst_63 = arith.constant 1.000000e+00 : f32
    %172 = vector.broadcast %cst_63 : f32 to vector<1x32xf32>
    %173 = arith.addf %172, %171 : vector<1x32xf32>
    %174 = arith.divf %172, %173 : vector<1x32xf32>
    %175 = vector.extract_strided_slice %164 {offsets = [0, 32], sizes = [1, 32], strides = [1, 1]} : vector<1x96xf32> to vector<1x32xf32>
    %176 = vector.extract_strided_slice %166 {offsets = [0, 32], sizes = [1, 32], strides = [1, 1]} : vector<1x96xf32> to vector<1x32xf32>
    %177 = arith.addf %175, %176 : vector<1x32xf32>
    %178 = arith.negf %177 : vector<1x32xf32>
    %179 = math.exp %178 : vector<1x32xf32>
    %cst_64 = arith.constant 1.000000e+00 : f32
    %180 = vector.broadcast %cst_64 : f32 to vector<1x32xf32>
    %181 = arith.addf %180, %179 : vector<1x32xf32>
    %182 = arith.divf %180, %181 : vector<1x32xf32>
    %183 = vector.extract_strided_slice %164 {offsets = [0, 64], sizes = [1, 32], strides = [1, 1]} : vector<1x96xf32> to vector<1x32xf32>
    %184 = vector.extract_strided_slice %166 {offsets = [0, 64], sizes = [1, 32], strides = [1, 1]} : vector<1x96xf32> to vector<1x32xf32>
    %185 = arith.mulf %174, %184 : vector<1x32xf32>
    %186 = arith.addf %183, %185 : vector<1x32xf32>
    %187 = math.tanh %186 : vector<1x32xf32>
    %cst_65 = arith.constant 1.000000e+00 : f32
    %188 = vector.broadcast %cst_65 : f32 to vector<1x32xf32>
    %189 = arith.subf %188, %182 : vector<1x32xf32>
    %190 = arith.mulf %189, %187 : vector<1x32xf32>
    %191 = arith.mulf %182, %163 : vector<1x32xf32>
    %192 = arith.addf %190, %191 : vector<1x32xf32>
    %c0_66 = arith.constant 0 : index
    %c0_67 = arith.constant 0 : index
    %c0_68 = arith.constant 0 : index
    %193 = vector.load %arg11[%c0_66, %c0_67, %c0_68] : memref<1x1x32xf32, #tpu.memory_space<vmem>>, vector<1x1x32xf32>
    %194 = vector.shape_cast %193 : vector<1x1x32xf32> to vector<1x32xf32>
    %195 = vector.shape_cast %192 : vector<1x32xf32> to vector<1x1x32xf32>
    tpu.vector_store %arg11[%c0_66, %c0_67, %c0_68], %195 {strides = array<i32>} : memref<1x1x32xf32, #tpu.memory_space<vmem>>, vector<1x1x32xf32>,
    return
  }
  func.func @transform_0(%arg0: i32) -> (i32, i32, i32) {
    %c0_i32 = arith.constant 0 : i32
    %c0_i32_0 = arith.constant 0 : i32
    %c0_i32_1 = arith.constant 0 : i32
    return %arg0, %c0_i32, %c0_i32_0 : i32, i32, i32
  }
  func.func @transform_1(%arg0: i32) -> (i32, i32, i32) {
    %c0_i32 = arith.constant 0 : i32
    %c0_i32_0 = arith.constant 0 : i32
    %c0_i32_1 = arith.constant 0 : i32
    %c0_i32_2 = arith.constant 0 : i32
    return %c0_i32, %c0_i32_0, %c0_i32_1 : i32, i32, i32
  }
  func.func @transform_2(%arg0: i32) -> (i32, i32) {
    %c0_i32 = arith.constant 0 : i32
    %c0_i32_0 = arith.constant 0 : i32
    %c0_i32_1 = arith.constant 0 : i32
    return %c0_i32, %c0_i32_0 : i32, i32
  }
  func.func @transform_3(%arg0: i32) -> (i32, i32, i32) {
    %c0_i32 = arith.constant 0 : i32
    %c0_i32_0 = arith.constant 0 : i32
    %c0_i32_1 = arith.constant 0 : i32
    %c0_i32_2 = arith.constant 0 : i32
    return %c0_i32, %c0_i32_0, %c0_i32_1 : i32, i32, i32
  }
  func.func @transform_4(%arg0: i32) -> (i32, i32) {
    %c0_i32 = arith.constant 0 : i32
    %c0_i32_0 = arith.constant 0 : i32
    %c0_i32_1 = arith.constant 0 : i32
    return %c0_i32, %c0_i32_0 : i32, i32
  }
  func.func @transform_5(%arg0: i32) -> (i32, i32, i32) {
    %c0_i32 = arith.constant 0 : i32
    %c0_i32_0 = arith.constant 0 : i32
    %c0_i32_1 = arith.constant 0 : i32
    %c0_i32_2 = arith.constant 0 : i32
    return %c0_i32, %c0_i32_0, %c0_i32_1 : i32, i32, i32
  }
  func.func @transform_6(%arg0: i32) -> (i32, i32) {
    %c0_i32 = arith.constant 0 : i32
    %c0_i32_0 = arith.constant 0 : i32
    %c0_i32_1 = arith.constant 0 : i32
    return %c0_i32, %c0_i32_0 : i32, i32
  }
  func.func @transform_7(%arg0: i32) -> (i32, i32) {
    %c0_i32 = arith.constant 0 : i32
    %c0_i32_0 = arith.constant 0 : i32
    %c0_i32_1 = arith.constant 0 : i32
    return %c0_i32, %c0_i32_0 : i32, i32
  }
  func.func @transform_8(%arg0: i32) -> (i32, i32) {
    %c0_i32 = arith.constant 0 : i32
    %c0_i32_0 = arith.constant 0 : i32
    %c0_i32_1 = arith.constant 0 : i32
    return %c0_i32, %c0_i32_0 : i32, i32
  }
  func.func @transform_9(%arg0: i32) -> (i32, i32, i32) {
    %c0_i32 = arith.constant 0 : i32
    %c0_i32_0 = arith.constant 0 : i32
    %c0_i32_1 = arith.constant 0 : i32
    return %arg0, %c0_i32, %c0_i32_0 : i32, i32, i32
  }
  func.func @transform_10(%arg0: i32) -> (i32, i32, i32) {
    %c0_i32 = arith.constant 0 : i32
    %c0_i32_0 = arith.constant 0 : i32
    %c0_i32_1 = arith.constant 0 : i32
    return %arg0, %c0_i32, %c0_i32_0 : i32, i32, i32
  }
}

module attributes {stable_mosaic.version = 11 : i64} {
  func.func @_dueling_head_kernel(%arg0: memref<512x32xf32, #tpu.memory_space<vmem>>, %arg1: memref<32x128xbf16, #tpu.memory_space<vmem>>, %arg2: memref<1x128xf32, #tpu.memory_space<vmem>>, %arg3: memref<512x128xf32, #tpu.memory_space<vmem>>) attributes {dimension_semantics = [], scalar_prefetch = 0 : i64, scratch_operands = 0 : i64, tpu.core_type = #tpu.core_type<tc>} {
    %c0 = arith.constant 0 : index
    %c0_0 = arith.constant 0 : index
    %0 = vector.load %arg0[%c0, %c0_0] : memref<512x32xf32, #tpu.memory_space<vmem>>, vector<512x32xf32>
    %1 = arith.truncf %0 : vector<512x32xf32> to vector<512x32xbf16>
    %c0_1 = arith.constant 0 : index
    %c0_2 = arith.constant 0 : index
    %2 = vector.load %arg1[%c0_1, %c0_2] : memref<32x128xbf16, #tpu.memory_space<vmem>>, vector<32x128xbf16>
    %cst = arith.constant dense<0.000000e+00> : vector<512x128xf32>
    %3 = tpu.matmul %1, %2, %cst {dimension_numbers = #tpu.dot_dimension_numbers<[1], [0], [0], [1], [0, 0, 1, 1], [], []>} : vector<512x32xbf16>, vector<32x128xbf16>, vector<512x128xf32> -> vector<512x128xf32>
    %c0_3 = arith.constant 0 : index
    %c0_4 = arith.constant 0 : index
    %4 = vector.load %arg2[%c0_3, %c0_4] : memref<1x128xf32, #tpu.memory_space<vmem>>, vector<1x128xf32>
    %5 = vector.broadcast %4 : vector<1x128xf32> to vector<512x128xf32>
    %6 = arith.addf %3, %5 : vector<512x128xf32>
    %7 = vector.extract_strided_slice %6 {offsets = [0, 0], sizes = [512, 6], strides = [1, 1]} : vector<512x128xf32> to vector<512x6xf32>
    %8 = vector.extract_strided_slice %6 {offsets = [0, 6], sizes = [512, 1], strides = [1, 1]} : vector<512x128xf32> to vector<512x1xf32>
    %9 = vector.broadcast %8 : vector<512x1xf32> to vector<512x128xf32>
    %10 = arith.addf %6, %9 : vector<512x128xf32>
    %11 = vector.shape_cast %7 : vector<512x6xf32> to vector<1x512x6xf32>
    %cst_5 = arith.constant dense<0.000000e+00> : vector<1xf32>
    %12 = vector.multi_reduction <add>, %11, %cst_5 [1, 2] : vector<1x512x6xf32> to vector<1xf32>
    %13 = vector.shape_cast %12 : vector<1xf32> to vector<1x1x1xf32>
    %14 = vector.extract %13[0, 0, 0] : f32 from vector<1x1x1xf32>
    %cst_6 = arith.constant 3.072000e+03 : f32
    %15 = arith.divf %14, %cst_6 : f32
    %16 = vector.broadcast %15 : f32 to vector<512x128xf32>
    %17 = arith.subf %10, %16 : vector<512x128xf32>
    %c0_7 = arith.constant 0 : index
    %c0_8 = arith.constant 0 : index
    %18 = vector.load %arg3[%c0_7, %c0_8] : memref<512x128xf32, #tpu.memory_space<vmem>>, vector<512x128xf32>
    tpu.vector_store %arg3[%c0_7, %c0_8], %17 {strides = array<i32>} : memref<512x128xf32, #tpu.memory_space<vmem>>, vector<512x128xf32>,
    return
  }
}

</mosaic_0001>

<bundles_post_ra>
// kernel: dueling_drqn_forward.3
= control target key start
LH: loop header
LB: loop body
LE: loop exit
PB: predicated region body
PF: predicated region fallthrough
CT: control target
= control target key end

     0   :  { %vm131_vm0 = vcmask 261120   ;;  %vm781_vm1 = vcmask 48128   ;;  %s2263_s1 = inlined_call_operand.vmem [shape: bf16[32,128], index: 1, kind: input, shape index: {}]   ;;  %s2264_s0 = inlined_call_operand.vmem [shape: f32[512,32], index: 0, kind: input, shape index: {}]   ;;  %s2265_s2 = inlined_call_operand.vmem [shape: f32[1,128], index: 2, kind: input, shape index: {}]   ;;  %s2266_s3 = inlined_call_operand.vmem [shape: f32[512,128], index: 3, kind: output, shape index: {}]  }
   0x1   :  { %v1101_v0 = vld [vmem:[%s2263_s1 + $0x8] sm:$0xff]  ;;  %v1100_v1 = vld [vmem:[%s2263_s1] sm:$0xff]  ;;  %v17_v14 = vld [vmem:[%s2264_s0 + $0x10] sm:$0xff] }
   0x2   :  { %v15_v2 = vld [vmem:[%s2264_s0] sm:$0xff]  ;;  %v16_v3 = vld [vmem:[%s2264_s0 + $0x8] sm:$0xff]  ;;  %234 = vmatpush.bf16.msra.mxu0 %v1101_v0  ;;  %1102 = vmatpush.bf16.msra.mxu1 %v1101_v0  ;;  %v18_v15 = vld [vmem:[%s2264_s0 + $0x18] sm:$0xff] }
   0x3   :  { %v31_v4 = vld [vmem:[%s2264_s0 + $0x80] sm:$0xff]  ;;  %v32_v5 = vld [vmem:[%s2264_s0 + $0x88] sm:$0xff]  ;;  %1103 = vmatpush.bf16.msra.mxu2 %v1101_v0  ;;  %1104 = vmatpush.bf16.msra.mxu3 %v1101_v0  ;;  %v79_v10 = vpack.c.bf16 %v16_v3, %v15_v2  ;;  %v33_v16 = vld [vmem:[%s2264_s0 + $0x90] sm:$0xff]  ;;  %v80_v20 = vpack.c.bf16 %v18_v15, %v17_v14 }
   0x4   :  { %v47_v6 = vld [vmem:[%s2264_s0 + $0x100] sm:$0xff]  ;;  %v48_v7 = vld [vmem:[%s2264_s0 + $0x108] sm:$0xff]  ;;  %v87_v11 = vpack.c.bf16 %v32_v5, %v31_v4  ;;  %v34_v17 = vld [vmem:[%s2264_s0 + $0x98] sm:$0xff] }
   0x5   :  { %v63_v8 = vld [vmem:[%s2264_s0 + $0x180] sm:$0xff]  ;;  %v64_v9 = vld [vmem:[%s2264_s0 + $0x188] sm:$0xff]  ;;  %v95_v12 = vpack.c.bf16 %v48_v7, %v47_v6  ;;  %v49_v18 = vld [vmem:[%s2264_s0 + $0x110] sm:$0xff]  ;;  %v88_v21 = vpack.c.bf16 %v34_v17, %v33_v16  ;;  %v1120_v16 = vmov 6  }
   0x6   :  { %235 = vmatpush.bf16.msra.mxu0 %v1100_v1  ;;  %1105 = vmatpush.bf16.msra.mxu1 %v1100_v1  ;;  %v103_v13 = vpack.c.bf16 %v64_v9, %v63_v8  ;;  %v50_v19 = vld [vmem:[%s2264_s0 + $0x118] sm:$0xff]  ;;  %v19_v23 = vld [vmem:[%s2264_s0 + $0x20] sm:$0xff]  ;;  %v20_v24 = vld [vmem:[%s2264_s0 + $0x28] sm:$0xff] }
   0x7   :  { %1106 = vmatpush.bf16.msra.mxu2 %v1100_v1  ;;  %1107 = vmatpush.bf16.msra.mxu3 %v1100_v1  ;;  %v96_v22 = vpack.c.bf16 %v50_v19, %v49_v18  ;;  %v35_v25 = vld [vmem:[%s2264_s0 + $0xa0] sm:$0xff]  ;;  %v36_v26 = vld [vmem:[%s2264_s0 + $0xa8] sm:$0xff]  ;;  %v81_v29 = vpack.c.bf16 %v20_v24, %v19_v23  ;;  %v65_v32 = vld [vmem:[%s2264_s0 + $0x190] sm:$0xff] }
   0x8   :  { %v51_v27 = vld [vmem:[%s2264_s0 + $0x120] sm:$0xff]  ;;  %v52_v28 = vld [vmem:[%s2264_s0 + $0x128] sm:$0xff]  ;;  %v89_v30 = vpack.c.bf16 %v36_v26, %v35_v25  ;;  %v66_v33 = vld [vmem:[%s2264_s0 + $0x198] sm:$0xff]  ;;  %1115 = vset.pattern.permute.xlu1 %v1120_v16  ;;  %1114 = vset.pattern.permute.xlu0 %v1120_v16 }
   0x9   :  { %1068 = vmatmul.msk.bf16.vlgmr.msra.gmra.mxu0 %vm131_vm0, %v79_v10  ;;  %1076 = vmatmul.msk.bf16.vlgmr.msra.gmra.mxu1 %vm131_vm0, %v87_v11  ;;  %v97_v31 = vpack.c.bf16 %v52_v28, %v51_v27  ;;  %v104_v34 = vpack.c.bf16 %v66_v33, %v65_v32  ;;  %v21_v35 = vld [vmem:[%s2264_s0 + $0x30] sm:$0xff]  ;;  %v22_v36 = vld [vmem:[%s2264_s0 + $0x38] sm:$0xff]  ;;  %v67_v44 = vld [vmem:[%s2264_s0 + $0x1a0] sm:$0xff] }
   0xa   :  { %1084 = vmatmul.msk.bf16.vlgmr.msra.gmra.mxu2 %vm131_vm0, %v95_v12  ;;  %1092 = vmatmul.msk.bf16.vlgmr.msra.gmra.mxu3 %vm131_vm0, %v103_v13  ;;  %v37_v37 = vld [vmem:[%s2264_s0 + $0xb0] sm:$0xff]  ;;  %v38_v38 = vld [vmem:[%s2264_s0 + $0xb8] sm:$0xff]  ;;  %v82_v41 = vpack.c.bf16 %v22_v36, %v21_v35  ;;  %v68_v45 = vld [vmem:[%s2264_s0 + $0x1a8] sm:$0xff] }
   0xb   :  { %v53_v39 = vld [vmem:[%s2264_s0 + $0x130] sm:$0xff]  ;;  %v54_v40 = vld [vmem:[%s2264_s0 + $0x138] sm:$0xff]  ;;  %v90_v42 = vpack.c.bf16 %v38_v38, %v37_v37  ;;  %v105_v46 = vpack.c.bf16 %v68_v45, %v67_v44  ;;  %v23_v47 = vld [vmem:[%s2264_s0 + $0x40] sm:$0xff]  ;;  %1116 = vset.pattern.permute.xlu2 %v1120_v16 }
   0xc   :  { %v98_v43 = vpack.c.bf16 %v54_v40, %v53_v39  ;;  %v24_v48 = vld [vmem:[%s2264_s0 + $0x48] sm:$0xff]  ;;  %v39_v49 = vld [vmem:[%s2264_s0 + $0xc0] sm:$0xff]  ;;  %v69_v56 = vld [vmem:[%s2264_s0 + $0x1b0] sm:$0xff] }
   0xd   :  { %v40_v50 = vld [vmem:[%s2264_s0 + $0xc8] sm:$0xff]  ;;  %v55_v51 = vld [vmem:[%s2264_s0 + $0x140] sm:$0xff]  ;;  %v83_v53 = vpack.c.bf16 %v24_v48, %v23_v47  ;;  %v70_v57 = vld [vmem:[%s2264_s0 + $0x1b8] sm:$0xff] }
   0xe   :  { %v56_v52 = vld [vmem:[%s2264_s0 + $0x148] sm:$0xff]  ;;  %v91_v54 = vpack.c.bf16 %v40_v50, %v39_v49  ;;  %v106_v58 = vpack.c.bf16 %v70_v57, %v69_v56  ;;  %v25_v59 = vld [vmem:[%s2264_s0 + $0x50] sm:$0xff]  ;;  %v26_v60 = vld [vmem:[%s2264_s0 + $0x58] sm:$0xff] }
   0xf   :  { %v99_v55 = vpack.c.bf16 %v56_v52, %v55_v51  ;;  %v41_v61 = vld [vmem:[%s2264_s0 + $0xd0] sm:$0xff]  ;;  %v42_v62 = vld [vmem:[%s2264_s0 + $0xd8] sm:$0xff]  ;;  %v84_v1 = vpack.c.bf16 %v26_v60, %v25_v59  ;;  %v71_v4 = vld [vmem:[%s2264_s0 + $0x1c0] sm:$0xff] }
  0x10   :  { %v57_v63 = vld [vmem:[%s2264_s0 + $0x150] sm:$0xff]  ;;  %v58_v0 = vld [vmem:[%s2264_s0 + $0x158] sm:$0xff]  ;;  %v92_v2 = vpack.c.bf16 %v42_v62, %v41_v61  ;;  %v72_v5 = vld [vmem:[%s2264_s0 + $0x1c8] sm:$0xff] }
  0x11   :  { %v100_v3 = vpack.c.bf16 %v58_v0, %v57_v63  ;;  %v107_v6 = vpack.c.bf16 %v72_v5, %v71_v4  ;;  %v27_v7 = vld [vmem:[%s2264_s0 + $0x60] sm:$0xff]  ;;  %v28_v8 = vld [vmem:[%s2264_s0 + $0x68] sm:$0xff]  ;;  %v29_v17 = vld [vmem:[%s2264_s0 + $0x70] sm:$0xff] }
  0x12   :  { %v43_v9 = vld [vmem:[%s2264_s0 + $0xe0] sm:$0xff]  ;;  %v44_v10 = vld [vmem:[%s2264_s0 + $0xe8] sm:$0xff]  ;;  %v85_v13 = vpack.c.bf16 %v28_v8, %v27_v7  ;;  %v73_v18 = vld [vmem:[%s2264_s0 + $0x1d0] sm:$0xff] }
  0x13   :  { %v59_v11 = vld [vmem:[%s2264_s0 + $0x160] sm:$0xff]  ;;  %v60_v12 = vld [vmem:[%s2264_s0 + $0x168] sm:$0xff]  ;;  %v93_v14 = vpack.c.bf16 %v44_v10, %v43_v9  ;;  %v74_v19 = vld [vmem:[%s2264_s0 + $0x1d8] sm:$0xff] }
  0x14   :  { %v101_v15 = vpack.c.bf16 %v60_v12, %v59_v11  ;;  %v108_v23 = vpack.c.bf16 %v74_v19, %v73_v18  ;;  %v61_v24 = vld [vmem:[%s2264_s0 + $0x170] sm:$0xff]  ;;  %v62_v25 = vld [vmem:[%s2264_s0 + $0x178] sm:$0xff]  ;;  %v1367_v32 = vld [vmem:[%s2265_s2] ss:$0 sm:$0xff] }
  0x15   :  { %v102_v28 = vpack.c.bf16 %v62_v25, %v61_v24  ;;  %v78_v44 = vld [vmem:[%s2264_s0 + $0x1f8] sm:$0xff] }
  0x19   :  { %1069 = vmatmul.msk.bf16.gmra.mxu0 %vm131_vm0, %v80_v20  ;;  %1077 = vmatmul.msk.bf16.gmra.mxu1 %vm131_vm0, %v88_v21  ;;  %v30_v20 = vld [vmem:[%s2264_s0 + $0x78] sm:$0xff]  ;;  %v45_v21 = vld [vmem:[%s2264_s0 + $0xf0] sm:$0xff] }
  0x1a   :  { %1085 = vmatmul.msk.bf16.gmra.mxu2 %vm131_vm0, %v96_v22  ;;  %1093 = vmatmul.msk.bf16.gmra.mxu3 %vm131_vm0, %v104_v34  ;;  %v46_v22 = vld [vmem:[%s2264_s0 + $0xf8] sm:$0xff]  ;;  %v86_v26 = vpack.c.bf16 %v30_v20, %v29_v17 }
  0x1b   :  { %v94_v27 = vpack.c.bf16 %v46_v22, %v45_v21 }
  0x29   :  { %1070 = vmatmul.msk.bf16.gmra.mxu0 %vm131_vm0, %v81_v29  ;;  %1078 = vmatmul.msk.bf16.gmra.mxu1 %vm131_vm0, %v89_v30  ;;  %v75_v29 = vld [vmem:[%s2264_s0 + $0x1e0] sm:$0xff]  ;;  %v76_v30 = vld [vmem:[%s2264_s0 + $0x1e8] sm:$0xff] }
  0x2a   :  { %1086 = vmatmul.msk.bf16.gmra.mxu2 %vm131_vm0, %v97_v31  ;;  %1094 = vmatmul.msk.bf16.gmra.mxu3 %vm131_vm0, %v105_v46  ;;  %v109_v31 = vpack.c.bf16 %v76_v30, %v75_v29 }
  0x39   :  { %1071 = vmatmul.msk.bf16.gmra.mxu0 %vm131_vm0, %v82_v41  ;;  %1079 = vmatmul.msk.bf16.gmra.mxu1 %vm131_vm0, %v90_v42 }
  0x3a   :  { %1087 = vmatmul.msk.bf16.gmra.mxu2 %vm131_vm0, %v98_v43  ;;  %1095 = vmatmul.msk.bf16.gmra.mxu3 %vm131_vm0, %v106_v58  ;;  %v77_v43 = vld [vmem:[%s2264_s0 + $0x1f0] sm:$0xff] }
  0x3b   :  { %v110_v45 = vpack.c.bf16 %v78_v44, %v77_v43 }
  0x49   :  { %1072 = vmatmul.msk.bf16.gmra.mxu0 %vm131_vm0, %v83_v53  ;;  %1080 = vmatmul.msk.bf16.gmra.mxu1 %vm131_vm0, %v91_v54 }
  0x4a   :  { %1088 = vmatmul.msk.bf16.gmra.mxu2 %vm131_vm0, %v99_v55  ;;  %1096 = vmatmul.msk.bf16.gmra.mxu3 %vm131_vm0, %v107_v6 }
  0x59   :  { %1073 = vmatmul.msk.bf16.gmra.mxu0 %vm131_vm0, %v84_v1  ;;  %1081 = vmatmul.msk.bf16.gmra.mxu1 %vm131_vm0, %v92_v2 }
  0x5a   :  { %1089 = vmatmul.msk.bf16.gmra.mxu2 %vm131_vm0, %v100_v3  ;;  %1097 = vmatmul.msk.bf16.gmra.mxu3 %vm131_vm0, %v108_v23 }
  0x69   :  { %1074 = vmatmul.msk.bf16.gmra.mxu0 %vm131_vm0, %v85_v13  ;;  %1082 = vmatmul.msk.bf16.gmra.mxu1 %vm131_vm0, %v93_v14 }
  0x6a   :  { %1090 = vmatmul.msk.bf16.gmra.mxu2 %vm131_vm0, %v101_v15  ;;  %1098 = vmatmul.msk.bf16.gmra.mxu3 %vm131_vm0, %v109_v31 }
  0x79   :  { %1075 = vmatmul.msk.bf16.gmra.mxu0 %vm131_vm0, %v86_v26  ;;  %1083 = vmatmul.msk.bf16.gmra.mxu1 %vm131_vm0, %v94_v27 }
  0x7a   :  { %1091 = vmatmul.msk.bf16.gmra.mxu2 %vm131_vm0, %v102_v28  ;;  %1099 = vmatmul.msk.bf16.gmra.mxu3 %vm131_vm0, %v110_v45 }
  0x86   :  { %v237_v33 = vpop.f32.mrf.mxu0  ;;  %v277_v34 = vpop.f32.mrf.mxu1 }
  0x87   :  { %v1371_v35 = vadd.f32 %v1367_v32, %v237_v33  ;;  %v1374_v36 = vadd.f32 %v1367_v32, %v277_v34 }
  0x89   :  { %479 = vperm.xlu1 %1115, %v1374_v36   ;;  %399 = vperm.xlu0 %1114, %v1371_v35  }
  0x8d   :  { %v317_v37 = vpop.f32.mrf.mxu2  ;;  %v357_v38 = vpop.f32.mrf.mxu3 }
  0x8e   :  { %v1379_v39 = vadd.f32 %v1367_v32, %v317_v37  ;;  %v239_v40 = vpop.f32.mrf.mxu0  ;;  %v279_v41 = vpop.f32.mrf.mxu1  ;;  %v1382_v42 = vadd.f32 %v1367_v32, %v357_v38 }
  0x8f   :  { %v1393_v46 = vadd.f32 %v1367_v32, %v279_v41  ;;  %v1397_v50 = vadd.f32 %v1367_v32, %v239_v40 }
  0x90   :  { %2309 = vst [vmem:[#allocation2_spill] sm:$0xff] %v1379_v39  ;;  %559 = vperm.xlu2 %1116, %v1379_v39  }
  0x91   :  { %2310 = vst [vmem:[#allocation3_spill] sm:$0xff] %v1382_v42  ;;  %639 = vperm.xlu0 %1114, %v1382_v42  }
  0x95   :  { %v319_v47 = vpop.f32.mrf.mxu2  ;;  %v1434_v5 = vpop.f32.mrf.mxu3 }
  0x96   :  { %v242_v48 = vpop.f32.mrf.mxu0  ;;  %v282_v49 = vpop.f32.mrf.mxu1  ;;  %v1406_v52 = vadd.f32 %v1367_v32, %v319_v47 }
  0x97   :  { %v1400_v51 = vadd.f32 %v1367_v32, %v242_v48  ;;  %v1414_v57 = vadd.f32 %v1367_v32, %v282_v49 }
  0x98   :  { %484 = vperm.xlu2 %1116, %v1393_v46   ;;  %2311 = vst [vmem:[#allocation4_spill] sm:$0xff] %v1406_v52 }
  0x99   :  { %409 = vperm.xlu1 %1115, %v1400_v51   ;;  %404 = vperm.xlu0 %1114, %v1397_v50   ;;  %2313 = vst [vmem:[#allocation6_spill] sm:$0xff] %v1414_v57 }
  0x9d   :  { %v322_v53 = vpop.f32.mrf.mxu2  ;;  %v1448_v12 = vpop.f32.mrf.mxu3 }
  0x9e   :  { %v1409_v54 = vadd.f32 %v1367_v32, %v322_v53  ;;  %v244_v55 = vpop.f32.mrf.mxu0  ;;  %v284_v56 = vpop.f32.mrf.mxu1 }
  0x9f   :  { %v1420_v62 = vadd.f32 %v1367_v32, %v244_v55  ;;  %v1426_v63 = vadd.f32 %v1367_v32, %v284_v56  ;;  %v783_v56 = vsel %vm781_vm1, %v1397_v50, 0.0 }
  0xa0   :  { %2312 = vst [vmem:[#allocation5_spill] sm:$0xff] %v1409_v54 }
  0xa1   :  { %569 = vperm.xlu1 %1115, %v1409_v54   ;;  %564 = vperm.xlu0 %1114, %v1406_v52   ;;  %2315 = vst [vmem:[#allocation8_spill] sm:$0xff] %v1426_v63 }
  0xa5   :  { %v324_v58 = vpop.f32.mrf.mxu2  ;;  %v1465_v19 = vpop.f32.mrf.mxu3 }
  0xa6   :  { %v1417_v59 = vadd.f32 %v1367_v32, %v324_v58  ;;  %v247_v60 = vpop.f32.mrf.mxu0  ;;  %v287_v61 = vpop.f32.mrf.mxu1 }
  0xa7   :  { %v1429_v1 = vadd.f32 %v1367_v32, %v247_v60  ;;  %v1440_v6 = vadd.f32 %v1367_v32, %v287_v61  ;;  %v782_v60 = vsel %vm781_vm1, %v1371_v35, 0.0  ;;  %v785_v61 = vsel %vm781_vm1, %v1400_v51, 0.0 }
  0xa8   :  { %2314 = vst [vmem:[#allocation7_spill] sm:$0xff] %v1417_v59  ;;  %574 = vperm.xlu2 %1116, %v1417_v59  }
  0xa9   :  { %414 = vperm.xlu1 %1115, %v1420_v62   ;;  %489 = vperm.xlu0 %1114, %v1414_v57  }
  0xad   :  { %v327_v0 = vpop.f32.mrf.mxu2  ;;  %v1479_v26 = vpop.f32.mrf.mxu3 }
  0xae   :  { %v249_v2 = vpop.f32.mrf.mxu0  ;;  %v289_v3 = vpop.f32.mrf.mxu1  ;;  %v1432_v4 = vadd.f32 %v1367_v32, %v327_v0 }
  0xaf   :  { %v1443_v7 = vadd.f32 %v1367_v32, %v289_v3  ;;  %v1457_v15 = vadd.f32 %v1367_v32, %v249_v2  ;;  %v784_v3 = vadd.f32 %v783_v56, %v782_v60 }
  0xb0   :  { %2316 = vst [vmem:[#allocation9_spill] sm:$0xff] %v1432_v4  ;;  %419 = vperm.xlu2 %1116, %v1429_v1  }
  0xb1   :  { %494 = vperm.xlu1 %1115, %v1426_v63   ;;  %579 = vperm.xlu0 %1114, %v1432_v4  }
  0xb5   :  { %v329_v8 = vpop.f32.mrf.mxu2  ;;  %v1495_v37 = vpop.f32.mrf.mxu3 }
  0xb6   :  { %v252_v9 = vpop.f32.mrf.mxu0  ;;  %v292_v10 = vpop.f32.mrf.mxu1  ;;  %v1446_v11 = vadd.f32 %v1367_v32, %v329_v8 }
  0xb7   :  { %v1454_v13 = vadd.f32 %v1367_v32, %v292_v10  ;;  %v1460_v18 = vadd.f32 %v1367_v32, %v252_v9  ;;  %v787_v10 = vsel %vm781_vm1, %v1420_v62, 0.0 }
  0xb8   :  { %2317 = vst [vmem:[#allocation10_spill] sm:$0xff] %v1446_v11  ;;  %499 = vperm.xlu2 %1116, %v1440_v6  }
  0xb9   :  { %584 = vperm.xlu1 %1115, %v1446_v11   ;;  %504 = vperm.xlu0 %1114, %v1443_v7  }
  0xbd   :  { %v332_v14 = vpop.f32.mrf.mxu2  ;;  %v1515_v55 = vpop.f32.mrf.mxu3 }
  0xbe   :  { %v254_v16 = vpop.f32.mrf.mxu0  ;;  %v294_v17 = vpop.f32.mrf.mxu1  ;;  %v1468_v20 = vadd.f32 %v1367_v32, %v332_v14 }
  0xbf   :  { %v1474_v25 = vadd.f32 %v1367_v32, %v254_v16  ;;  %v1482_v27 = vadd.f32 %v1367_v32, %v294_v17  ;;  %v786_v16 = vadd.f32 %v785_v61, %v784_v3  ;;  %v789_v17 = vsel %vm781_vm1, %v1429_v1, 0.0 }
  0xc0   :  { %424 = vperm.xlu2 %1116, %v1457_v15   ;;  %2318 = vst [vmem:[#allocation11_spill] sm:$0xff] %v1468_v20 }
  0xc1   :  { %509 = vperm.xlu1 %1115, %v1454_v13   ;;  %429 = vperm.xlu0 %1114, %v1460_v18   ;;  %v795_v56 = vsel %vm781_vm1, %v1474_v25, 0.0 }
  0xc5   :  { %v334_v21 = vpop.f32.mrf.mxu2 }
  0xc6   :  { %v257_v22 = vpop.f32.mrf.mxu0  ;;  %v297_v23 = vpop.f32.mrf.mxu1  ;;  %v1471_v24 = vadd.f32 %v1367_v32, %v334_v21 }
  0xc7   :  { %v1485_v28 = vadd.f32 %v1367_v32, %v297_v23  ;;  %v1498_v38 = vadd.f32 %v1367_v32, %v257_v22  ;;  %v1543_v21 = vpop.f32.mrf.mxu3  ;;  %v788_v22 = vadd.f32 %v787_v10, %v786_v16  ;;  %v791_v23 = vsel %vm781_vm1, %v1457_v15, 0.0 }
  0xc8   :  { %2319 = vst [vmem:[#allocation12_spill] sm:$0xff] %v1471_v24  ;;  %589 = vperm.xlu2 %1116, %v1468_v20  }
  0xc9   :  { %434 = vperm.xlu1 %1115, %v1474_v25   ;;  %594 = vperm.xlu0 %1114, %v1471_v24  }
  0xcd   :  { %v1487_v29 = vpop.f32.mrf.mxu2 }
  0xce   :  { %v259_v30 = vpop.f32.mrf.mxu0  ;;  %v299_v31 = vpop.f32.mrf.mxu1 }
  0xcf   :  { %v1490_v33 = vadd.f32 %v1367_v32, %v299_v31  ;;  %v1501_v43 = vadd.f32 %v1367_v32, %v259_v30  ;;  %v790_v30 = vadd.f32 %v789_v17, %v788_v22  ;;  %v793_v31 = vsel %vm781_vm1, %v1460_v18, 0.0  ;;  %v1567_v16 = vpop.f32.mrf.mxu3 }
  0xd0   :  { %514 = vperm.xlu2 %1116, %v1482_v27  }
  0xd1   :  { %524 = vperm.xlu1 %1115, %v1490_v33   ;;  %519 = vperm.xlu0 %1114, %v1485_v28   ;;  %2320 = vst [vmem:[#allocation13_spill] sm:$0xff] %v1501_v43  ;;  %v799_v10 = vsel %vm781_vm1, %v1501_v43, 0.0 }
  0xd5   :  { %v339_v34 = vpop.f32.mrf.mxu2 }
  0xd6   :  { %v262_v40 = vpop.f32.mrf.mxu0  ;;  %v302_v41 = vpop.f32.mrf.mxu1  ;;  %v1510_v45 = vadd.f32 %v1367_v32, %v339_v34 }
  0xd7   :  { %v1504_v44 = vadd.f32 %v1367_v32, %v262_v40  ;;  %v1522_v58 = vadd.f32 %v1367_v32, %v302_v41  ;;  %v792_v40 = vadd.f32 %v791_v23, %v790_v30 }
  0xd8   :  { %439 = vperm.xlu2 %1116, %v1498_v38   ;;  %2322 = vst [vmem:[#allocation15_spill] sm:$0xff] %v1510_v45 }
  0xd9   :  { %2321 = vst [vmem:[#allocation14_spill] sm:$0xff] %v1504_v44  ;;  %449 = vperm.xlu1 %1115, %v1504_v44   ;;  %444 = vperm.xlu0 %1114, %v1501_v43   ;;  %v794_v3 = vadd.f32 %v793_v31, %v792_v40  ;;  %v801_v22 = vsel %vm781_vm1, %v1504_v44, 0.0  ;;  %v819_v43 = vsel %vm781_vm1, %v1426_v63, 0.0  ;;  %v1632_v63 = vadd.f32 %v1367_v32, %v1448_v12 }
  0xda   :  { %v1646_v12 = vadd.f32 %v1367_v32, %v1434_v5 }
  0xdb   :  { %2333 = vst [vmem:[#allocation26_spill] sm:$0xff] %v1632_v63 }
  0xdc   :  { %2334 = vst [vmem:[#allocation27_spill] sm:$0xff] %v1646_v12 }
  0xdd   :  { %v342_v47 = vpop.f32.mrf.mxu2 }
  0xde   :  { %v264_v48 = vpop.f32.mrf.mxu0  ;;  %v304_v49 = vpop.f32.mrf.mxu1  ;;  %v1513_v53 = vadd.f32 %v1367_v32, %v342_v47 }
  0xdf   :  { %v1529_v0 = vadd.f32 %v1367_v32, %v304_v49  ;;  %v1550_v41 = vadd.f32 %v1367_v32, %v264_v48  ;;  %v796_v48 = vadd.f32 %v795_v56, %v794_v3 }
  0xe0   :  { %2323 = vst [vmem:[#allocation16_spill] sm:$0xff] %v1513_v53  ;;  %604 = vperm.xlu2 %1116, %v1510_v45  }
  0xe1   :  { %609 = vperm.xlu0 %1114, %v1513_v53   ;;  %2324 = vst [vmem:[#allocation17_spill] sm:$0xff] %v1550_v41  ;;  %v803_v56 = vsel %vm781_vm1, %v1550_v41, 0.0 }
  0xe5   :  { %v1531_v2 = vpop.f32.mrf.mxu2 }
  0xe6   :  { %v267_v8 = vpop.f32.mrf.mxu0  ;;  %v307_v9 = vpop.f32.mrf.mxu1 }
  0xe7   :  { %v1536_v14 = vadd.f32 %v1367_v32, %v307_v9  ;;  %v1555_v60 = vadd.f32 %v1367_v32, %v267_v8  ;;  %v797_v9 = vsel %vm781_vm1, %v1498_v38, 0.0 }
  0xe8   :  { %529 = vperm.xlu2 %1116, %v1522_v58   ;;  %v798_v8 = vadd.f32 %v797_v9, %v796_v48 }
  0xe9   :  { %539 = vperm.xlu1 %1115, %v1536_v14   ;;  %534 = vperm.xlu0 %1114, %v1529_v0   ;;  %2325 = vst [vmem:[#allocation18_spill] sm:$0xff] %v1555_v60  ;;  %v837_v5 = vsel %vm781_vm1, %v1536_v14, 0.0 }
  0xea   :  { %v800_v30 = vadd.f32 %v799_v10, %v798_v8 }
  0xec   :  { %v802_v3 = vadd.f32 %v801_v22, %v800_v30 }
  0xed   :  { %v347_v34 = vpop.f32.mrf.mxu2 }
  0xee   :  { %v269_v47 = vpop.f32.mrf.mxu0  ;;  %v309_v49 = vpop.f32.mrf.mxu1  ;;  %v1570_v17 = vadd.f32 %v1367_v32, %v347_v34  ;;  %v805_v34 = vsel %vm781_vm1, %v1555_v60, 0.0  ;;  %v804_v48 = vadd.f32 %v803_v56, %v802_v3 }
  0xef   :  { %v1558_v61 = vadd.f32 %v1367_v32, %v269_v47 }
  0xf0   :  { %454 = vperm.xlu2 %1116, %v1550_v41   ;;  %2327 = vst [vmem:[#allocation20_spill] sm:$0xff] %v1570_v17  ;;  %v806_v8 = vadd.f32 %v805_v34, %v804_v48 }
  0xf1   :  { %2326 = vst [vmem:[#allocation19_spill] sm:$0xff] %v1558_v61  ;;  %464 = vperm.xlu1 %1115, %v1558_v61   ;;  %459 = vperm.xlu0 %1114, %v1555_v60   ;;  %v807_v10 = vsel %vm781_vm1, %v1558_v61, 0.0  ;;  %v1596_v60 = vpop.f32.mrf.mxu3 }
  0xf5   :  { %v349_v23 = vpop.f32.mrf.mxu2 }
  0xf6   :  { %v272_v31 = vpop.f32.mrf.mxu0  ;;  %v312_v40 = vpop.f32.mrf.mxu1  ;;  %v1575_v47 = vadd.f32 %v1367_v32, %v349_v23  ;;  %v1589_v23 = vadd.f32 %v1367_v32, %v309_v49 }
  0xf7   :  { %v1583_v9 = vadd.f32 %v1367_v32, %v272_v31  ;;  %v1594_v30 = vadd.f32 %v1367_v32, %v312_v40  ;;  %v808_v31 = vadd.f32 %v807_v10, %v806_v8 }
  0xf8   :  { %2328 = vst [vmem:[#allocation21_spill] sm:$0xff] %v1575_v47  ;;  %619 = vperm.xlu2 %1116, %v1570_v17  }
  0xf9   :  { %624 = vperm.xlu0 %1114, %v1575_v47   ;;  %2329 = vst [vmem:[#allocation22_spill] sm:$0xff] %v1589_v23  ;;  %v809_v22 = vsel %vm781_vm1, %v1583_v9, 0.0  ;;  %v382_v61 = vpop.f32.mrf.mxu3 }
  0xfa   :  { %2330 = vst [vmem:[#allocation23_spill] sm:$0xff] %v1594_v30  ;;  %v810_v49 = vadd.f32 %v809_v22, %v808_v31  ;;  %v817_v22 = vsel %vm781_vm1, %v1414_v57, 0.0 }
  0xfd   :  { %v1604_v34 = vpop.f32.mrf.mxu2 }
  0xfe   :  { %v274_v41 = vpop.f32.mrf.mxu0  ;;  %v314_v44 = vpop.f32.mrf.mxu1 }
  0xff   :  { %v1599_v56 = vadd.f32 %v1367_v32, %v274_v41  ;;  %v1602_v3 = vadd.f32 %v1367_v32, %v314_v44  ;;  %v813_v41 = vsel %vm781_vm1, %v1374_v36, 0.0  ;;  %v815_v44 = vsel %vm781_vm1, %v1393_v46, 0.0 }
 0x100   :  { %544 = vperm.xlu2 %1116, %v1589_v23  }
 0x101   :  { %2331 = vst [vmem:[#allocation24_spill] sm:$0xff] %v1602_v3  ;;  %v811_v40 = vsel %vm781_vm1, %v1599_v56, 0.0  ;;  %554 = vperm.xlu1 %1115, %v1602_v3   ;;  %549 = vperm.xlu0 %1114, %v1594_v30  }
 0x102   :  { %v812_v48 = vadd.f32 %v811_v40, %v810_v49 }
 0x104   :  { %v814_v10 = vadd.f32 %v813_v41, %v812_v48  ;;  %v821_v48 = vsel %vm781_vm1, %v1440_v6, 0.0 }
 0x105   :  { %v354_v49 = vpop.f32.mrf.mxu2 }
 0x106   :  { %v816_v8 = vadd.f32 %v815_v44, %v814_v10  ;;  %v1624_v10 = vadd.f32 %v1367_v32, %v354_v49  ;;  %v823_v44 = vsel %vm781_vm1, %v1443_v7, 0.0  ;;  %v1638_v49 = vpop.f32.mrf.mxu3 }
 0x108   :  { %v818_v31 = vadd.f32 %v817_v22, %v816_v8  ;;  %469 = vperm.xlu2 %1116, %v1583_v9   ;;  %2332 = vst [vmem:[#allocation25_spill] sm:$0xff] %v1624_v10  ;;  %v825_v22 = vsel %vm781_vm1, %v1454_v13, 0.0 }
 0x109   :  { %474 = vperm.xlu0 %1114, %v1599_v56  }
 0x10a   :  { %v820_v40 = vadd.f32 %v819_v43, %v818_v31  ;;  %v827_v43 = vsel %vm781_vm1, %v1482_v27, 0.0 }
 0x10c   :  { %v822_v41 = vadd.f32 %v821_v48, %v820_v40  ;;  %v829_v40 = vsel %vm781_vm1, %v1485_v28, 0.0 }
 0x10e   :  { %v824_v8 = vadd.f32 %v823_v44, %v822_v41  ;;  %v831_v41 = vsel %vm781_vm1, %v1490_v33, 0.0 }
 0x110   :  { %v826_v57 = vadd.f32 %v825_v22, %v824_v8  ;;  %634 = vperm.xlu2 %1116, %v1624_v10   ;;  %v833_v8 = vsel %vm781_vm1, %v1522_v58, 0.0 }
 0x111   :  { %649 = vperm.xlu0 %1114, %v1632_v63  }
 0x112   :  { %v828_v31 = vadd.f32 %v827_v43, %v826_v57  ;;  %v1652_v57 = vadd.f32 %v1367_v32, %v1479_v26  ;;  %v835_v43 = vsel %vm781_vm1, %v1529_v0, 0.0  ;;  %v1666_v26 = vadd.f32 %v1367_v32, %v1465_v19 }
 0x113   :  { %v845_v19 = vsel %vm781_vm1, %v1379_v39, 0.0 }
 0x114   :  { %v830_v48 = vadd.f32 %v829_v40, %v828_v31  ;;  %2335 = vst [vmem:[#allocation28_spill] sm:$0xff] %v1652_v57 }
 0x115   :  { %2336 = vst [vmem:[#allocation29_spill] sm:$0xff] %v1666_v26 }
 0x116   :  { %v832_v44 = vadd.f32 %v831_v41, %v830_v48  ;;  %v1660_v48 = vpop.f32.mrf.mxu3  ;;  %v839_v41 = vsel %vm781_vm1, %v1589_v23, 0.0 }
 0x118   :  { %v834_v22 = vadd.f32 %v833_v8, %v832_v44  ;;  %644 = vperm.xlu2 %1116, %v1646_v12   ;;  %v841_v8 = vsel %vm781_vm1, %v1594_v30, 0.0 }
 0x119   :  { %659 = vperm.xlu0 %1114, %v1652_v57  }
 0x11a   :  { %v836_v31 = vadd.f32 %v835_v43, %v834_v22  ;;  %v1672_v22 = vadd.f32 %v1367_v32, %v1515_v55  ;;  %v1684_v55 = vadd.f32 %v1367_v32, %v1567_v16  ;;  %v853_v16 = vsel %vm781_vm1, %v1432_v4, 0.0 }
 0x11c   :  { %v838_v40 = vadd.f32 %v837_v5, %v836_v31  ;;  %2337 = vst [vmem:[#allocation30_spill] sm:$0xff] %v1672_v22  ;;  %v843_v31 = vsel %vm781_vm1, %v1602_v3, 0.0 }
 0x11d   :  { %2338 = vst [vmem:[#allocation31_spill] sm:$0xff] %v1684_v55 }
 0x11e   :  { %v840_v44 = vadd.f32 %v839_v41, %v838_v40  ;;  %v847_v41 = vsel %vm781_vm1, %v1406_v52, 0.0  ;;  %v389_v3 = vpop.f32.mrf.mxu3 }
 0x120   :  { %v842_v43 = vadd.f32 %v841_v8, %v840_v44  ;;  %654 = vperm.xlu2 %1116, %v1666_v26   ;;  %v1688_v44 = vadd.f32 %v1367_v32, %v1495_v37  ;;  %v855_v37 = vsel %vm781_vm1, %v1446_v11, 0.0 }
 0x121   :  { %669 = vperm.xlu0 %1114, %v1672_v22  }
 0x122   :  { %v844_v5 = vadd.f32 %v843_v31, %v842_v43  ;;  %2339 = vst [vmem:[#allocation32_spill] sm:$0xff] %v1688_v44  ;;  %v849_v43 = vsel %vm781_vm1, %v1409_v54, 0.0 }
 0x124   :  { %v846_v40 = vadd.f32 %v845_v19, %v844_v5  ;;  %v851_v5 = vsel %vm781_vm1, %v1417_v59, 0.0 }
 0x126   :  { %v848_v8 = vadd.f32 %v847_v41, %v846_v40  ;;  %v1701_v40 = vadd.f32 %v1367_v32, %v382_v61  ;;  %v859_v61 = vsel %vm781_vm1, %v1471_v24, 0.0  ;;  %v1730_v24 = vadd.f32 %v1367_v32, %v1596_v60 }
 0x127   :  { %v1742_v60 = vadd.f32 %v1367_v32, %v1604_v34  ;;  %v875_v34 = vsel %vm781_vm1, %v1624_v10, 0.0 }
 0x128   :  { %v850_v31 = vadd.f32 %v849_v43, %v848_v8  ;;  %664 = vperm.xlu2 %1116, %v1688_v44   ;;  %2340 = vst [vmem:[#allocation33_spill] sm:$0xff] %v1701_v40  ;;  %v1705_v8 = vadd.f32 %v1367_v32, %v1543_v21  ;;  %v857_v43 = vsel %vm781_vm1, %v1468_v20, 0.0 }
 0x129   :  { %679 = vperm.xlu0 %1114, %v1684_v55   ;;  %2345 = vst [vmem:[#allocation38_spill] sm:$0xff] %v1730_v24 }
 0x12a   :  { %v852_v19 = vadd.f32 %v851_v5, %v850_v31  ;;  %2341 = vst [vmem:[#allocation34_spill] sm:$0xff] %v1705_v8  ;;  %v1711_v31 = vadd.f32 %v1367_v32, %v1487_v29  ;;  %v1723_v29 = vadd.f32 %v1367_v32, %v1531_v2 }
 0x12b   :  { %2346 = vst [vmem:[#allocation39_spill] sm:$0xff] %v1742_v60 }
 0x12c   :  { %v854_v52 = vadd.f32 %v853_v16, %v852_v19  ;;  %2342 = vst [vmem:[#allocation35_spill] sm:$0xff] %v1711_v31  ;;  %v392_v19 = vpop.f32.mrf.mxu3  ;;  %v861_v21 = vsel %vm781_vm1, %v1711_v31, 0.0 }
 0x12d   :  { %2343 = vst [vmem:[#allocation36_spill] sm:$0xff] %v1723_v29 }
 0x12e   :  { %v856_v41 = vadd.f32 %v855_v37, %v854_v52  ;;  %v863_v37 = vsel %vm781_vm1, %v1510_v45, 0.0 }
 0x130   :  { %v858_v5 = vadd.f32 %v857_v43, %v856_v41  ;;  %674 = vperm.xlu2 %1116, %v1705_v8   ;;  %v1726_v41 = vadd.f32 %v1367_v32, %v389_v3  ;;  %v869_v3 = vsel %vm781_vm1, %v1570_v17, 0.0  ;;  %v1121_v17 = vmov 3072.0  }
 0x131   :  { %689 = vperm.xlu0 %1114, %v1701_v40   ;;  %1118 = vrcp.f32 %v1121_v17 }
 0x132   :  { %v860_v52 = vadd.f32 %v859_v61, %v858_v5  ;;  %2344 = vst [vmem:[#allocation37_spill] sm:$0xff] %v1726_v41  ;;  %v865_v5 = vsel %vm781_vm1, %v1513_v53, 0.0  ;;  %v1751_v53 = vadd.f32 %v1367_v32, %v1638_v49  ;;  %v879_v49 = vsel %vm781_vm1, %v1646_v12, 0.0 }
 0x134   :  { %v862_v16 = vadd.f32 %v861_v21, %v860_v52  ;;  %v867_v52 = vsel %vm781_vm1, %v1723_v29, 0.0  ;;  %v394_v21 = vpop.f32.mrf.mxu3  ;;  %2348 = vst [vmem:[#allocation41_spill] sm:$0xff] %v1751_v53 }
 0x136   :  { %v864_v43 = vadd.f32 %v863_v37, %v862_v16  ;;  %v871_v37 = vsel %vm781_vm1, %v1575_v47, 0.0 }
 0x138   :  { %v866_v61 = vadd.f32 %v865_v5, %v864_v43  ;;  %684 = vperm.xlu2 %1116, %v1730_v24   ;;  %v1747_v43 = vadd.f32 %v1367_v32, %v394_v21  ;;  %v877_v21 = vsel %vm781_vm1, %v1382_v42, 0.0 }
 0x139   :  { %704 = vperm.xlu0 %1114, %v1726_v41  }
 0x13a   :  { %v868_v2 = vadd.f32 %v867_v52, %v866_v61  ;;  %2347 = vst [vmem:[#allocation40_spill] sm:$0xff] %v1747_v43  ;;  %v873_v61 = vsel %vm781_vm1, %v1742_v60, 0.0 }
 0x13c   :  { %v870_v16 = vadd.f32 %v869_v3, %v868_v2 }
 0x13e   :  { %v872_v5 = vadd.f32 %v871_v37, %v870_v16  ;;  %v1762_v16 = vadd.f32 %v1367_v32, %v392_v19  ;;  %v887_v19 = vsel %vm781_vm1, %v1688_v44, 0.0 }
 0x140   :  { %v874_v52 = vadd.f32 %v873_v61, %v872_v5  ;;  %694 = vperm.xlu2 %1116, %v1751_v53   ;;  %2349 = vst [vmem:[#allocation42_spill] sm:$0xff] %v1762_v16  ;;  %v881_v5 = vsel %vm781_vm1, %v1632_v63, 0.0 }
 0x141   :  { %714 = vperm.xlu0 %1114, %v1747_v43  }
 0x142   :  { %v876_v2 = vadd.f32 %v875_v34, %v874_v52  ;;  %v883_v52 = vsel %vm781_vm1, %v1666_v26, 0.0  ;;  %v893_v26 = vsel %vm781_vm1, %v1684_v55, 0.0 }
 0x144   :  { %v878_v3 = vadd.f32 %v877_v21, %v876_v2  ;;  %v885_v2 = vsel %vm781_vm1, %v1652_v57, 0.0 }
 0x146   :  { %v880_v37 = vadd.f32 %v879_v49, %v878_v3  ;;  %v889_v3 = vsel %vm781_vm1, %v1672_v22, 0.0 }
 0x148   :  { %v882_v61 = vadd.f32 %v881_v5, %v880_v37  ;;  %709 = vperm.xlu2 %1116, %v1762_v16   ;;  %v891_v37 = vsel %vm781_vm1, %v1705_v8, 0.0 }
 0x14a   :  { %v884_v34 = vadd.f32 %v883_v52, %v882_v61  ;;  %v895_v52 = vsel %vm781_vm1, %v1730_v24, 0.0 }
 0x14c   :  { %v886_v21 = vadd.f32 %v885_v2, %v884_v34  ;;  %v897_v2 = vsel %vm781_vm1, %v1701_v40, 0.0 }
 0x14e   :  { %v888_v42 = vadd.f32 %v887_v19, %v886_v21  ;;  %v1787_v21 = vadd.f32 %v1367_v32, %v1660_v48  ;;  %v899_v19 = vsel %vm781_vm1, %v1751_v53, 0.0  ;;  %v907_v48 = vsel %vm781_vm1, %v1747_v43, 0.0 }
 0x150   :  { %v890_v49 = vadd.f32 %v889_v3, %v888_v42  ;;  %2350 = vst [vmem:[#allocation43_spill] sm:$0xff] %v1787_v21 }
 0x152   :  { %v892_v5 = vadd.f32 %v891_v37, %v890_v49  ;;  %v901_v49 = vsel %vm781_vm1, %v1787_v21, 0.0  ;;  %v1793_v37 = vpop.permute.xlu1 %479 }
 0x154   :  { %v894_v61 = vadd.f32 %v893_v26, %v892_v5  ;;  %v903_v5 = vsel %vm781_vm1, %v1726_v41, 0.0 }
 0x156   :  { %v896_v34 = vadd.f32 %v895_v52, %v894_v61  ;;  %v905_v52 = vsel %vm781_vm1, %v1762_v16, 0.0 }
 0x158   :  { %v898_v42 = vadd.f32 %v897_v2, %v896_v34 }
 0x15a   :  { %v900_v3 = vadd.f32 %v899_v19, %v898_v42  ;;  %v1801_v2 = vpop.permute.xlu1 %409  ;;  %v1803_v42 = vpop.permute.xlu0 %399 }
 0x15c   :  { %v902_v26 = vadd.f32 %v901_v49, %v900_v3  ;;  %v1809_v49 = vpop.permute.xlu2 %559 }
 0x15d   :  { %2353 = vst [vmem:[#allocation46_spill] sm:$0xff] %v1809_v49 }
 0x15e   :  { %v904_v61 = vadd.f32 %v903_v5, %v902_v26 }
 0x160   :  { %v906_v32 = vadd.f32 %v905_v52, %v904_v61 }
 0x162   :  { %v908_v34 = vadd.f32 %v907_v48, %v906_v32  ;;  %v1805_v19 = vpop.permute.xlu1 %569  ;;  %v1807_v3 = vpop.permute.xlu0 %639 }
 0x163   :  { %2351 = vst [vmem:[#allocation44_spill] sm:$0xff] %v1805_v19 }
 0x164   :  { %909 = vadd.xlane.f32.xlu1 %v908_v34  ;;  %2352 = vst [vmem:[#allocation45_spill] sm:$0xff] %v1807_v3  ;;  %v1816_v61 = vpop.permute.xlu2 %484 }
 0x16a   :  { %v1811_v26 = vpop.permute.xlu1 %414  ;;  %v1814_v5 = vpop.permute.xlu0 %404 }
 0x16c   :  { %v1821_v32 = vpop.permute.xlu2 %574 }
 0x16d   :  { %2354 = vst [vmem:[#allocation47_spill] sm:$0xff] %v1821_v32 }
 0x172   :  { %v1818_v52 = vpop.permute.xlu1 %494  ;;  %v1823_v48 = vpop.permute.xlu0 %564 }
 0x173   :  { %2355 = vst [vmem:[#allocation48_spill] sm:$0xff] %v1823_v48 }
 0x174   :  { %v1828_v43 = vpop.permute.xlu2 %419 }
 0x17a   :  { %v1825_v34 = vpop.permute.xlu1 %584  ;;  %v1830_v16 = vpop.permute.xlu0 %489 }
 0x17b   :  { %2356 = vst [vmem:[#allocation49_spill] sm:$0xff] %v1825_v34 }
 0x17c   :  { %v1835_v53 = vpop.permute.xlu2 %499 }
 0x17d   :  { %599 = vperm.xlu1 %1115, %v1711_v31  }
 0x182   :  { %v1833_v41 = vpop.permute.xlu1 %509  ;;  %v1837_v40 = vpop.permute.xlu0 %579 }
 0x183   :  { %2357 = vst [vmem:[#allocation50_spill] sm:$0xff] %v1837_v40 }
 0x184   :  { %v425_v55 = vpop.permute.xlu2 %424 }
 0x185   :  { %614 = vperm.xlu1 %1115, %v1723_v29   ;;  %v1119_v29 = vpop.eup %1118 }
 0x186   :  { %v919_v20 = vmul.f32 3072.0, %v1119_v29  ;;  %vm923_vm2 = vweird.f32 %v1119_v29 }
 0x188   :  { %v920_v34 = vsub.f32 1.0, %v919_v20 }
 0x18a   :  { %v1839_v24 = vpop.permute.xlu1 %434  ;;  %v1841_v8 = vpop.permute.xlu0 %504  ;;  %v921_v59 = vmul.f32 %v1119_v29, %v920_v34 }
 0x18c   :  { %v1845_v44 = vpop.permute.xlu2 %589  ;;  %v922_v48 = vadd.f32 %v1119_v29, %v921_v59 }
 0x18d   :  { %629 = vperm.xlu1 %1115, %v1742_v60   ;;  %2358 = vst [vmem:[#allocation51_spill] sm:$0xff] %v1845_v44 }
 0x192   :  { %v1843_v22 = vpop.permute.xlu1 %524  ;;  %v430_v57 = vpop.permute.xlu0 %429 }
 0x194   :  { %v1849_v12 = vpop.permute.xlu2 %514 }
 0x195   :  { %699 = vperm.xlu1 %1115, %v1787_v21  }
 0x19a   :  { %v1847_v63 = vpop.permute.xlu1 %449  ;;  %v1851_v21 = vpop.permute.xlu0 %594 }
 0x19b   :  { %2359 = vst [vmem:[#allocation52_spill] sm:$0xff] %v1851_v21 }
 0x19c   :  { %v440_v10 = vpop.permute.xlu2 %439 }
 0x1a2   :  { %v1853_v3 = vpop.permute.xlu1 %539  ;;  %v1855_v60 = vpop.permute.xlu0 %519 }
 0x1a4   :  { %v1859_v45 = vpop.permute.xlu2 %604 }
 0x1a5   :  { %2360 = vst [vmem:[#allocation53_spill] sm:$0xff] %v1859_v45  ;;  %v924_v45 = vsel %vm923_vm2, %v1119_v29, %v922_v48  ;;  %v720_v48 = vadd.f32 %v1811_v26, %v1420_v62  ;;  %v724_v62 = vadd.f32 %v1839_v24, %v1474_v25  ;;  %v2366_v25 = vld [vmem:[#allocation14_spill] sm:$0xff] }
 0x1a6   :  { %v727_v26 = vadd.f32 %v1847_v63, %v2366_v25 }
 0x1aa   :  { %v1857_v47 = vpop.permute.xlu1 %464  ;;  %v445_v44 = vpop.permute.xlu0 %444 }
 0x1ac   :  { %v1863_v21 = vpop.permute.xlu2 %529 }
 0x1b2   :  { %v1861_v31 = vpop.permute.xlu1 %554  ;;  %v1865_v4 = vpop.permute.xlu0 %609 }
 0x1b3   :  { %2361 = vst [vmem:[#allocation54_spill] sm:$0xff] %v1861_v31 }
 0x1b4   :  { %2362 = vst [vmem:[#allocation55_spill] sm:$0xff] %v1865_v4  ;;  %v455_v39 = vpop.permute.xlu2 %454 }
 0x1ba   :  { %v1867_v31 = vpop.permute.xlu0 %534 }
 0x1bc   :  { %v1869_v20 = vpop.permute.xlu2 %619 }
 0x1c2   :  { %v460_v30 = vpop.permute.xlu0 %459 }
 0x1c4   :  { %v1871_v23 = vpop.permute.xlu2 %544 }
 0x1ca   :  { %v1873_v4 = vpop.permute.xlu0 %624 }
 0x1d7   :  { %v910_v11 = vpop.xlane.xlu1 %909 }
 0x1d8   :  { %v911_v40 = vrot.slane %v910_v11, 4 }
 0x1da   :  { %v912_v32 = vadd.f32 %v911_v40, %v910_v11  ;;  %v470_v11 = vpop.permute.xlu2 %469  ;;  %v1875_v40 = vpop.permute.xlu0 %549 }
 0x1dc   :  { %v913_v19 = vrot.slane %v912_v32, 2 }
 0x1de   :  { %v914_v54 = vadd.f32 %v913_v19, %v912_v32  ;;  %v718_v32 = vadd.f32 %v1814_v5, %v1397_v50  ;;  %v723_v50 = vadd.f32 %v430_v57, %v1460_v18  ;;  %v2365_v18 = vld [vmem:[#allocation13_spill] sm:$0xff] }
 0x1df   :  { %v726_v57 = vadd.f32 %v445_v44, %v2365_v18  ;;  %v2367_v44 = vld [vmem:[#allocation17_spill] sm:$0xff] }
 0x1e0   :  { %v915_v17 = vrot.slane %v914_v54, 1  ;;  %v728_v5 = vadd.f32 %v455_v39, %v2367_v44  ;;  %v731_v39 = vadd.f32 %v470_v11, %v1583_v9  ;;  %v734_v9 = vadd.f32 %v1816_v61, %v1393_v46  ;;  %v2370_v11 = vld [vmem:[#allocation6_spill] sm:$0xff] }
 0x1e1   :  { %v2377_v44 = vld [vmem:[#allocation46_spill] sm:$0xff] }
 0x1e2   :  { %v916_v49 = vadd.f32 %v915_v17, %v914_v54  ;;  %v1877_v59 = vpop.permute.xlu2 %634  ;;  %v475_v19 = vpop.permute.xlu0 %474  ;;  %v721_v17 = vadd.f32 %v1828_v43, %v1429_v1 }
 0x1e4   :  { %1108 = vpush %v916_v49  ;;  %v719_v49 = vadd.f32 %v1801_v2, %v1400_v51 }
 0x1e5   :  { %1110 = vpush %v924_v45  ;;  %v717_v45 = vadd.f32 %v1803_v42, %v1371_v35  ;;  %v722_v42 = vadd.f32 %v425_v55, %v1457_v15  ;;  %v725_v15 = vadd.f32 %v440_v10, %v1498_v38 }
 0x1ea   :  { %v1879_v54 = vpop.permute.xlu2 %644  ;;  %v1881_v29 = vpop.permute.xlu0 %649 }
 0x1eb   :  { %2363 = vst [vmem:[#allocation56_spill] sm:$0xff] %v1879_v54 }
 0x1ec   :  { %2364 = vst [vmem:[#allocation57_spill] sm:$0xff] %v1881_v29 }
 0x1f2   :  { %v1917_v43 = vpop.permute.xlu2 %654  ;;  %v1925_v38 = vpop.permute.xlu0 %659 }
 0x1fa   :  { %v1985_v61 = vpop.permute.xlu0 %669 }
 0x215   :  { %s1109_s0 = spop %1108 }
 0x216   :  { %s1111_s5 = spop %1110 }
 0x217   :  { %s926_s6 = smul.f32 %s1111_s5, %s1109_s0 }
 0x219   :  { %v1891_v34 = vstv %s926_s6 }
 0x21a   :  { %v928_v29 = vsub.f32 %v717_v45, %v1891_v34  ;;  %v929_v54 = vsub.f32 %v718_v32, %v1891_v34  ;;  %v930_v35 = vsub.f32 %v719_v49, %v1891_v34  ;;  %v931_v51 = vsub.f32 %v720_v48, %v1891_v34  ;;  %v2369_v49 = vld [vmem:[#allocation19_spill] sm:$0xff] }
 0x21b   :  { %v932_v2 = vsub.f32 %v721_v17, %v1891_v34  ;;  %v933_v1 = vsub.f32 %v722_v42, %v1891_v34  ;;  %v934_v55 = vsub.f32 %v723_v50, %v1891_v34  ;;  %v935_v24 = vsub.f32 %v724_v62, %v1891_v34  ;;  %v1977_v50 = vpop.permute.xlu2 %664 }
 0x21c   :  { %992 = vst [vmem:[%s2266_s3] sm:$0xff] %v928_v29  ;;  %v936_v10 = vsub.f32 %v725_v15, %v1891_v34  ;;  %v2368_v29 = vld [vmem:[#allocation18_spill] sm:$0xff]  ;;  %v938_v63 = vsub.f32 %v727_v26, %v1891_v34  ;;  %v730_v32 = vadd.f32 %v1857_v47, %v2369_v49  ;;  %v939_v48 = vsub.f32 %v728_v5, %v1891_v34  ;;  %v600_v15 = vpop.permute.xlu1 %599 }
 0x21d   :  { %993 = vst [vmem:[%s2266_s3 + $0x8] sm:$0xff] %v929_v54  ;;  %v937_v54 = vsub.f32 %v726_v57, %v1891_v34  ;;  %v729_v45 = vadd.f32 %v460_v30, %v2368_v29  ;;  %v732_v30 = vadd.f32 %v475_v19, %v1599_v56  ;;  %v733_v47 = vadd.f32 %v1793_v37, %v1374_v36  ;;  %v2371_v37 = vld [vmem:[#allocation8_spill] sm:$0xff] }
 0x21e   :  { %994 = vst [vmem:[%s2266_s3 + $0x10] sm:$0xff] %v930_v35  ;;  %v941_v35 = vsub.f32 %v730_v32, %v1891_v34  ;;  %v942_v42 = vsub.f32 %v731_v39, %v1891_v34  ;;  %v735_v19 = vadd.f32 %v1830_v16, %v2370_v11  ;;  %v945_v46 = vsub.f32 %v734_v9, %v1891_v34  ;;  %v2379_v29 = vld [vmem:[#allocation48_spill] sm:$0xff]  ;;  %v2380_v32 = vld [vmem:[#allocation5_spill] sm:$0xff] }
 0x21f   :  { %995 = vst [vmem:[%s2266_s3 + $0x18] sm:$0xff] %v931_v51  ;;  %v940_v17 = vsub.f32 %v729_v45, %v1891_v34  ;;  %v943_v56 = vsub.f32 %v732_v30, %v1891_v34  ;;  %v944_v36 = vsub.f32 %v733_v47, %v1891_v34  ;;  %v736_v51 = vadd.f32 %v1818_v52, %v2371_v37  ;;  %v2382_v30 = vld [vmem:[#allocation7_spill] sm:$0xff]  ;;  %v2384_v9 = vld [vmem:[#allocation9_spill] sm:$0xff] }
 0x220   :  { %996 = vst [vmem:[%s2266_s3 + $0x20] sm:$0xff] %v932_v2  ;;  %v737_v16 = vadd.f32 %v1835_v53, %v1440_v6  ;;  %v946_v2 = vsub.f32 %v735_v19, %v1891_v34  ;;  %v738_v52 = vadd.f32 %v1841_v8, %v1443_v7  ;;  %v739_v6 = vadd.f32 %v1833_v41, %v1454_v13  ;;  %v2387_v37 = vld [vmem:[#allocation49_spill] sm:$0xff] }
 0x221   :  { %997 = vst [vmem:[%s2266_s3 + $0x28] sm:$0xff] %v933_v1  ;;  %v947_v62 = vsub.f32 %v736_v51, %v1891_v34  ;;  %v740_v1 = vadd.f32 %v1849_v12, %v1482_v27  ;;  %v741_v8 = vadd.f32 %v1855_v60, %v1485_v28  ;;  %v742_v41 = vadd.f32 %v1843_v22, %v1490_v33 }
 0x222   :  { %998 = vst [vmem:[%s2266_s3 + $0x30] sm:$0xff] %v934_v55  ;;  %v948_v53 = vsub.f32 %v737_v16, %v1891_v34  ;;  %v949_v7 = vsub.f32 %v738_v52, %v1891_v34  ;;  %v950_v13 = vsub.f32 %v739_v6, %v1891_v34  ;;  %v743_v12 = vadd.f32 %v1863_v21, %v1522_v58  ;;  %v2372_v21 = vld [vmem:[#allocation22_spill] sm:$0xff]  ;;  %v2388_v16 = vld [vmem:[#allocation11_spill] sm:$0xff]  ;;  %v2390_v6 = vld [vmem:[#allocation12_spill] sm:$0xff] }
 0x223   :  { %999 = vst [vmem:[%s2266_s3 + $0x38] sm:$0xff] %v935_v24  ;;  %v951_v27 = vsub.f32 %v740_v1, %v1891_v34  ;;  %v952_v28 = vsub.f32 %v741_v8, %v1891_v34  ;;  %v744_v60 = vadd.f32 %v1867_v31, %v1529_v0  ;;  %v953_v33 = vsub.f32 %v742_v41, %v1891_v34  ;;  %v2041_v18 = vpop.permute.xlu2 %674  ;;  %v2373_v31 = vld [vmem:[#allocation23_spill] sm:$0xff]  ;;  %v2375_v24 = vld [vmem:[#allocation54_spill] sm:$0xff] }
 0x224   :  { %1000 = vst [vmem:[%s2266_s3 + $0x40] sm:$0xff] %v936_v10  ;;  %v745_v22 = vadd.f32 %v1853_v3, %v1536_v14  ;;  %v954_v58 = vsub.f32 %v743_v12, %v1891_v34  ;;  %v746_v55 = vadd.f32 %v1871_v23, %v2372_v21  ;;  %v747_v14 = vadd.f32 %v1875_v40, %v2373_v31  ;;  %v2049_v3 = vpop.permute.xlu0 %679  ;;  %v2374_v23 = vld [vmem:[#allocation24_spill] sm:$0xff]  ;;  %v2376_v10 = vld [vmem:[#allocation2_spill] sm:$0xff]  ;;  %v2392_v41 = vld [vmem:[#allocation35_spill] sm:$0xff] }
 0x225   :  { %1001 = vst [vmem:[%s2266_s3 + $0x48] sm:$0xff] %v937_v54  ;;  %v955_v0 = vsub.f32 %v744_v60, %v1891_v34  ;;  %v748_v25 = vadd.f32 %v2375_v24, %v2374_v23  ;;  %v749_v40 = vadd.f32 %v2377_v44, %v2376_v10  ;;  %v2378_v54 = vld [vmem:[#allocation4_spill] sm:$0xff]  ;;  %v2394_v60 = vld [vmem:[#allocation53_spill] sm:$0xff]  ;;  %v2396_v21 = vld [vmem:[#allocation55_spill] sm:$0xff] }
 0x226   :  { %1002 = vst [vmem:[%s2266_s3 + $0x50] sm:$0xff] %v938_v63  ;;  %v956_v57 = vsub.f32 %v745_v22, %v1891_v34  ;;  %v957_v26 = vsub.f32 %v746_v55, %v1891_v34  ;;  %v958_v5 = vsub.f32 %v747_v14, %v1891_v34  ;;  %v750_v45 = vadd.f32 %v2379_v29, %v2378_v54  ;;  %v615_v63 = vpop.permute.xlu1 %614  ;;  %v2398_v23 = vld [vmem:[#allocation20_spill] sm:$0xff] }
 0x227   :  { %1003 = vst [vmem:[%s2266_s3 + $0x58] sm:$0xff] %v939_v48  ;;  %v959_v49 = vsub.f32 %v748_v25, %v1891_v34  ;;  %v2381_v48 = vld [vmem:[#allocation44_spill] sm:$0xff]  ;;  %v761_v24 = vadd.f32 %v1869_v20, %v2398_v23  ;;  %v2401_v20 = vld [vmem:[#allocation25_spill] sm:$0xff] }
 0x228   :  { %1004 = vst [vmem:[%s2266_s3 + $0x60] sm:$0xff] %v940_v17  ;;  %v751_v39 = vadd.f32 %v2381_v48, %v2380_v32  ;;  %v960_v17 = vsub.f32 %v749_v40, %v1891_v34  ;;  %v2400_v40 = vld [vmem:[#allocation39_spill] sm:$0xff]  ;;  %v764_v29 = vadd.f32 %v1877_v59, %v2401_v20 }
 0x229   :  { %1005 = vst [vmem:[%s2266_s3 + $0x68] sm:$0xff] %v941_v35  ;;  %v2383_v35 = vld [vmem:[#allocation47_spill] sm:$0xff]  ;;  %v972_v54 = vsub.f32 %v761_v24, %v1891_v34 }
 0x22a   :  { %1006 = vst [vmem:[%s2266_s3 + $0x70] sm:$0xff] %v942_v42  ;;  %v752_v47 = vadd.f32 %v2383_v35, %v2382_v30  ;;  %v961_v42 = vsub.f32 %v750_v45, %v1891_v34  ;;  %v962_v19 = vsub.f32 %v751_v39, %v1891_v34  ;;  %v2404_v48 = vld [vmem:[#allocation27_spill] sm:$0xff]  ;;  %v2405_v39 = vld [vmem:[#allocation56_spill] sm:$0xff]  ;;  %v975_v59 = vsub.f32 %v764_v29, %v1891_v34  ;;  %v2406_v35 = vld [vmem:[#allocation26_spill] sm:$0xff] }
 0x22b   :  { %1007 = vst [vmem:[%s2266_s3 + $0x78] sm:$0xff] %v943_v56  ;;  %v2385_v56 = vld [vmem:[#allocation50_spill] sm:$0xff] }
 0x22c   :  { %1008 = vst [vmem:[%s2266_s3 + $0x80] sm:$0xff] %v944_v36  ;;  %v753_v11 = vadd.f32 %v2385_v56, %v2384_v9  ;;  %v2386_v36 = vld [vmem:[#allocation10_spill] sm:$0xff] }
 0x22d   :  { %1009 = vst [vmem:[%s2266_s3 + $0x88] sm:$0xff] %v945_v46  ;;  %v754_v51 = vadd.f32 %v2387_v37, %v2386_v36  ;;  %v963_v46 = vsub.f32 %v752_v47, %v1891_v34  ;;  %v2407_v47 = vld [vmem:[#allocation57_spill] sm:$0xff]  ;;  %v2409_v37 = vld [vmem:[#allocation28_spill] sm:$0xff] }
 0x22e   :  { %1010 = vst [vmem:[%s2266_s3 + $0x90] sm:$0xff] %v946_v2  ;;  %v2389_v2 = vld [vmem:[#allocation51_spill] sm:$0xff]  ;;  %v630_v14 = vpop.permute.xlu1 %629 }
 0x22f   :  { %1011 = vst [vmem:[%s2266_s3 + $0x98] sm:$0xff] %v947_v62  ;;  %v755_v52 = vadd.f32 %v2389_v2, %v2388_v16  ;;  %v964_v62 = vsub.f32 %v753_v11, %v1891_v34  ;;  %v965_v8 = vsub.f32 %v754_v51, %v1891_v34  ;;  %v2408_v11 = vld [vmem:[#allocation29_spill] sm:$0xff]  ;;  %v769_v51 = vadd.f32 %v1925_v38, %v2409_v37  ;;  %v2410_v16 = vld [vmem:[#allocation32_spill] sm:$0xff] }
 0x230   :  { %1012 = vst [vmem:[%s2266_s3 + $0xa0] sm:$0xff] %v948_v53  ;;  %v2391_v53 = vld [vmem:[#allocation52_spill] sm:$0xff]  ;;  %v770_v2 = vadd.f32 %v1977_v50, %v2410_v16 }
 0x231   :  { %1013 = vst [vmem:[%s2266_s3 + $0xa8] sm:$0xff] %v949_v7  ;;  %v756_v1 = vadd.f32 %v2391_v53, %v2390_v6  ;;  %v685_v7 = vpop.permute.xlu2 %684  ;;  %v966_v12 = vsub.f32 %v755_v52, %v1891_v34  ;;  %v2411_v52 = vld [vmem:[#allocation30_spill] sm:$0xff]  ;;  %v980_v38 = vsub.f32 %v769_v51, %v1891_v34 }
 0x232   :  { %1014 = vst [vmem:[%s2266_s3 + $0xb0] sm:$0xff] %v950_v13  ;;  %v690_v13 = vpop.permute.xlu0 %689  ;;  %v2412_v6 = vld [vmem:[#allocation34_spill] sm:$0xff]  ;;  %v981_v50 = vsub.f32 %v770_v2, %v1891_v34 }
 0x233   :  { %1015 = vst [vmem:[%s2266_s3 + $0xb8] sm:$0xff] %v951_v27  ;;  %v757_v27 = vadd.f32 %v600_v15, %v2392_v41  ;;  %v967_v22 = vsub.f32 %v756_v1, %v1891_v34  ;;  %v772_v53 = vadd.f32 %v2041_v18, %v2412_v6  ;;  %v2413_v1 = vld [vmem:[#allocation31_spill] sm:$0xff]  ;;  %v2414_v41 = vld [vmem:[#allocation38_spill] sm:$0xff] }
 0x234   :  { %1016 = vst [vmem:[%s2266_s3 + $0xc0] sm:$0xff] %v952_v28  ;;  %v2393_v28 = vld [vmem:[#allocation15_spill] sm:$0xff] }
 0x235   :  { %1017 = vst [vmem:[%s2266_s3 + $0xc8] sm:$0xff] %v953_v33  ;;  %v758_v33 = vadd.f32 %v2394_v60, %v2393_v28  ;;  %v968_v15 = vsub.f32 %v757_v27, %v1891_v34  ;;  %v774_v27 = vadd.f32 %v685_v7, %v2414_v41  ;;  %v983_v18 = vsub.f32 %v772_v53, %v1891_v34  ;;  %v2415_v28 = vld [vmem:[#allocation33_spill] sm:$0xff] }
 0x236   :  { %1018 = vst [vmem:[%s2266_s3 + $0xd0] sm:$0xff] %v954_v58  ;;  %v2395_v58 = vld [vmem:[#allocation16_spill] sm:$0xff]  ;;  %v775_v60 = vadd.f32 %v690_v13, %v2415_v28 }
 0x237   :  { %1019 = vst [vmem:[%s2266_s3 + $0xd8] sm:$0xff] %v955_v0  ;;  %v759_v55 = vadd.f32 %v2396_v21, %v2395_v58  ;;  %v2397_v0 = vld [vmem:[#allocation36_spill] sm:$0xff]  ;;  %v985_v7 = vsub.f32 %v774_v27, %v1891_v34 }
 0x238   :  { %1020 = vst [vmem:[%s2266_s3 + $0xe0] sm:$0xff] %v956_v57  ;;  %v760_v31 = vadd.f32 %v615_v63, %v2397_v0  ;;  %v969_v57 = vsub.f32 %v758_v33, %v1891_v34  ;;  %v2403_v63 = vld [vmem:[#allocation45_spill] sm:$0xff]  ;;  %v986_v13 = vsub.f32 %v775_v60, %v1891_v34 }
 0x239   :  { %1021 = vst [vmem:[%s2266_s3 + $0xe8] sm:$0xff] %v957_v26  ;;  %v970_v25 = vsub.f32 %v759_v55, %v1891_v34  ;;  %v2399_v26 = vld [vmem:[#allocation21_spill] sm:$0xff]  ;;  %v695_v30 = vpop.permute.xlu2 %694  ;;  %v2417_v55 = vld [vmem:[#allocation43_spill] sm:$0xff] }
 0x23a   :  { %1022 = vst [vmem:[%s2266_s3 + $0xf0] sm:$0xff] %v958_v5  ;;  %v762_v10 = vadd.f32 %v1873_v4, %v2399_v26  ;;  %v971_v44 = vsub.f32 %v760_v31, %v1891_v34  ;;  %v763_v5 = vadd.f32 %v630_v14, %v2400_v40  ;;  %v2402_v4 = vld [vmem:[#allocation3_spill] sm:$0xff]  ;;  %v705_v9 = vpop.permute.xlu0 %704  ;;  %v2418_v0 = vld [vmem:[#allocation37_spill] sm:$0xff] }
 0x23b   :  { %1023 = vst [vmem:[%s2266_s3 + $0xf8] sm:$0xff] %v959_v49  ;;  %v765_v49 = vadd.f32 %v2403_v63, %v2402_v4  ;;  %v778_v31 = vadd.f32 %v705_v9, %v2418_v0 }
 0x23c   :  { %1024 = vst [vmem:[%s2266_s3 + $0x100] sm:$0xff] %v960_v17  ;;  %v973_v45 = vsub.f32 %v762_v10, %v1891_v34  ;;  %v974_v32 = vsub.f32 %v763_v5, %v1891_v34  ;;  %v766_v17 = vadd.f32 %v2405_v39, %v2404_v48 }
 0x23d   :  { %1025 = vst [vmem:[%s2266_s3 + $0x108] sm:$0xff] %v961_v42  ;;  %v767_v42 = vadd.f32 %v2407_v47, %v2406_v35  ;;  %v976_v56 = vsub.f32 %v765_v49, %v1891_v34  ;;  %v989_v10 = vsub.f32 %v778_v31, %v1891_v34 }
 0x23e   :  { %1026 = vst [vmem:[%s2266_s3 + $0x110] sm:$0xff] %v962_v19  ;;  %v768_v19 = vadd.f32 %v1917_v43, %v2408_v11  ;;  %v977_v36 = vsub.f32 %v766_v17, %v1891_v34 }
 0x23f   :  { %1027 = vst [vmem:[%s2266_s3 + $0x118] sm:$0xff] %v963_v46  ;;  %v978_v46 = vsub.f32 %v767_v42, %v1891_v34 }
 0x240   :  { %1028 = vst [vmem:[%s2266_s3 + $0x120] sm:$0xff] %v964_v62  ;;  %v979_v43 = vsub.f32 %v768_v19, %v1891_v34  ;;  %v771_v62 = vadd.f32 %v1985_v61, %v2411_v52 }
 0x241   :  { %1029 = vst [vmem:[%s2266_s3 + $0x128] sm:$0xff] %v965_v8  ;;  %v773_v8 = vadd.f32 %v2049_v3, %v2413_v1  ;;  %v2416_v3 = vld [vmem:[#allocation41_spill] sm:$0xff]  ;;  %v710_v58 = vpop.permute.xlu2 %709 }
 0x242   :  { %1030 = vst [vmem:[%s2266_s3 + $0x130] sm:$0xff] %v966_v12  ;;  %v982_v61 = vsub.f32 %v771_v62, %v1891_v34  ;;  %v700_v12 = vpop.permute.xlu1 %699  ;;  %v715_v21 = vpop.permute.xlu0 %714 }
 0x243   :  { %1031 = vst [vmem:[%s2266_s3 + $0x138] sm:$0xff] %v967_v22  ;;  %v984_v33 = vsub.f32 %v773_v8, %v1891_v34  ;;  %v776_v22 = vadd.f32 %v695_v30, %v2416_v3 }
 0x244   :  { %1032 = vst [vmem:[%s2266_s3 + $0x140] sm:$0xff] %v968_v15  ;;  %v777_v15 = vadd.f32 %v700_v12, %v2417_v55 }
 0x245   :  { %1033 = vst [vmem:[%s2266_s3 + $0x148] sm:$0xff] %v969_v57  ;;  %v987_v14 = vsub.f32 %v776_v22, %v1891_v34  ;;  %v2419_v57 = vld [vmem:[#allocation42_spill] sm:$0xff] }
 0x246   :  { %1034 = vst [vmem:[%s2266_s3 + $0x150] sm:$0xff] %v970_v25  ;;  %v779_v23 = vadd.f32 %v710_v58, %v2419_v57  ;;  %v988_v24 = vsub.f32 %v777_v15, %v1891_v34  ;;  %v2420_v25 = vld [vmem:[#allocation40_spill] sm:$0xff] }
 0x247   :  { %1035 = vst [vmem:[%s2266_s3 + $0x158] sm:$0xff] %v971_v44  ;;  %v780_v26 = vadd.f32 %v715_v21, %v2420_v25 }
 0x248   :  { %1036 = vst [vmem:[%s2266_s3 + $0x160] sm:$0xff] %v972_v54  ;;  %v990_v44 = vsub.f32 %v779_v23, %v1891_v34 }
 0x249   :  { %1037 = vst [vmem:[%s2266_s3 + $0x168] sm:$0xff] %v973_v45  ;;  %v991_v40 = vsub.f32 %v780_v26, %v1891_v34 }
 0x24a   :  { %1038 = vst [vmem:[%s2266_s3 + $0x170] sm:$0xff] %v974_v32 }
 0x24b   :  { %1039 = vst [vmem:[%s2266_s3 + $0x178] sm:$0xff] %v975_v59 }
 0x24c   :  { %1040 = vst [vmem:[%s2266_s3 + $0x180] sm:$0xff] %v976_v56 }
 0x24d   :  { %1041 = vst [vmem:[%s2266_s3 + $0x188] sm:$0xff] %v977_v36 }
 0x24e   :  { %1042 = vst [vmem:[%s2266_s3 + $0x190] sm:$0xff] %v978_v46 }
 0x24f   :  { %1043 = vst [vmem:[%s2266_s3 + $0x198] sm:$0xff] %v979_v43 }
 0x250   :  { %1044 = vst [vmem:[%s2266_s3 + $0x1a0] sm:$0xff] %v980_v38 }
 0x251   :  { %1045 = vst [vmem:[%s2266_s3 + $0x1a8] sm:$0xff] %v981_v50 }
 0x252   :  { %1046 = vst [vmem:[%s2266_s3 + $0x1b0] sm:$0xff] %v982_v61 }
 0x253   :  { %1047 = vst [vmem:[%s2266_s3 + $0x1b8] sm:$0xff] %v983_v18 }
 0x254   :  { %1048 = vst [vmem:[%s2266_s3 + $0x1c0] sm:$0xff] %v984_v33 }
 0x255   :  { %1049 = vst [vmem:[%s2266_s3 + $0x1c8] sm:$0xff] %v985_v7 }
 0x256   :  { %1050 = vst [vmem:[%s2266_s3 + $0x1d0] sm:$0xff] %v986_v13 }
 0x257   :  { %1051 = vst [vmem:[%s2266_s3 + $0x1d8] sm:$0xff] %v987_v14 }
 0x258   :  { %1052 = vst [vmem:[%s2266_s3 + $0x1e0] sm:$0xff] %v988_v24 }
 0x259   :  { %1053 = vst [vmem:[%s2266_s3 + $0x1e8] sm:$0xff] %v989_v10 }
 0x25a   :  { %1054 = vst [vmem:[%s2266_s3 + $0x1f0] sm:$0xff] %v990_v44 }
 0x25b   :  { %1055 = vst [vmem:[%s2266_s3 + $0x1f8] sm:$0xff] %v991_v40 }

// kernel: dueling_drqn_forward.2
= control target key start
LH: loop header
LB: loop body
LE: loop exit
PB: predicated region body
PF: predicated region fallthrough
CT: control target
= control target key end

     0   :  { %15 = vsyncpa [#allocation3], 0  ;;  %s4927_s0 = inlined_call_operand.vmem [shape: f32[2,64,128], index: 0, kind: input, shape index: {}]   ;;  %s4928_s1 = inlined_call_operand.vmem [shape: bf16[3,128,240], index: 1, kind: input, shape index: {}]   ;;  %s4929_s2 = inlined_call_operand.vmem [shape: f32[1,240], index: 2, kind: input, shape index: {}]   ;;  %s4930_s3 = inlined_call_operand.vmem [shape: bf16[3,240,224], index: 3, kind: input, shape index: {}]   ;;  %s4931_s4 = inlined_call_operand.vmem [shape: f32[1,224], index: 4, kind: input, shape index: {}]   ;;  %s4932_s5 = inlined_call_operand.vmem [shape: bf16[3,224,96], index: 5, kind: input, shape index: {}]   ;;  %s4933_s6 = inlined_call_operand.vmem [shape: f32[1,96], index: 6, kind: input, shape index: {}]   ;;  %s4934_s7 = inlined_call_operand.vmem [shape: f32[32,96], index: 7, kind: input, shape index: {}]   ;;  %s4935_s8 = inlined_call_operand.vmem [shape: f32[1,96], index: 8, kind: input, shape index: {}]   ;;  %s4936_s9 = inlined_call_operand.vmem [shape: f32[2,1,32], index: 9, kind: input, shape index: {}]   ;;  %s4937_s10 = inlined_call_operand.hbm [shape: f32[2,1,32], index: 10, kind: output, shape index: {}]  }
   0x1   :  { %17 = vsyncpa [#allocation3 + $0x1], 0  ;;  %s3701_s13 = smov 0   ;;  %s3703_s14 = smov 0  }
   0x2   :  { %s3705_s15 = smov 0   ;;  %s3707_s16 = smov 0  }
   0x3 LB: > { %s3722_s17 = sadd.s32 4294967295, %s3641_s16   ;;  %s2437_s18 = sadd.s32 4294967294, %s3641_s16   ;;  %s3641_s16 = sphi %s3707_s16, %s4945_s16   ;;  %s3637_s15 = sphi %s3705_s15, %s4944_s15   ;;  %s3633_s14 = sphi %s3703_s14, %s4943_s14   ;;  %s3629_s13 = sphi %s3701_s13, %s4942_s13  }
   0x4   : > { %s3726_s19 = sadd.s32 1, %s3641_s16   ;;  %s250_s20 = sadd.s32 1, %s3637_s15 }
   0x5   : > { %s247_s21 = ssub.s32 %s3641_s16, %s3726_s19  ;;  %p260_p0 = scmp.ne.s32.totalorder %s3637_s15, %s3633_s14 }
   0x6   : > { %p248_p1 = scmp.eq.s32.totalorder %s247_s21, 0  ;;  %p261_p2 = scmp.eq.s32.totalorder %s3722_s17, 1 }
   0x7   : > { %p266_p3 = scmp.ne.s32.totalorder %s3633_s14, %s3629_s13  ;;  %p267_p4 = scmp.eq.s32.totalorder %s2437_s18, 1 }
   0x8   : > { %s3737_s22 = scalar_select %p248_p1, %s3637_s15, %s250_s20  }
   0x9   : > { %p3739_p5 = por %p261_p2, %p260_p0  ;;  %p3743_p6 = por %p267_p4, %p266_p3 }
   0xa   : > { %4938 = sst [smem:[#allocation5_spill]] %s3737_s22  ;;  %p2440_p7 = scmp.ge.s32.totalorder %s3641_s16, 1 }
   0xb   : > { %p323_p8 = scmp.lt.s32.totalorder %s3641_s16, 3 }
   0xd   : > { %p324_p9 = pnand %p2440_p7, %p323_p8 }
   0xe   : > { %p363_p10 = scmp.lt.s32.totalorder (!%p324_p9), %s3722_s17, 1  ;;  %s3643_s30 = smov (!%p324_p9), 64  }
   0xf   : > { %327 = sbr.rel (%p324_p9) target bundleno = 2772 (0xad4), region = 60  ;;  %s3645_s12 = smov (!%p324_p9), 32  }
  0x10   : > { %s361_s18 = sand.u32 (!%p324_p9), 1, %s3633_s14   ;;  %s2369_s25 = scalar_lea.hbm (!%p324_p9), %s4937_s10, %s3722_s17 }
  0x11   : > { %s2361_s29 = scalar_lea.sflag (!%p324_p9), [#allocation3], %s361_s18 }
  0x14   : > { %v2501_v0 = vld [vmem:[%s4928_s1 + $0x70] sm:$0xf]  ;;  %v3346_v1 = vld [vmem:[%s4928_s1 + $0x74] sm:$0xf0]  ;;  %v3345_v2 = vld [vmem:[%s4928_s1 + $0x74] sm:$0xf] }
  0x15   : > { %v2502_v3 = vor.u32 %v3346_v1, %v2501_v0  ;;  %v2503_v4 = vld [vmem:[%s4928_s1 + $0x78] sm:$0xf0]  ;;  %v3361_v5 = vld [vmem:[%s4928_s1 + $0xf4] sm:$0xf]  ;;  %v2493_v9 = vld [vmem:[%s4928_s1 + $0x60] sm:$0xf] }
  0x16   : > { %v2583_v6 = vld [vmem:[%s4928_s1 + $0xf8] sm:$0xf0]  ;;  %v2506_v7 = vor.u32 %v3345_v2, %v2503_v4  ;;  %v3344_v10 = vld [vmem:[%s4928_s1 + $0x64] sm:$0xf0]  ;;  %v3343_v11 = vld [vmem:[%s4928_s1 + $0x64] sm:$0xf] }
  0x17   : > { %v2586_v8 = vor.u32 %v3361_v5, %v2583_v6  ;;  %497 = vmatpush.bf16.msra.mxu0 %v2502_v3  ;;  %v2494_v12 = vor.u32 %v3344_v10, %v2493_v9  ;;  %v2495_v13 = vld [vmem:[%s4928_s1 + $0x68] sm:$0xf0]  ;;  %v3359_v14 = vld [vmem:[%s4928_s1 + $0xe4] sm:$0xf]  ;;  %v2485_v18 = vld [vmem:[%s4928_s1 + $0x50] sm:$0xf] }
  0x18   : > { %v2575_v15 = vld [vmem:[%s4928_s1 + $0xe8] sm:$0xf0]  ;;  %516 = vmatpush.bf16.msra.mxu1 %v2506_v7  ;;  %v2498_v16 = vor.u32 %v3343_v11, %v2495_v13  ;;  %v3342_v19 = vld [vmem:[%s4928_s1 + $0x54] sm:$0xf0]  ;;  %v3341_v20 = vld [vmem:[%s4928_s1 + $0x54] sm:$0xf] }
  0x19   : > { %676 = vmatpush.bf16.msra.mxu3 %v2586_v8  ;;  %v2578_v17 = vor.u32 %v3359_v14, %v2575_v15  ;;  %v2487_v21 = vld [vmem:[%s4928_s1 + $0x58] sm:$0xf0]  ;;  %v3357_v22 = vld [vmem:[%s4928_s1 + $0xd4] sm:$0xf]  ;;  %v2581_v24 = vld [vmem:[%s4928_s1 + $0xf0] sm:$0xf]  ;;  %v2486_v26 = vor.u32 %v3342_v19, %v2485_v18 }
  0x1a   : > { %v2567_v23 = vld [vmem:[%s4928_s1 + $0xd8] sm:$0xf0]  ;;  %v3362_v25 = vld [vmem:[%s4928_s1 + $0xf4] sm:$0xf0]  ;;  %v2477_v28 = vld [vmem:[%s4928_s1 + $0x40] sm:$0xf]  ;;  %v2490_v30 = vor.u32 %v3341_v20, %v2487_v21 }
  0x1b   : > { %498 = vmatpush.bf16.msra.mxu0 %v2494_v12  ;;  %v2582_v27 = vor.u32 %v3362_v25, %v2581_v24  ;;  %v3340_v29 = vld [vmem:[%s4928_s1 + $0x44] sm:$0xf0]  ;;  %v2570_v31 = vor.u32 %v3357_v22, %v2567_v23  ;;  %v3339_v32 = vld [vmem:[%s4928_s1 + $0x44] sm:$0xf]  ;;  %v2479_v33 = vld [vmem:[%s4928_s1 + $0x48] sm:$0xf0] }
  0x1c   : > { %517 = vmatpush.bf16.msra.mxu1 %v2498_v16  ;;  %v2573_v34 = vld [vmem:[%s4928_s1 + $0xe0] sm:$0xf]  ;;  %v3355_v35 = vld [vmem:[%s4928_s1 + $0xc4] sm:$0xf]  ;;  %v2559_v36 = vld [vmem:[%s4928_s1 + $0xc8] sm:$0xf0]  ;;  %v2478_v39 = vor.u32 %v3340_v29, %v2477_v28  ;;  %v2482_v42 = vor.u32 %v3339_v32, %v2479_v33 }
  0x1d   : > { %677 = vmatpush.bf16.msra.mxu3 %v2578_v17  ;;  %657 = vmatpush.bf16.msra.mxu2 %v2582_v27  ;;  %v3360_v37 = vld [vmem:[%s4928_s1 + $0xe4] sm:$0xf0]  ;;  %v2565_v40 = vld [vmem:[%s4928_s1 + $0xd0] sm:$0xf]  ;;  %v3358_v41 = vld [vmem:[%s4928_s1 + $0xd4] sm:$0xf0]  ;;  %v2562_v43 = vor.u32 %v3355_v35, %v2559_v36 }
  0x1e   : > { %v2574_v38 = vor.u32 %v3360_v37, %v2573_v34  ;;  %v2469_v44 = vld [vmem:[%s4928_s1 + $0x30] sm:$0xf]  ;;  %v3338_v45 = vld [vmem:[%s4928_s1 + $0x34] sm:$0xf0]  ;;  %v3337_v46 = vld [vmem:[%s4928_s1 + $0x34] sm:$0xf]  ;;  %v2566_v50 = vor.u32 %v3358_v41, %v2565_v40 }
  0x1f   : > { %499 = vmatpush.bf16.msra.mxu0 %v2486_v26  ;;  %v2471_v47 = vld [vmem:[%s4928_s1 + $0x38] sm:$0xf0]  ;;  %v3353_v48 = vld [vmem:[%s4928_s1 + $0xb4] sm:$0xf]  ;;  %v2557_v51 = vld [vmem:[%s4928_s1 + $0xc0] sm:$0xf]  ;;  %v2470_v53 = vor.u32 %v3338_v45, %v2469_v44 }
  0x20   : > { %518 = vmatpush.bf16.msra.mxu1 %v2490_v30  ;;  %v2551_v49 = vld [vmem:[%s4928_s1 + $0xb8] sm:$0xf0]  ;;  %v3356_v52 = vld [vmem:[%s4928_s1 + $0xc4] sm:$0xf0]  ;;  %v2474_v54 = vor.u32 %v3337_v46, %v2471_v47  ;;  %v2461_v56 = vld [vmem:[%s4928_s1 + $0x20] sm:$0xf] }
  0x21   : > { %678 = vmatpush.bf16.msra.mxu3 %v2570_v31  ;;  %658 = vmatpush.bf16.msra.mxu2 %v2574_v38  ;;  %v2554_v55 = vor.u32 %v3353_v48, %v2551_v49  ;;  %v3336_v57 = vld [vmem:[%s4928_s1 + $0x24] sm:$0xf0]  ;;  %v3335_v58 = vld [vmem:[%s4928_s1 + $0x24] sm:$0xf]  ;;  %v2463_v59 = vld [vmem:[%s4928_s1 + $0x28] sm:$0xf0]  ;;  %v2558_v62 = vor.u32 %v3356_v52, %v2557_v51 }
  0x22   : > { %v3351_v60 = vld [vmem:[%s4928_s1 + $0xa4] sm:$0xf]  ;;  %v2543_v61 = vld [vmem:[%s4928_s1 + $0xa8] sm:$0xf0]  ;;  %v2549_v63 = vld [vmem:[%s4928_s1 + $0xb0] sm:$0xf]  ;;  %v2462_v1 = vor.u32 %v3336_v57, %v2461_v56  ;;  %v2466_v5 = vor.u32 %v3335_v58, %v2463_v59 }
  0x23   : > { %500 = vmatpush.bf16.msra.mxu0 %v2478_v39  ;;  %v3354_v0 = vld [vmem:[%s4928_s1 + $0xb4] sm:$0xf0]  ;;  %v2453_v2 = vld [vmem:[%s4928_s1 + $0x10] sm:$0xf]  ;;  %v3333_v4 = vld [vmem:[%s4928_s1 + $0x14] sm:$0xf]  ;;  %v2546_v6 = vor.u32 %v3351_v60, %v2543_v61 }
  0x24   : > { %519 = vmatpush.bf16.msra.mxu1 %v2482_v42  ;;  %v3334_v3 = vld [vmem:[%s4928_s1 + $0x14] sm:$0xf0]  ;;  %v2455_v7 = vld [vmem:[%s4928_s1 + $0x18] sm:$0xf0]  ;;  %v3349_v8 = vld [vmem:[%s4928_s1 + $0x94] sm:$0xf]  ;;  %v2550_v10 = vor.u32 %v3354_v0, %v2549_v63 }
  0x25   : > { %679 = vmatpush.bf16.msra.mxu3 %v2562_v43  ;;  %659 = vmatpush.bf16.msra.mxu2 %v2566_v50  ;;  %v2535_v9 = vld [vmem:[%s4928_s1 + $0x98] sm:$0xf0]  ;;  %v2445_v11 = vld [vmem:[%s4928_s1] sm:$0xf]  ;;  %v3332_v12 = vld [vmem:[%s4928_s1 + $0x4] sm:$0xf0]  ;;  %v2454_v15 = vor.u32 %v3334_v3, %v2453_v2  ;;  %v2458_v19 = vor.u32 %v3333_v4, %v2455_v7 }
  0x26   : > { %v2541_v13 = vld [vmem:[%s4928_s1 + $0xa0] sm:$0xf]  ;;  %v3352_v14 = vld [vmem:[%s4928_s1 + $0xa4] sm:$0xf0]  ;;  %s3919_s11 = scalar_select %p363_p10, %s3722_s17, 1  ;;  %v2538_v20 = vor.u32 %v3349_v8, %v2535_v9  ;;  %v2446_v27 = vor.u32 %v3332_v12, %v2445_v11  ;;  %vm720_vm0 = vcmask 1045504  }
  0x27   : > { %501 = vmatpush.bf16.msra.mxu0 %v2470_v53  ;;  %v3331_v16 = vld [vmem:[%s4928_s1 + $0x4] sm:$0xf]  ;;  %v2447_v17 = vld [vmem:[%s4928_s1 + $0x8] sm:$0xf0]  ;;  %v2661_v22 = vld [vmem:[%s4928_s1 + $0x170] sm:$0xf]  ;;  %v2542_v23 = vor.u32 %v3352_v14, %v2541_v13 }
  0x28   : > { %520 = vmatpush.bf16.msra.mxu1 %v2474_v54  ;;  %v3347_v18 = vld [vmem:[%s4928_s1 + $0x84] sm:$0xf]  ;;  %v2527_v21 = vld [vmem:[%s4928_s1 + $0x88] sm:$0xf0]  ;;  %s3330_s28 = sshll.u32 %s3919_s11, 6  ;;  %v2450_v31 = vor.u32 %v3331_v16, %v2447_v17  ;;  %vm867_vm1 = vcmask 1043456   ;;  %s4848_s26 = scalar_lea.vmem %s4936_s9, %s3919_s11 }
  0x29   : > { %680 = vmatpush.bf16.msra.mxu3 %v2554_v55  ;;  %660 = vmatpush.bf16.msra.mxu2 %v2558_v62  ;;  %s3940_s20 = scalar_lea.vmem %s4927_s0, %s3330_s28  ;;  %v3378_v24 = vld [vmem:[%s4928_s1 + $0x174] sm:$0xf0]  ;;  %v3377_v25 = vld [vmem:[%s4928_s1 + $0x174] sm:$0xf]  ;;  %v2663_v26 = vld [vmem:[%s4928_s1 + $0x178] sm:$0xf0]  ;;  %v2530_v38 = vor.u32 %v3347_v18, %v2527_v21 }
  0x2a   : > { %v372_v28 = vld [vmem:[%s3940_s20] sm:$0xff]  ;;  %v373_v29 = vld [vmem:[%s3940_s20 + $0x8] sm:$0xff]  ;;  %v2533_v36 = vld [vmem:[%s4928_s1 + $0x90] sm:$0xf]  ;;  %v2662_v40 = vor.u32 %v3378_v24, %v2661_v22  ;;  %v2666_v44 = vor.u32 %v3377_v25, %v2663_v26  ;;  %vm1052_vm2 = vcmask 916480   ;;  %vm1748_vm3 = vcmask 785408  }
  0x2b   : > { %502 = vmatpush.bf16.msra.mxu0 %v2462_v1  ;;  %v376_v30 = vld [vmem:[%s3940_s20 + $0x20] sm:$0xff]  ;;  %v380_v32 = vpack.c.bf16 %v372_v28, %v372_v28  ;;  %v381_v33 = vpack.c.bf16 %v373_v29, %v373_v29  ;;  %v377_v34 = vld [vmem:[%s3940_s20 + $0x28] sm:$0xff]  ;;  %v3350_v37 = vld [vmem:[%s4928_s1 + $0x94] sm:$0xf0]  ;;  %vm2081_vm4 = vcmask 261120   ;;  %s2373_s11 = sshll.u32 %s2369_s25, 4  ;;  %s2374_s11 = int_to_ptr.hbm [resolvable:$true] %s2373_s11 }
  0x2c   : > { %521 = vmatpush.bf16.msra.mxu1 %v2466_v5  ;;  %v384_v35 = vpack.c.bf16 %v376_v30, %v376_v30  ;;  %v385_v39 = vpack.c.bf16 %v377_v34, %v377_v34  ;;  %v2653_v45 = vld [vmem:[%s4928_s1 + $0x160] sm:$0xf]  ;;  %v2534_v47 = vor.u32 %v3350_v37, %v2533_v36  ;;  %v3376_v48 = vld [vmem:[%s4928_s1 + $0x164] sm:$0xf0]  ;;  %v3375_v49 = vld [vmem:[%s4928_s1 + $0x164] sm:$0xf] }
  0x2d   : > { %681 = vmatpush.bf16.msra.mxu3 %v2546_v6  ;;  %661 = vmatpush.bf16.msra.mxu2 %v2550_v10  ;;  %v409_v41 = vunpack.c.l.b16 %v380_v32  ;;  %v410_v42 = vunpack.c.l.b16 %v381_v33  ;;  %v2655_v50 = vld [vmem:[%s4928_s1 + $0x168] sm:$0xf0]  ;;  %v2525_v52 = vld [vmem:[%s4928_s1 + $0x80] sm:$0xf]  ;;  %v3348_v53 = vld [vmem:[%s4928_s1 + $0x84] sm:$0xf0]  ;;  %v2654_v55 = vor.u32 %v3376_v48, %v2653_v45 }
  0x2e   : > { %v569_v43 = vunpack.c.l.b16 %v384_v35  ;;  %v570_v46 = vunpack.c.l.b16 %v385_v39  ;;  %v2658_v56 = vor.u32 %v3375_v49, %v2655_v50  ;;  %v2645_v57 = vld [vmem:[%s4928_s1 + $0x150] sm:$0xf]  ;;  %v2526_v58 = vor.u32 %v3348_v53, %v2525_v52  ;;  %v3374_v59 = vld [vmem:[%s4928_s1 + $0x154] sm:$0xf0]  ;;  %v3373_v60 = vld [vmem:[%s4928_s1 + $0x154] sm:$0xf] }
  0x2f   : > { %503 = vmatpush.bf16.msra.mxu0 %v2454_v15  ;;  %v3973_v51 = vpack.c.b16 %v410_v42, %v409_v41  ;;  %v2647_v61 = vld [vmem:[%s4928_s1 + $0x158] sm:$0xf0]  ;;  %v374_v62 = vld [vmem:[%s3940_s20 + $0x10] sm:$0xff]  ;;  %v2646_v2 = vor.u32 %v3374_v59, %v2645_v57  ;;  %v2637_v4 = vld [vmem:[%s4928_s1 + $0x140] sm:$0xf]  ;;  %s3593_s28 = sshra.s32 %s2374_s11, 4  ;;  %s3594_s28 = int_to_ptr.hbm [resolvable:$true] %s3593_s28 }
  0x30   : > { %522 = vmatpush.bf16.msra.mxu1 %v2458_v19  ;;  %v573_v54 = vpack.c.b16 %v570_v46, %v569_v43  ;;  %v375_v63 = vld [vmem:[%s3940_s20 + $0x18] sm:$0xff]  ;;  %v378_v0 = vld [vmem:[%s3940_s20 + $0x30] sm:$0xff]  ;;  %v2650_v3 = vor.u32 %v3373_v60, %v2647_v61  ;;  %v3372_v5 = vld [vmem:[%s4928_s1 + $0x144] sm:$0xf0]  ;;  %v382_v8 = vpack.c.bf16 %v374_v62, %v374_v62  ;;  %s3599_s17 = scalar_lea.hbm %s4937_s10, 2  ;;  %p3600_p0 = scmp.lt.s32.totalorder %s3594_s28, %s4937_s10 }
  0x31   : > { %682 = vmatpush.bf16.msra.mxu3 %v2538_v20  ;;  %662 = vmatpush.bf16.msra.mxu2 %v2542_v23  ;;  %v379_v1 = vld [vmem:[%s3940_s20 + $0x38] sm:$0xff]  ;;  %v3371_v6 = vld [vmem:[%s4928_s1 + $0x144] sm:$0xf]  ;;  %v2639_v7 = vld [vmem:[%s4928_s1 + $0x148] sm:$0xf0]  ;;  %v383_v9 = vpack.c.bf16 %v375_v63, %v375_v63  ;;  %v386_v10 = vpack.c.bf16 %v378_v0, %v378_v0  ;;  %v2638_v12 = vor.u32 %v3372_v5, %v2637_v4  ;;  %s3644_s20 = smov 96  }
  0x32   : > { %v387_v11 = vpack.c.bf16 %v379_v1, %v379_v1  ;;  %v2642_v13 = vor.u32 %v3371_v6, %v2639_v7  ;;  %v2629_v14 = vld [vmem:[%s4928_s1 + $0x130] sm:$0xf]  ;;  %v411_v15 = vunpack.c.l.b16 %v382_v8  ;;  %v3370_v17 = vld [vmem:[%s4928_s1 + $0x134] sm:$0xf0]  ;;  %v3369_v18 = vld [vmem:[%s4928_s1 + $0x134] sm:$0xf] }
  0x33   : > { %504 = vmatpush.bf16.msra.mxu0 %v2446_v27  ;;  %v412_v16 = vunpack.c.l.b16 %v383_v9  ;;  %v2631_v19 = vld [vmem:[%s4928_s1 + $0x138] sm:$0xf0]  ;;  %v571_v20 = vunpack.c.l.b16 %v386_v10  ;;  %v2630_v22 = vor.u32 %v3370_v17, %v2629_v14  ;;  %v2621_v24 = vld [vmem:[%s4928_s1 + $0x120] sm:$0xf]  ;;  %v3368_v26 = vld [vmem:[%s4928_s1 + $0x124] sm:$0xf0] }
  0x34   : > { %523 = vmatpush.bf16.msra.mxu1 %v2450_v31  ;;  %v572_v21 = vunpack.c.l.b16 %v387_v11  ;;  %v2634_v23 = vor.u32 %v3369_v18, %v2631_v19  ;;  %v3367_v27 = vld [vmem:[%s4928_s1 + $0x124] sm:$0xf]  ;;  %v2623_v28 = vld [vmem:[%s4928_s1 + $0x128] sm:$0xf0]  ;;  %v2622_v30 = vor.u32 %v3368_v26, %v2621_v24  ;;  %v2613_v32 = vld [vmem:[%s4928_s1 + $0x110] sm:$0xf] }
  0x35   : > { %683 = vmatpush.bf16.msra.mxu3 %v2530_v38  ;;  %663 = vmatpush.bf16.msra.mxu2 %v2534_v47  ;;  %v414_v25 = vpack.c.b16 %v412_v16, %v411_v15  ;;  %v2626_v31 = vor.u32 %v3367_v27, %v2623_v28  ;;  %v3366_v33 = vld [vmem:[%s4928_s1 + $0x114] sm:$0xf0]  ;;  %v3365_v34 = vld [vmem:[%s4928_s1 + $0x114] sm:$0xf]  ;;  %v2615_v35 = vld [vmem:[%s4928_s1 + $0x118] sm:$0xf0] }
  0x36   : > { %505 = vmatmul.bf16.vlgmr.msra.gmra.mxu0 %v3973_v51  ;;  %v574_v29 = vpack.c.b16 %v572_v21, %v571_v20  ;;  %v2614_v36 = vor.u32 %v3366_v33, %v2613_v32  ;;  %v2618_v37 = vor.u32 %v3365_v34, %v2615_v35  ;;  %v2605_v38 = vld [vmem:[%s4928_s1 + $0x100] sm:$0xf]  ;;  %v3364_v39 = vld [vmem:[%s4928_s1 + $0x104] sm:$0xf0]  ;;  %v2607_v41 = vld [vmem:[%s4928_s1 + $0x108] sm:$0xf0] }
  0x37   : > { %806 = vmatpush.bf16.msrb.mxu0 %v2662_v40  ;;  %524 = vmatmul.bf16.vlgmr.msra.gmra.mxu1 %v3973_v51  ;;  %v3363_v40 = vld [vmem:[%s4928_s1 + $0x104] sm:$0xf]  ;;  %v2606_v42 = vor.u32 %v3364_v39, %v2605_v38  ;;  %v722_v45 = vrot.slane %v414_v25, 2  ;;  %v2725_v47 = vld [vmem:[%s4930_s3 + $0x70] sm:$0xf] }
  0x38   : > { %825 = vmatpush.bf16.msrb.mxu1 %v2666_v44  ;;  %684 = vmatmul.bf16.vlgmr.msra.gmra.mxu3 %v573_v54  ;;  %v2610_v43 = vor.u32 %v3363_v40, %v2607_v41  ;;  %v721_v44 = vrot.slane %v3973_v51, 2  ;;  %v3394_v48 = vld [vmem:[%s4930_s3 + $0x74] sm:$0xf0]  ;;  %v2781_v50 = vld [vmem:[%s4930_s3 + $0xe0] sm:$0xf] }
  0x39   : > { %664 = vmatpush.bf16.msra.mxu2 %v2526_v58  ;;  %v2726_v49 = vor.u32 %v3394_v48, %v2725_v47  ;;  %v3408_v51 = vld [vmem:[%s4930_s3 + $0xe4] sm:$0xf0]  ;;  %v2717_v53 = vld [vmem:[%s4930_s3 + $0x60] sm:$0xf]  ;;  %v2773_v59 = vld [vmem:[%s4930_s3 + $0xd0] sm:$0xf] }
  0x3a   : > { %v723_v46 = vsel %vm720_vm0, %v721_v44, %v722_v45  ;;  %v2782_v52 = vor.u32 %v3408_v51, %v2781_v50  ;;  %v3424_v57 = vld [vmem:[%s4930_s3 + $0x164] sm:$0xf0]  ;;  %v3406_v60 = vld [vmem:[%s4930_s3 + $0xd4] sm:$0xf0]  ;;  %v2709_v62 = vld [vmem:[%s4930_s3 + $0x50] sm:$0xf] }
  0x3b   : > { %807 = vmatpush.bf16.msrb.mxu0 %v2654_v55  ;;  %v2774_v61 = vor.u32 %v3406_v60, %v2773_v59  ;;  %v3390_v63 = vld [vmem:[%s4930_s3 + $0x54] sm:$0xf0]  ;;  %v3393_v1 = vld [vmem:[%s4930_s3 + $0x74] sm:$0xf]  ;;  %v2869_v4 = vld [vmem:[%s4930_s3 + $0x150] sm:$0xf] }
  0x3c   : > { %826 = vmatpush.bf16.msrb.mxu1 %v2658_v56  ;;  %665 = vmatmul.bf16.vlgmr.msra.gmra.mxu2 %v573_v54  ;;  %v3392_v54 = vld [vmem:[%s4930_s3 + $0x64] sm:$0xf0]  ;;  %v2877_v56 = vld [vmem:[%s4930_s3 + $0x160] sm:$0xf]  ;;  %v2710_v0 = vor.u32 %v3390_v63, %v2709_v62  ;;  %v3422_v5 = vld [vmem:[%s4930_s3 + $0x154] sm:$0xf0] }
  0x3d   : > { %1056 = vmatpush.bf16.msrb.mxu2 %v2726_v49  ;;  %1071 = vmatpush.bf16.msrb.mxu3 %v2782_v52  ;;  %v2718_v55 = vor.u32 %v3392_v54, %v2717_v53  ;;  %v2878_v58 = vor.u32 %v3424_v57, %v2877_v56  ;;  %v2765_v6 = vld [vmem:[%s4930_s3 + $0xc0] sm:$0xf]  ;;  %v2870_v7 = vor.u32 %v3422_v5, %v2869_v4  ;;  %v3404_v8 = vld [vmem:[%s4930_s3 + $0xc4] sm:$0xf0]  ;;  %v2719_v14 = vld [vmem:[%s4930_s3 + $0x68] sm:$0xf0] }
  0x3e   : > { %v2766_v9 = vor.u32 %v3404_v8, %v2765_v6  ;;  %v2701_v10 = vld [vmem:[%s4930_s3 + $0x40] sm:$0xf]  ;;  %v3388_v11 = vld [vmem:[%s4930_s3 + $0x44] sm:$0xf0]  ;;  %v2757_v19 = vld [vmem:[%s4930_s3 + $0xb0] sm:$0xf] }
  0x3f   : > { %808 = vmatpush.bf16.msrb.mxu0 %v2646_v2  ;;  %v2727_v2 = vld [vmem:[%s4930_s3 + $0x78] sm:$0xf0]  ;;  %v2861_v16 = vld [vmem:[%s4930_s3 + $0x140] sm:$0xf]  ;;  %v3420_v17 = vld [vmem:[%s4930_s3 + $0x144] sm:$0xf0] }
  0x40   : > { %827 = vmatpush.bf16.msrb.mxu1 %v2650_v3  ;;  %v2730_v3 = vor.u32 %v3393_v1, %v2727_v2  ;;  %v2862_v18 = vor.u32 %v3420_v17, %v2861_v16  ;;  %v3402_v20 = vld [vmem:[%s4930_s3 + $0xb4] sm:$0xf0]  ;;  %v2711_v26 = vld [vmem:[%s4930_s3 + $0x58] sm:$0xf0]  ;;  %v2853_v28 = vld [vmem:[%s4930_s3 + $0x130] sm:$0xf] }
  0x41   : > { %1057 = vmatpush.bf16.msrb.mxu2 %v2718_v55  ;;  %1072 = vmatpush.bf16.msrb.mxu3 %v2774_v61  ;;  %v2758_v21 = vor.u32 %v3402_v20, %v2757_v19  ;;  %v3400_v32 = vld [vmem:[%s4930_s3 + $0xa4] sm:$0xf0]  ;;  %v2685_v34 = vld [vmem:[%s4930_s3 + $0x20] sm:$0xf]  ;;  %v2703_v38 = vld [vmem:[%s4930_s3 + $0x48] sm:$0xf0] }
  0x42   : > { %v3384_v35 = vld [vmem:[%s4930_s3 + $0x24] sm:$0xf0]  ;;  %v2845_v40 = vld [vmem:[%s4930_s3 + $0x120] sm:$0xf]  ;;  %v3398_v44 = vld [vmem:[%s4930_s3 + $0x94] sm:$0xf0] }
  0x43   : > { %809 = vmatpush.bf16.msrb.mxu0 %v2638_v12  ;;  %v2702_v12 = vor.u32 %v3388_v11, %v2701_v10  ;;  %v3416_v41 = vld [vmem:[%s4930_s3 + $0x124] sm:$0xf0]  ;;  %v3382_v47 = vld [vmem:[%s4930_s3 + $0x14] sm:$0xf0]  ;;  %v3385_v49 = vld [vmem:[%s4930_s3 + $0x34] sm:$0xf] }
  0x44   : > { %828 = vmatpush.bf16.msrb.mxu1 %v2642_v13  ;;  %v3391_v13 = vld [vmem:[%s4930_s3 + $0x64] sm:$0xf]  ;;  %v2695_v50 = vld [vmem:[%s4930_s3 + $0x38] sm:$0xf0]  ;;  %v2837_v52 = vld [vmem:[%s4930_s3 + $0x110] sm:$0xf] }
  0x45   : > { %1058 = vmatpush.bf16.msrb.mxu2 %v2710_v0  ;;  %1073 = vmatpush.bf16.msrb.mxu3 %v2766_v9  ;;  %v2722_v15 = vor.u32 %v3391_v13, %v2719_v14  ;;  %v2698_v51 = vor.u32 %v3385_v49, %v2695_v50  ;;  %v3414_v53 = vld [vmem:[%s4930_s3 + $0x114] sm:$0xf0]  ;;  %v2733_v54 = vld [vmem:[%s4930_s3 + $0x80] sm:$0xf]  ;;  %v3396_v56 = vld [vmem:[%s4930_s3 + $0x84] sm:$0xf0] }
  0x46   : > { %510 = vmatmul.bf16.gmra.mxu0 %v414_v25  ;;  %v2838_v55 = vor.u32 %v3414_v53, %v2837_v52  ;;  %v2734_v57 = vor.u32 %v3396_v56, %v2733_v54  ;;  %v3380_v59 = vld [vmem:[%s4930_s3 + $0x4] sm:$0xf0]  ;;  %v2933_v60 = vld [vmem:[%s4930_s3 + $0x1d0] sm:$0xf]  ;;  %v3438_v62 = vld [vmem:[%s4930_s3 + $0x1d4] sm:$0xf0] }
  0x47   : > { %810 = vmatpush.bf16.msrb.mxu0 %v2630_v22  ;;  %529 = vmatmul.bf16.gmra.mxu1 %v414_v25  ;;  %v2693_v22 = vld [vmem:[%s4930_s3 + $0x30] sm:$0xf]  ;;  %v3389_v25 = vld [vmem:[%s4930_s3 + $0x54] sm:$0xf]  ;;  %v3383_v63 = vld [vmem:[%s4930_s3 + $0x24] sm:$0xf]  ;;  %v2934_v1 = vor.u32 %v3438_v62, %v2933_v60 }
  0x48   : > { %829 = vmatpush.bf16.msrb.mxu1 %v2634_v23  ;;  %689 = vmatmul.bf16.gmra.mxu3 %v574_v29  ;;  %v3386_v23 = vld [vmem:[%s4930_s3 + $0x34] sm:$0xf0]  ;;  %v2714_v27 = vor.u32 %v3389_v25, %v2711_v26  ;;  %v2687_v0 = vld [vmem:[%s4930_s3 + $0x28] sm:$0xf0]  ;;  %v2829_v5 = vld [vmem:[%s4930_s3 + $0x100] sm:$0xf] }
  0x49   : > { %1059 = vmatpush.bf16.msrb.mxu2 %v2702_v12  ;;  %v2694_v24 = vor.u32 %v3386_v23, %v2693_v22  ;;  %1074 = vmatpush.bf16.msrb.mxu3 %v2758_v21  ;;  %v2690_v2 = vor.u32 %v3383_v63, %v2687_v0  ;;  %v2783_v4 = vld [vmem:[%s4930_s3 + $0xe8] sm:$0xf0]  ;;  %v2925_v10 = vld [vmem:[%s4930_s3 + $0x1c0] sm:$0xf]  ;;  %v3436_v11 = vld [vmem:[%s4930_s3 + $0x1c4] sm:$0xf0] }
  0x4a   : > { %v2926_v13 = vor.u32 %v3436_v11, %v2925_v10  ;;  %v3381_v14 = vld [vmem:[%s4930_s3 + $0x14] sm:$0xf]  ;;  %v2821_v19 = vld [vmem:[%s4930_s3 + $0xf0] sm:$0xf]  ;;  %v3410_v20 = vld [vmem:[%s4930_s3 + $0xf4] sm:$0xf0] }
  0x4b   : > { %811 = vmatpush.bf16.msrb.mxu0 %v2622_v30  ;;  %v2749_v30 = vld [vmem:[%s4930_s3 + $0xa0] sm:$0xf]  ;;  %v3405_v16 = vld [vmem:[%s4930_s3 + $0xd4] sm:$0xf]  ;;  %v2822_v22 = vor.u32 %v3410_v20, %v2821_v19  ;;  %v2917_v26 = vld [vmem:[%s4930_s3 + $0x1b0] sm:$0xf] }
  0x4c   : > { %830 = vmatpush.bf16.msrb.mxu1 %v2626_v31  ;;  %670 = vmatmul.bf16.gmra.mxu2 %v574_v29  ;;  %v3418_v29 = vld [vmem:[%s4930_s3 + $0x134] sm:$0xf0]  ;;  %v2750_v33 = vor.u32 %v3400_v32, %v2749_v30  ;;  %v3085_v23 = vld [vmem:[%s4930_s3 + $0x2c0] sm:$0xf]  ;;  %v2671_v30 = vld [vmem:[%s4930_s3 + $0x8] sm:$0xf0] }
  0x4d   : > { %1060 = vmatpush.bf16.msrb.mxu2 %v2694_v24  ;;  %v2854_v31 = vor.u32 %v3418_v29, %v2853_v28  ;;  %v3468_v24 = vld [vmem:[%s4930_s3 + $0x2c4] sm:$0xf0]  ;;  %v3379_v29 = vld [vmem:[%s4930_s3 + $0x4] sm:$0xf]  ;;  %v3021_v49 = vld [vmem:[%s4930_s3 + $0x240] sm:$0xf] }
  0x4e   : > { %1075 = vmatpush.bf16.msrb.mxu3 %v2750_v33  ;;  %v3086_v25 = vor.u32 %v3468_v24, %v3085_v23  ;;  %v2674_v32 = vor.u32 %v3379_v29, %v2671_v30  ;;  %v2767_v33 = vld [vmem:[%s4930_s3 + $0xc8] sm:$0xf0]  ;;  %v3452_v50 = vld [vmem:[%s4930_s3 + $0x244] sm:$0xf0]  ;;  %v3069_v52 = vld [vmem:[%s4930_s3 + $0x2a0] sm:$0xf] }
  0x4f   : > { %812 = vmatpush.bf16.msrb.mxu0 %v2614_v36  ;;  %v2686_v36 = vor.u32 %v3384_v35, %v2685_v34  ;;  %v3029_v34 = vld [vmem:[%s4930_s3 + $0x250] sm:$0xf]  ;;  %v3454_v35 = vld [vmem:[%s4930_s3 + $0x254] sm:$0xf0]  ;;  %v3464_v53 = vld [vmem:[%s4930_s3 + $0x2a4] sm:$0xf0] }
  0x50   : > { %831 = vmatpush.bf16.msrb.mxu1 %v2618_v37  ;;  %v3387_v37 = vld [vmem:[%s4930_s3 + $0x44] sm:$0xf]  ;;  %v3070_v54 = vor.u32 %v3464_v53, %v3069_v52  ;;  %v3430_v56 = vld [vmem:[%s4930_s3 + $0x194] sm:$0xf0]  ;;  %v3061_v0 = vld [vmem:[%s4930_s3 + $0x290] sm:$0xf] }
  0x51   : > { %v2706_v39 = vor.u32 %v3387_v37, %v2703_v38  ;;  %1061 = vmatpush.bf16.msrb.mxu2 %v2686_v36  ;;  %v3030_v37 = vor.u32 %v3454_v35, %v3029_v34  ;;  %v3077_v38 = vld [vmem:[%s4930_s3 + $0x2b0] sm:$0xf]  ;;  %v3450_v62 = vld [vmem:[%s4930_s3 + $0x234] sm:$0xf0]  ;;  %v2743_v10 = vld [vmem:[%s4930_s3 + $0x98] sm:$0xf0] }
  0x52   : > { %v2885_v19 = vld [vmem:[%s4930_s3 + $0x170] sm:$0xf]  ;;  %v3426_v20 = vld [vmem:[%s4930_s3 + $0x174] sm:$0xf0]  ;;  %v2735_v23 = vld [vmem:[%s4930_s3 + $0x88] sm:$0xf0] }
  0x53   : > { %813 = vmatpush.bf16.msrb.mxu0 %v2606_v42  ;;  %v2846_v42 = vor.u32 %v3416_v41, %v2845_v40  ;;  %v2989_v35 = vld [vmem:[%s4930_s3 + $0x200] sm:$0xf] }
  0x54   : > { %832 = vmatpush.bf16.msrb.mxu1 %v2610_v43  ;;  %v2741_v43 = vld [vmem:[%s4930_s3 + $0x90] sm:$0xf] }
  0x56   : > { %814 = vmatmul.bf16.vlgmr.msrb.gmra.mxu0 %v723_v46 }
  0x57   : > { %833 = vmatmul.bf16.vlgmr.msrb.gmra.mxu1 %v723_v46  ;;  %1084 = vmatpush.bf16.msra.mxu0 %v2730_v3  ;;  %v2677_v46 = vld [vmem:[%s4930_s3 + $0x10] sm:$0xf]  ;;  %v3407_v3 = vld [vmem:[%s4930_s3 + $0xe4] sm:$0xf] }
  0x58   : > { %1321 = vmatpush.bf16.msra.mxu1 %v2878_v58  ;;  %v2678_v48 = vor.u32 %v3382_v47, %v2677_v46  ;;  %v2669_v58 = vld [vmem:[%s4930_s3] sm:$0xf]  ;;  %v2786_v6 = vor.u32 %v3407_v3, %v2783_v4  ;;  %v3401_v46 = vld [vmem:[%s4930_s3 + $0xb4] sm:$0xf]  ;;  %v2759_v47 = vld [vmem:[%s4930_s3 + $0xb8] sm:$0xf0] }
  0x59   : > { %v2670_v61 = vor.u32 %v3380_v59, %v2669_v58  ;;  %v3399_v58 = vld [vmem:[%s4930_s3 + $0xa4] sm:$0xf]  ;;  %v2751_v59 = vld [vmem:[%s4930_s3 + $0xa8] sm:$0xf0]  ;;  %v2893_v4 = vld [vmem:[%s4930_s3 + $0x180] sm:$0xf] }
  0x5a   : > { %1062 = vmatpush.bf16.msrb.mxu2 %v2678_v48  ;;  %v2762_v48 = vor.u32 %v3401_v46, %v2759_v47  ;;  %v2754_v60 = vor.u32 %v3399_v58, %v2751_v59  ;;  %v3442_v47 = vld [vmem:[%s4930_s3 + $0x1f4] sm:$0xf0] }
  0x5b   : > { %1085 = vmatpush.bf16.msra.mxu0 %v2722_v15  ;;  %v2679_v15 = vld [vmem:[%s4930_s3 + $0x18] sm:$0xf0] }
  0x5c   : > { %1322 = vmatpush.bf16.msra.mxu1 %v2870_v7  ;;  %v3412_v7 = vld [vmem:[%s4930_s3 + $0x104] sm:$0xf0]  ;;  %v2682_v17 = vor.u32 %v3381_v14, %v2679_v15 }
  0x5d   : > { %v2830_v9 = vor.u32 %v3412_v7, %v2829_v5  ;;  %v3428_v5 = vld [vmem:[%s4930_s3 + $0x184] sm:$0xf0] }
  0x5e   : > { %1063 = vmatpush.bf16.msrb.mxu2 %v2670_v61  ;;  %v3013_v61 = vld [vmem:[%s4930_s3 + $0x230] sm:$0xf]  ;;  %v2894_v7 = vor.u32 %v3428_v5, %v2893_v4  ;;  %v3448_v14 = vld [vmem:[%s4930_s3 + $0x224] sm:$0xf0] }
  0x5f   : > { %1086 = vmatpush.bf16.msra.mxu0 %v2714_v27  ;;  %v3434_v27 = vld [vmem:[%s4930_s3 + $0x1b4] sm:$0xf0]  ;;  %v3014_v63 = vor.u32 %v3450_v62, %v3013_v61 }
  0x60   : > { %1323 = vmatpush.bf16.msra.mxu1 %v2862_v18  ;;  %v2775_v18 = vld [vmem:[%s4930_s3 + $0xd8] sm:$0xf0]  ;;  %v2918_v28 = vor.u32 %v3434_v27, %v2917_v26  ;;  %v2997_v26 = vld [vmem:[%s4930_s3 + $0x210] sm:$0xf]  ;;  %v3446_v27 = vld [vmem:[%s4930_s3 + $0x214] sm:$0xf0] }
  0x61   : > { %v2778_v21 = vor.u32 %v3405_v16, %v2775_v18  ;;  %v3053_v16 = vld [vmem:[%s4930_s3 + $0x280] sm:$0xf] }
  0x62   : > { %1099 = vmatpush.bf16.msra.mxu2 %v2786_v6 }
  0x63   : > { %1087 = vmatpush.bf16.msra.mxu0 %v2706_v39  ;;  %v3466_v39 = vld [vmem:[%s4930_s3 + $0x2b4] sm:$0xf0] }
  0x64   : > { %1324 = vmatpush.bf16.msra.mxu1 %v2854_v31  ;;  %v3403_v31 = vld [vmem:[%s4930_s3 + $0xc4] sm:$0xf]  ;;  %v3078_v41 = vor.u32 %v3466_v39, %v3077_v38  ;;  %v3456_v38 = vld [vmem:[%s4930_s3 + $0x264] sm:$0xf0] }
  0x65   : > { %v2770_v36 = vor.u32 %v3403_v31, %v2767_v33  ;;  %v2998_v31 = vor.u32 %v3446_v27, %v2997_v26  ;;  %v3467_v26 = vld [vmem:[%s4930_s3 + $0x2c4] sm:$0xf]  ;;  %v3087_v27 = vld [vmem:[%s4930_s3 + $0x2c8] sm:$0xf0] }
  0x66   : > { %819 = vmatmul.bf16.gmra.mxu0 %v722_v45  ;;  %1100 = vmatpush.bf16.msra.mxu2 %v2778_v21  ;;  %v2886_v21 = vor.u32 %v3426_v20, %v2885_v19  ;;  %v3423_v19 = vld [vmem:[%s4930_s3 + $0x164] sm:$0xf] }
  0x67   : > { %838 = vmatmul.bf16.gmra.mxu1 %v722_v45  ;;  %v2742_v45 = vor.u32 %v3398_v44, %v2741_v43  ;;  %1088 = vmatpush.bf16.msra.mxu0 %v2698_v51  ;;  %v3432_v43 = vld [vmem:[%s4930_s3 + $0x1a4] sm:$0xf0]  ;;  %v3022_v51 = vor.u32 %v3452_v50, %v3021_v49 }
  0x68   : > { %1325 = vmatpush.bf16.msra.mxu1 %v2846_v42  ;;  %v2909_v42 = vld [vmem:[%s4930_s3 + $0x1a0] sm:$0xf] }
  0x69   : > { %1076 = vmatpush.bf16.msrb.mxu3 %v2742_v45  ;;  %v2910_v45 = vor.u32 %v3432_v43, %v2909_v42  ;;  %v388_v42 = vld [vmem:[%s4929_s2] sm:$0x3] }
  0x6a   : > { %1101 = vmatpush.bf16.msra.mxu2 %v2770_v36  ;;  %v3444_v36 = vld [vmem:[%s4930_s3 + $0x204] sm:$0xf0]  ;;  %v4427_v43 = vperm.slane %v388_v42, 0  ;;  %v4437_v52 = vperm.slane %v388_v42, 1  ;;  %v3435_v42 = vld [vmem:[%s4930_s3 + $0x1c4] sm:$0xf] }
  0x6b   : > { %1089 = vmatpush.bf16.msra.mxu0 %v2690_v2  ;;  %v2990_v39 = vor.u32 %v3444_v36, %v2989_v35 }
  0x6c   : > { %1326 = vmatpush.bf16.msra.mxu1 %v2838_v55  ;;  %v2901_v55 = vld [vmem:[%s4930_s3 + $0x190] sm:$0xf] }
  0x6d   : > { %1077 = vmatpush.bf16.msrb.mxu3 %v2734_v57  ;;  %v2902_v57 = vor.u32 %v3430_v56, %v2901_v55  ;;  %v3440_v55 = vld [vmem:[%s4930_s3 + $0x1e4] sm:$0xf0] }
  0x6e   : > { %1102 = vmatpush.bf16.msra.mxu2 %v2762_v48 }
  0x6f   : > { %1090 = vmatpush.bf16.msra.mxu0 %v2682_v17  ;;  %v3460_v17 = vld [vmem:[%s4930_s3 + $0x284] sm:$0xf0] }
  0x70   : > { %1327 = vmatpush.bf16.msra.mxu1 %v2830_v9  ;;  %v3397_v9 = vld [vmem:[%s4930_s3 + $0x94] sm:$0xf]  ;;  %v3054_v18 = vor.u32 %v3460_v17, %v3053_v16 }
  0x71   : > { %1336 = vmatpush.bf16.msra.mxu3 %v2934_v1  ;;  %v3462_v1 = vld [vmem:[%s4930_s3 + $0x294] sm:$0xf0]  ;;  %v2746_v11 = vor.u32 %v3397_v9, %v2743_v10 }
  0x72   : > { %v3062_v3 = vor.u32 %v3462_v1, %v3061_v0  ;;  %1103 = vmatpush.bf16.msra.mxu2 %v2754_v60 }
  0x73   : > { %1091 = vmatpush.bf16.msra.mxu0 %v2674_v32  ;;  %v3458_v32 = vld [vmem:[%s4930_s3 + $0x274] sm:$0xf0] }
  0x74   : > { %1328 = vmatpush.bf16.msra.mxu1 %v2822_v22  ;;  %v3395_v22 = vld [vmem:[%s4930_s3 + $0x84] sm:$0xf] }
  0x75   : > { %1337 = vmatpush.bf16.msra.mxu3 %v2926_v13  ;;  %v3005_v13 = vld [vmem:[%s4930_s3 + $0x220] sm:$0xf]  ;;  %v2738_v24 = vor.u32 %v3395_v22, %v2735_v23  ;;  %v2935_v22 = vld [vmem:[%s4930_s3 + $0x1d8] sm:$0xf0] }
  0x76   : > { %v3006_v15 = vor.u32 %v3448_v14, %v3005_v13  ;;  %1104 = vmatpush.bf16.msra.mxu2 %v2746_v11 }
  0x77   : > { %1569 = vmatpush.bf16.msrb.mxu0 %v3030_v37  ;;  %v3037_v37 = vld [vmem:[%s4930_s3 + $0x260] sm:$0xf] }
  0x78   : > { %1584 = vmatpush.bf16.msrb.mxu1 %v3086_v25 }
  0x79   : > { %1338 = vmatpush.bf16.msra.mxu3 %v2918_v28  ;;  %v3045_v28 = vld [vmem:[%s4930_s3 + $0x270] sm:$0xf] }
  0x7a   : > { %1105 = vmatpush.bf16.msra.mxu2 %v2738_v24  ;;  %v3046_v34 = vor.u32 %v3458_v32, %v3045_v28 }
  0x7b   : > { %1570 = vmatpush.bf16.msrb.mxu0 %v3022_v51 }
  0x7c   : > { %1585 = vmatpush.bf16.msrb.mxu1 %v3078_v41  ;;  %v3038_v41 = vor.u32 %v3456_v38, %v3037_v37  ;;  %v3421_v37 = vld [vmem:[%s4930_s3 + $0x154] sm:$0xf]  ;;  %v2871_v38 = vld [vmem:[%s4930_s3 + $0x158] sm:$0xf0] }
  0x7d   : > { %1339 = vmatpush.bf16.msra.mxu3 %v2910_v45  ;;  %v2981_v45 = vld [vmem:[%s4930_s3 + $0x1f0] sm:$0xf] }
  0x7e   : > { %v2982_v49 = vor.u32 %v3442_v47, %v2981_v45  ;;  %v2927_v45 = vld [vmem:[%s4930_s3 + $0x1c8] sm:$0xf0] }
  0x7f   : > { %1571 = vmatpush.bf16.msrb.mxu0 %v3014_v63 }
  0x80   : > { %1586 = vmatpush.bf16.msrb.mxu1 %v3070_v54  ;;  %v2973_v54 = vld [vmem:[%s4930_s3 + $0x1e0] sm:$0xf] }
  0x81   : > { %1340 = vmatpush.bf16.msra.mxu3 %v2902_v57  ;;  %v2974_v56 = vor.u32 %v3440_v55, %v2973_v54  ;;  %v2863_v54 = vld [vmem:[%s4930_s3 + $0x148] sm:$0xf0] }
  0x83   : > { %1572 = vmatpush.bf16.msrb.mxu0 %v3006_v15 }
  0x84   : > { %1587 = vmatpush.bf16.msrb.mxu1 %v3062_v3 }
  0x85   : > { %1341 = vmatpush.bf16.msra.mxu3 %v2894_v7 }
  0x87   : > { %1573 = vmatpush.bf16.msrb.mxu0 %v2998_v31 }
  0x88   : > { %1588 = vmatpush.bf16.msrb.mxu1 %v3054_v18 }
  0x89   : > { %1342 = vmatpush.bf16.msra.mxu3 %v2886_v21  ;;  %v3437_v21 = vld [vmem:[%s4930_s3 + $0x1d4] sm:$0xf] }
  0x8a   : > { %v2938_v36 = vor.u32 %v3437_v21, %v2935_v22 }
  0x8b   : > { %1574 = vmatpush.bf16.msrb.mxu0 %v2990_v39 }
  0x8c   : > { %1589 = vmatpush.bf16.msrb.mxu1 %v3046_v34 }
  0x8f   : > { %1575 = vmatpush.bf16.msrb.mxu0 %v2982_v49  ;;  %v3465_v49 = vld [vmem:[%s4930_s3 + $0x2b4] sm:$0xf] }
  0x90   : > { %1590 = vmatpush.bf16.msrb.mxu1 %v3038_v41 }
  0x93   : > { %1576 = vmatpush.bf16.msrb.mxu0 %v2974_v56 }
  0xb3   : > { %v4240_v8 = vpop.f32.mrf.mxu0 }
  0xb4   : > { %v4248_v12 = vpop.f32.mrf.mxu1  ;;  %v540_v57 = vadd.f32 %v4427_v43, %v4240_v8 }
  0xb5   : > { %v541_v1 = vadd.f32 %v4437_v52, %v4248_v12 }
  0xbb   : > { %v4304_v40 = vpop.f32.mrf.mxu0  ;;  %v685_v29 = vpop.f32.mrf.mxu3 }
  0xbc   : > { %v4312_v44 = vpop.f32.mrf.mxu1  ;;  %v542_v50 = vadd.f32 %v4427_v43, %v4304_v40  ;;  %v696_v8 = vadd.f32 %v685_v29, %v541_v1 }
  0xbd   : > { %v543_v40 = vadd.f32 %v4437_v52, %v4312_v44 }
  0xbf   : > { %v666_v33 = vpop.f32.mrf.mxu2 }
  0xc0   : > { %v695_v63 = vadd.f32 %v666_v33, %v540_v57  ;;  %v3433_v57 = vld [vmem:[%s4930_s3 + $0x1b4] sm:$0xf] }
  0xc3   : > { %v4356_v2 = vpop.f32.mrf.mxu0  ;;  %v687_v51 = vpop.f32.mrf.mxu3 }
  0xc4   : > { %v4364_v6 = vpop.f32.mrf.mxu1  ;;  %v698_v59 = vadd.f32 %v687_v51, %v543_v40  ;;  %v544_v3 = vadd.f32 %v4427_v43, %v4356_v2  ;;  %v2919_v40 = vld [vmem:[%s4930_s3 + $0x1b8] sm:$0xf0] }
  0xc5   : > { %v545_v9 = vadd.f32 %v4437_v52, %v4364_v6  ;;  %v2879_v6 = vld [vmem:[%s4930_s3 + $0x168] sm:$0xf0] }
  0xc6   : > { %v2882_v32 = vor.u32 %v3423_v19, %v2879_v6  ;;  %v3429_v19 = vld [vmem:[%s4930_s3 + $0x194] sm:$0xf]  ;;  %v2903_v6 = vld [vmem:[%s4930_s3 + $0x198] sm:$0xf0] }
  0xc7   : > { %v668_v53 = vpop.f32.mrf.mxu2 }
  0xc8   : > { %v697_v58 = vadd.f32 %v668_v53, %v542_v50  ;;  %v3079_v50 = vld [vmem:[%s4930_s3 + $0x2b8] sm:$0xf0]  ;;  %v2874_v53 = vor.u32 %v3421_v37, %v2871_v38 }
  0xc9   : > { %v3047_v38 = vld [vmem:[%s4930_s3 + $0x278] sm:$0xf0] }
  0xcb   : > { %v4396_v25 = vpop.f32.mrf.mxu0  ;;  %v690_v7 = vpop.f32.mrf.mxu3 }
  0xcc   : > { %v4407_v30 = vpop.f32.mrf.mxu1  ;;  %v700_v14 = vadd.f32 %v690_v7, %v545_v9  ;;  %v546_v47 = vadd.f32 %v4427_v43, %v4396_v25  ;;  %v2930_v25 = vor.u32 %v3435_v42, %v2927_v45  ;;  %v3419_v43 = vld [vmem:[%s4930_s3 + $0x144] sm:$0xf]  ;;  %v2911_v7 = vld [vmem:[%s4930_s3 + $0x1a8] sm:$0xf0] }
  0xcd   : > { %v2831_v45 = vld [vmem:[%s4930_s3 + $0x108] sm:$0xf0] }
  0xcf   : > { %v671_v10 = vpop.f32.mrf.mxu2 }
  0xd0   : > { %v699_v11 = vadd.f32 %v671_v10, %v544_v3 }
  0xd3   : > { %v815_v46 = vpop.f32.mrf.mxu0  ;;  %v692_v55 = vpop.f32.mrf.mxu3 }
  0xd4   : > { %v834_v48 = vpop.f32.mrf.mxu1  ;;  %v844_v4 = vadd.f32 %v815_v46, %v695_v63  ;;  %v3090_v46 = vor.u32 %v3467_v26, %v3087_v27  ;;  %v3055_v26 = vld [vmem:[%s4930_s3 + $0x288] sm:$0xf0] }
  0xd5   : > { %v4459_v13 = vadd.f32 %v834_v48, %v696_v8  ;;  %v3431_v8 = vld [vmem:[%s4930_s3 + $0x1a4] sm:$0xf] }
  0xd6   : > { %v852_v15 = vmax.f32 %v844_v4, 0.0  ;;  %v2922_v4 = vor.u32 %v3433_v57, %v2919_v40 }
  0xd7   : > { %v853_v23 = vmax.f32 %v4459_v13, 0.0  ;;  %v673_v51 = vpop.f32.mrf.mxu2 }
  0xd8   : > { %v1123_v28 = vrot.slane %v852_v15, 4 }
  0xd9   : > { %v1124_v21 = vrot.slane %v853_v23, 4 }
  0xdb   : > { %v817_v60 = vpop.f32.mrf.mxu0 }
  0xdc   : > { %v846_v61 = vadd.f32 %v817_v60, %v697_v58  ;;  %v836_v62 = vpop.f32.mrf.mxu1  ;;  %v3082_v58 = vor.u32 %v3465_v49, %v3079_v50  ;;  %v701_v60 = vadd.f32 %v673_v51, %v546_v47  ;;  %v2887_v47 = vld [vmem:[%s4930_s3 + $0x178] sm:$0xf0]  ;;  %v3453_v49 = vld [vmem:[%s4930_s3 + $0x254] sm:$0xf] }
  0xdd   : > { %v847_v0 = vadd.f32 %v836_v62, %v698_v59  ;;  %v547_v59 = vadd.f32 %v4437_v52, %v4407_v30  ;;  %v3071_v62 = vld [vmem:[%s4930_s3 + $0x2a8] sm:$0xf0]  ;;  %v3417_v30 = vld [vmem:[%s4930_s3 + $0x134] sm:$0xf]  ;;  %v2855_v52 = vld [vmem:[%s4930_s3 + $0x138] sm:$0xf0] }
  0xde   : > { %v4453_v5 = vmax.f32 %v846_v61, 0.0  ;;  %v3463_v61 = vld [vmem:[%s4930_s3 + $0x2a4] sm:$0xf]  ;;  %v3031_v51 = vld [vmem:[%s4930_s3 + $0x258] sm:$0xf0] }
  0xdf   : > { %v4455_v44 = vmax.f32 %v847_v0, 0.0  ;;  %v2866_v0 = vor.u32 %v3419_v43, %v2863_v54  ;;  %v702_v1 = vadd.f32 %v692_v55, %v547_v59  ;;  %v3074_v9 = vor.u32 %v3463_v61, %v3071_v62  ;;  %v3409_v55 = vld [vmem:[%s4930_s3 + $0xf4] sm:$0xf]  ;;  %v3023_v59 = vld [vmem:[%s4930_s3 + $0x248] sm:$0xf0] }
  0xe0   : > { %v863_v12 = vrot.slane %v4453_v5, 4  ;;  %v1133_v39 = vsel %vm867_vm1, %v1123_v28, %v4453_v5  ;;  %v3034_v57 = vor.u32 %v3453_v49, %v3031_v51  ;;  %v3449_v62 = vld [vmem:[%s4930_s3 + $0x234] sm:$0xf] }
  0xe1   : > { %v864_v2 = vrot.slane %v4455_v44, 4  ;;  %v3495_v51 = vld [vmem:[%s4932_s5 + $0xd0] sm:$0xff] }
  0xe2   : > { %v868_v29 = vsel %vm867_vm1, %v852_v15, %v863_v12  ;;  %v2858_v15 = vor.u32 %v3417_v30, %v2855_v52  ;;  %v3445_v30 = vld [vmem:[%s4930_s3 + $0x214] sm:$0xf] }
  0xe3   : > { %v820_v16 = vpop.f32.mrf.mxu0  ;;  %v869_v35 = vsel %vm867_vm1, %v853_v23, %v864_v2  ;;  %v3415_v2 = vld [vmem:[%s4930_s3 + $0x124] sm:$0xf]  ;;  %v2906_v23 = vor.u32 %v3429_v19, %v2903_v6  ;;  %v3504_v19 = vld [vmem:[%s4932_s5 + $0x118] sm:$0xff] }
  0xe4   : > { %v848_v17 = vadd.f32 %v820_v16, %v699_v11  ;;  %v839_v18 = vpop.f32.mrf.mxu1  ;;  %v3461_v11 = vld [vmem:[%s4930_s3 + $0x294] sm:$0xf]  ;;  %v2914_v16 = vor.u32 %v3431_v8, %v2911_v7  ;;  %v3443_v8 = vld [vmem:[%s4930_s3 + $0x204] sm:$0xf]  ;;  %v2991_v7 = vld [vmem:[%s4930_s3 + $0x208] sm:$0xf0] }
  0xe5   : > { %v4469_v20 = vadd.f32 %v839_v18, %v700_v14  ;;  %v3063_v14 = vld [vmem:[%s4930_s3 + $0x298] sm:$0xf0]  ;;  %v3473_v6 = vld [vmem:[%s4932_s5 + $0x20] sm:$0xff] }
  0xe6   : > { %v856_v24 = vmax.f32 %v848_v17, 0.0  ;;  %v2847_v17 = vld [vmem:[%s4930_s3 + $0x128] sm:$0xf0] }
  0xe7   : > { %v857_v31 = vmax.f32 %v4469_v20, 0.0  ;;  %v3066_v20 = vor.u32 %v3461_v11, %v3063_v14  ;;  %v2850_v28 = vor.u32 %v3415_v2, %v2847_v17  ;;  %v2983_v11 = vld [vmem:[%s4930_s3 + $0x1f8] sm:$0xf0]  ;;  %v3475_v17 = vld [vmem:[%s4932_s5 + $0x30] sm:$0xff] }
  0xe8   : > { %v870_v33 = vpack.c.bf16 %v856_v24, %v868_v29  ;;  %v4486_v34 = vrot.slane %v856_v24, 4  ;;  %v3459_v24 = vld [vmem:[%s4930_s3 + $0x284] sm:$0xf]  ;;  %v1134_v29 = vsel %vm867_vm1, %v1124_v21, %v4455_v44  ;;  %v3476_v2 = vld [vmem:[%s4932_s5 + $0x38] sm:$0xff] }
  0xe9   : > { %v4499_v41 = vpack.c.bf16 %v857_v31, %v869_v35  ;;  %v1130_v18 = vrot.slane %v857_v31, 4  ;;  %v3413_v31 = vld [vmem:[%s4930_s3 + $0x114] sm:$0xf]  ;;  %v2895_v35 = vld [vmem:[%s4930_s3 + $0x188] sm:$0xf0]  ;;  %v3472_v21 = vld [vmem:[%s4932_s5 + $0x18] sm:$0xff] }
  0xea   : > { %v4510_v48 = vpack.c.bf16 %v4486_v34, %v1133_v39  ;;  %1064 = vmatmul.bf16.vlgmr.msrb.gmra.mxu2 %v870_v33  ;;  %1092 = vmatmul.bf16.vlgmr.msra.gmra.mxu0 %v870_v33  ;;  %v1381_v27 = vsel %vm867_vm1, %v4453_v5, %v4486_v34  ;;  %v3427_v34 = vld [vmem:[%s4930_s3 + $0x184] sm:$0xf] }
  0xeb   : > { %2787 = vmatmul.msk.bf16.vlgmr.msrb.gmra.mxu3 %vm1052_vm2, %v4499_v41  ;;  %1349 = vmatpush.bf16.msrb.mxu2 %v2882_v32  ;;  %v822_v56 = vpop.f32.mrf.mxu0  ;;  %v2839_v32 = vld [vmem:[%s4930_s3 + $0x118] sm:$0xf0]  ;;  %v1136_v33 = vpack.c.bf16 %v1130_v18, %v1134_v29  ;;  %v1382_v5 = vsel %vm867_vm1, %v4455_v44, %v1130_v18  ;;  %v3457_v44 = vld [vmem:[%s4930_s3 + $0x274] sm:$0xf]  ;;  %v2898_v42 = vor.u32 %v3427_v34, %v2895_v35  ;;  %v3474_v18 = vld [vmem:[%s4932_s5 + $0x28] sm:$0xff] }
  0xec   : > { %1364 = vmatpush.bf16.msrb.mxu3 %v2938_v36  ;;  %1329 = vmatmul.bf16.vlgmr.msra.gmra.mxu1 %v4510_v48  ;;  %v841_v63 = vpop.f32.mrf.mxu1  ;;  %v850_v3 = vadd.f32 %v822_v56, %v701_v60  ;;  %v3058_v36 = vor.u32 %v3459_v24, %v3055_v26  ;;  %v2842_v39 = vor.u32 %v3413_v31, %v2839_v32  ;;  %v2823_v56 = vld [vmem:[%s4930_s3 + $0xf8] sm:$0xf0]  ;;  %v3471_v24 = vld [vmem:[%s4932_s5 + $0x10] sm:$0xff]  ;;  %v3501_v26 = vld [vmem:[%s4932_s5 + $0x100] sm:$0xff] }
  0xed   : > { %1612 = vmatpush.bf16.msra.mxu1 %v3090_v46  ;;  %v851_v10 = vadd.f32 %v841_v63, %v702_v1  ;;  %v3425_v46 = vld [vmem:[%s4930_s3 + $0x174] sm:$0xf]  ;;  %v3050_v50 = vor.u32 %v3457_v44, %v3047_v38  ;;  %v2826_v60 = vor.u32 %v3409_v55, %v2823_v56  ;;  %v3015_v63 = vld [vmem:[%s4930_s3 + $0x238] sm:$0xf0]  ;;  %v3447_v1 = vld [vmem:[%s4930_s3 + $0x224] sm:$0xf] }
  0xee   : > { %v858_v12 = vmax.f32 %v850_v3, 0.0  ;;  %v2890_v54 = vor.u32 %v3425_v46, %v2887_v47  ;;  %v3007_v3 = vld [vmem:[%s4930_s3 + $0x228] sm:$0xf0]  ;;  %v3469_v29 = vld [vmem:[%s4932_s5] sm:$0xff] }
  0xef   : > { %1350 = vmatpush.bf16.msrb.mxu2 %v2874_v53  ;;  %v859_v22 = vmax.f32 %v851_v10, 0.0  ;;  %v3455_v53 = vld [vmem:[%s4930_s3 + $0x264] sm:$0xf]  ;;  %v3441_v10 = vld [vmem:[%s4930_s3 + $0x1f4] sm:$0xf]  ;;  %v3498_v31 = vld [vmem:[%s4932_s5 + $0xe8] sm:$0xff] }
  0xf0   : > { %1365 = vmatpush.bf16.msrb.mxu3 %v2930_v25  ;;  %v4584_v13 = vpack.c.bf16 %v858_v12, %v1381_v27  ;;  %v3039_v25 = vld [vmem:[%s4930_s3 + $0x268] sm:$0xf0]  ;;  %v2986_v14 = vor.u32 %v3441_v10, %v2983_v11  ;;  %v3481_v35 = vld [vmem:[%s4932_s5 + $0x60] sm:$0xff] }
  0xf1   : > { %1613 = vmatpush.bf16.msra.mxu1 %v3082_v58  ;;  %v1384_v37 = vpack.c.bf16 %v859_v22, %v1382_v5  ;;  %v3042_v40 = vor.u32 %v3455_v53, %v3039_v25  ;;  %v3451_v58 = vld [vmem:[%s4930_s3 + $0x244] sm:$0xf]  ;;  %v2975_v12 = vld [vmem:[%s4930_s3 + $0x1e8] sm:$0xf0] }
  0xf2   : > { %v3026_v61 = vor.u32 %v3451_v58, %v3023_v59  ;;  %v3502_v22 = vld [vmem:[%s4932_s5 + $0x108] sm:$0xff]  ;;  %v3497_v5 = vld [vmem:[%s4932_s5 + $0xe0] sm:$0xff] }
  0xf3   : > { %1351 = vmatpush.bf16.msrb.mxu2 %v2866_v0  ;;  %v3018_v0 = vor.u32 %v3449_v62, %v3015_v63  ;;  %v3470_v27 = vld [vmem:[%s4932_s5 + $0x8] sm:$0xff]  ;;  %v3477_v25 = vld [vmem:[%s4932_s5 + $0x40] sm:$0xff] }
  0xf4   : > { %1366 = vmatpush.bf16.msrb.mxu3 %v2922_v4  ;;  %v3010_v4 = vor.u32 %v3447_v1, %v3007_v3  ;;  %v3478_v46 = vld [vmem:[%s4932_s5 + $0x48] sm:$0xff]  ;;  %v3489_v62 = vld [vmem:[%s4932_s5 + $0xa0] sm:$0xff] }
  0xf5   : > { %1614 = vmatpush.bf16.msra.mxu1 %v3074_v9  ;;  %v2994_v9 = vor.u32 %v3443_v8, %v2991_v7  ;;  %v3510_v47 = vld [vmem:[%s4932_s5 + $0x148] sm:$0xff]  ;;  %v3493_v3 = vld [vmem:[%s4932_s5 + $0xc0] sm:$0xff]  ;;  %v3488_v7 = vld [vmem:[%s4932_s5 + $0x98] sm:$0xff] }
  0xf6   : > { %v3494_v58 = vld [vmem:[%s4932_s5 + $0xc8] sm:$0xff] }
  0xf7   : > { %1352 = vmatpush.bf16.msrb.mxu2 %v2858_v15  ;;  %v3439_v15 = vld [vmem:[%s4930_s3 + $0x1e4] sm:$0xf] }
  0xf8   : > { %1367 = vmatpush.bf16.msrb.mxu3 %v2914_v16  ;;  %v2978_v16 = vor.u32 %v3439_v15, %v2975_v12  ;;  %v3492_v15 = vld [vmem:[%s4932_s5 + $0xb8] sm:$0xff] }
  0xf9   : > { %1615 = vmatpush.bf16.msra.mxu1 %v3066_v20  ;;  %v3503_v20 = vld [vmem:[%s4932_s5 + $0x110] sm:$0xff] }
  0xfa   : > { %2788 = vmatmul.msk.bf16.vlgmr.msra.gmra.mxu2 %vm1052_vm2, %v4499_v41  ;;  %1577 = vmatmul.bf16.vlgmr.msrb.gmra.mxu0 %v4584_v13  ;;  %v3411_v41 = vld [vmem:[%s4930_s3 + $0x104] sm:$0xf] }
  0xfb   : > { %2939 = vmatmul.msk.bf16.vlgmr.msra.gmra.mxu3 %vm1052_vm2, %v1136_v33  ;;  %1353 = vmatpush.bf16.msrb.mxu2 %v2850_v28  ;;  %v2834_v43 = vor.u32 %v3411_v41, %v2831_v45  ;;  %v3500_v28 = vld [vmem:[%s4932_s5 + $0xf8] sm:$0xff]  ;;  %v4754_v41 = vld [vmem:[%s4931_s4] sm:$0x3] }
  0xfc   : > { %1368 = vmatpush.bf16.msrb.mxu3 %v2906_v23  ;;  %3091 = vmatmul.msk.bf16.vlgmr.msrb.gmra.mxu1 %vm1052_vm2, %v1384_v37  ;;  %v3496_v45 = vld [vmem:[%s4932_s5 + $0xd8] sm:$0xff] }
  0xfd   : > { %1616 = vmatpush.bf16.msra.mxu1 %v3058_v36  ;;  %v3480_v36 = vld [vmem:[%s4932_s5 + $0x58] sm:$0xff] }
  0xff   : > { %1354 = vmatpush.bf16.msrb.mxu2 %v2842_v39 }
 0x100   : > { %1369 = vmatpush.bf16.msrb.mxu3 %v2898_v42  ;;  %v3479_v42 = vld [vmem:[%s4932_s5 + $0x50] sm:$0xff] }
 0x101   : > { %1617 = vmatpush.bf16.msra.mxu1 %v3050_v50  ;;  %v1113_v50 = vperm.slane %v4754_v41, 0 }
 0x103   : > { %1355 = vmatpush.bf16.msrb.mxu2 %v2834_v43  ;;  %v3509_v43 = vld [vmem:[%s4932_s5 + $0x140] sm:$0xff] }
 0x104   : > { %1370 = vmatpush.bf16.msrb.mxu3 %v2890_v54  ;;  %v3490_v54 = vld [vmem:[%s4932_s5 + $0xa8] sm:$0xff] }
 0x105   : > { %1618 = vmatpush.bf16.msra.mxu1 %v3042_v40 }
 0x107   : > { %1356 = vmatpush.bf16.msrb.mxu2 %v2826_v60 }
 0x108   : > { %1597 = vmatpush.bf16.msra.mxu3 %v3034_v57 }
 0x109   : > { %1918 = vmatpush.bf16.msrb.mxu1 %v3496_v45 }
 0x10a   : > { %1357 = vmatmul.bf16.vlgmr.msrb.gmra.mxu2 %v4510_v48  ;;  %v2999_v48 = vld [vmem:[%s4930_s3 + $0x218] sm:$0xf0] }
 0x10b   : > { %2940 = vmatmul.msk.bf16.vlgmr.msrb.gmra.mxu3 %vm1052_vm2, %v1136_v33  ;;  %v3002_v52 = vor.u32 %v3445_v30, %v2999_v48  ;;  %1752 = vmatpush.bf16.msra.mxu2 %v3476_v2  ;;  %v3482_v33 = vld [vmem:[%s4932_s5 + $0x68] sm:$0xff]  ;;  %v3487_v2 = vld [vmem:[%s4932_s5 + $0x90] sm:$0xff] }
 0x10c   : > { %1598 = vmatpush.bf16.msra.mxu3 %v3026_v61  ;;  %3092 = vmatmul.msk.bf16.vlgmr.msra.gmra.mxu1 %vm1052_vm2, %v1384_v37 }
 0x10d   : > { %1767 = vmatpush.bf16.msra.mxu0 %v3482_v33  ;;  %1919 = vmatpush.bf16.msrb.mxu1 %v3495_v51  ;;  %v2075_v33 = vld [vmem:[%s4934_s7] sm:$0xff] }
 0x10f   : > { %1753 = vmatpush.bf16.msra.mxu2 %v3475_v17  ;;  %v3507_v17 = vld [vmem:[%s4932_s5 + $0x130] sm:$0xff] }
 0x110   : > { %1599 = vmatpush.bf16.msra.mxu3 %v3018_v0 }
 0x111   : > { %1768 = vmatpush.bf16.msra.mxu0 %v3481_v35  ;;  %1920 = vmatpush.bf16.msrb.mxu1 %v3494_v58 }
 0x113   : > { %1754 = vmatpush.bf16.msra.mxu2 %v3474_v18 }
 0x114   : > { %1600 = vmatpush.bf16.msra.mxu3 %v3010_v4 }
 0x115   : > { %1769 = vmatpush.bf16.msra.mxu0 %v3480_v36  ;;  %1921 = vmatpush.bf16.msrb.mxu1 %v3493_v3  ;;  %v1114_v36 = vperm.slane %v4754_v41, 1 }
 0x117   : > { %1755 = vmatpush.bf16.msra.mxu2 %v3473_v6 }
 0x118   : > { %1601 = vmatpush.bf16.msra.mxu3 %v3002_v52 }
 0x119   : > { %1770 = vmatpush.bf16.msra.mxu0 %v3479_v42  ;;  %1922 = vmatpush.bf16.msrb.mxu1 %v3492_v15 }
 0x11b   : > { %1756 = vmatpush.bf16.msra.mxu2 %v3472_v21  ;;  %v3506_v21 = vld [vmem:[%s4932_s5 + $0x128] sm:$0xff] }
 0x11c   : > { %1602 = vmatpush.bf16.msra.mxu3 %v2994_v9  ;;  %v3508_v9 = vld [vmem:[%s4932_s5 + $0x138] sm:$0xff] }
 0x11d   : > { %1771 = vmatpush.bf16.msra.mxu0 %v3478_v46 }
 0x11f   : > { %1757 = vmatpush.bf16.msra.mxu2 %v3471_v24  ;;  %v3505_v24 = vld [vmem:[%s4932_s5 + $0x120] sm:$0xff] }
 0x120   : > { %1603 = vmatpush.bf16.msra.mxu3 %v2986_v14 }
 0x121   : > { %1772 = vmatpush.bf16.msra.mxu0 %v3477_v25 }
 0x123   : > { %1758 = vmatpush.bf16.msra.mxu2 %v3470_v27 }
 0x124   : > { %1604 = vmatpush.bf16.msra.mxu3 %v2978_v16 }
 0x125   : > { %1903 = vmatpush.bf16.msrb.mxu0 %v3490_v54 }
 0x127   : > { %1605 = vmatmul.bf16.vlgmr.msra.gmra.mxu3 %v4584_v13  ;;  %v3499_v13 = vld [vmem:[%s4932_s5 + $0xf0] sm:$0xff]  ;;  %1759 = vmatpush.bf16.msra.mxu2 %v3469_v29 }
 0x128   : > { %2048 = vmatpush.bf16.msrb.mxu3 %v3504_v19  ;;  %v3491_v19 = vld [vmem:[%s4932_s5 + $0xb0] sm:$0xff] }
 0x129   : > { %1904 = vmatpush.bf16.msrb.mxu0 %v3489_v62  ;;  %1923 = vmatpush.bf16.msrb.mxu1 %v3491_v19  ;;  %v2077_v29 = vld [vmem:[%s4934_s7 + $0x10] sm:$0xff] }
 0x12b   : > { %2063 = vmatpush.bf16.msrb.mxu2 %v3510_v47 }
 0x12c   : > { %2049 = vmatpush.bf16.msrb.mxu3 %v3503_v20  ;;  %v3486_v20 = vld [vmem:[%s4932_s5 + $0x88] sm:$0xff] }
 0x12d   : > { %1905 = vmatpush.bf16.msrb.mxu0 %v3488_v7 }
 0x12f   : > { %2064 = vmatpush.bf16.msrb.mxu2 %v3509_v43 }
 0x130   : > { %2050 = vmatpush.bf16.msrb.mxu3 %v3502_v22  ;;  %v3485_v22 = vld [vmem:[%s4932_s5 + $0x80] sm:$0xff] }
 0x131   : > { %1906 = vmatpush.bf16.msrb.mxu0 %v3487_v2 }
 0x133   : > { %2065 = vmatpush.bf16.msrb.mxu2 %v3508_v9  ;;  %v4859_v9 = vld [vmem:[%s4935_s8] sm:$0x1] }
 0x134   : > { %2051 = vmatpush.bf16.msrb.mxu3 %v3501_v26 }
 0x135   : > { %1907 = vmatpush.bf16.msrb.mxu0 %v3486_v20 }
 0x137   : > { %2066 = vmatpush.bf16.msrb.mxu2 %v3507_v17 }
 0x138   : > { %2052 = vmatpush.bf16.msrb.mxu3 %v3500_v28  ;;  %v2078_v28 = vld [vmem:[%s4934_s7 + $0x18] sm:$0xff] }
 0x139   : > { %1908 = vmatpush.bf16.msrb.mxu0 %v3485_v22  ;;  %2097 = vmatpush.msra.mxu1 %v2078_v28 }
 0x13b   : > { %2067 = vmatpush.bf16.msrb.mxu2 %v3506_v21  ;;  %2098 = vmatpush.msra.mxu1 %v2077_v29 }
 0x13c   : > { %2053 = vmatpush.bf16.msrb.mxu3 %v3499_v13  ;;  %v3484_v13 = vld [vmem:[%s4932_s5 + $0x78] sm:$0xff] }
 0x13d   : > { %1909 = vmatpush.bf16.msrb.mxu0 %v3484_v13 }
 0x13f   : > { %2068 = vmatpush.bf16.msrb.mxu2 %v3505_v24 }
 0x140   : > { %2054 = vmatpush.bf16.msrb.mxu3 %v3498_v31  ;;  %v3483_v31 = vld [vmem:[%s4932_s5 + $0x70] sm:$0xff] }
 0x141   : > { %1910 = vmatpush.bf16.msrb.mxu0 %v3483_v31 }
 0x144   : > { %2055 = vmatpush.bf16.msrb.mxu3 %v3497_v5 }
 0x167   : > { %v4732_v32 = vpop.f32.mrf.mxu0 }
 0x169   : > { %v1330_v23 = vpop.f32.mrf.mxu1 }
 0x16d   : > { %v1065_v38 = vpop.f32.mrf.mxu2 }
 0x16e   : > { %v1079_v34 = vpop.f32.mrf.mxu3 }
 0x16f   : > { %v4746_v44 = vpop.f32.mrf.mxu0  ;;  %v1080_v49 = vadd.f32 %v1079_v34, %v1065_v38 }
 0x171   : > { %v1332_v37 = vpop.f32.mrf.mxu1  ;;  %v1117_v57 = vadd.f32 %v1113_v50, %v1080_v49 }
 0x175   : > { %v1067_v59 = vpop.f32.mrf.mxu2 }
 0x176   : > { %v1081_v39 = vpop.f32.mrf.mxu3 }
 0x177   : > { %v1578_v55 = vpop.f32.mrf.mxu0  ;;  %v1082_v63 = vadd.f32 %v1081_v39, %v1067_v59  ;;  %v2080_v59 = vld [vmem:[%s4848_s26] sm:$0x1] }
 0x179   : > { %v1592_v53 = vpop.f32.mrf.mxu1  ;;  %v1119_v48 = vadd.f32 %v1113_v50, %v1082_v63 }
 0x17a   : > { %v1593_v60 = vadd.f32 %v1592_v53, %v1578_v55 }
 0x17d   : > { %v1107_v12 = vpop.f32.mrf.mxu2 }
 0x17e   : > { %v1344_v56 = vpop.f32.mrf.mxu3  ;;  %v1108_v35 = vadd.f32 %v1107_v12, %v4732_v32 }
 0x17f   : > { %v1345_v40 = vadd.f32 %v1344_v56, %v1330_v23  ;;  %v1580_v10 = vpop.f32.mrf.mxu0  ;;  %v2076_v23 = vld [vmem:[%s4934_s7 + $0x8] sm:$0xff] }
 0x180   : > { %2099 = vmatpush.msra.mxu1 %v2076_v23  ;;  %v1118_v39 = vadd.f32 %v1114_v36, %v1108_v35 }
 0x181   : > { %v1377_v61 = vadd.f32 %v1345_v40, %v1117_v57  ;;  %v1594_v4 = vpop.f32.mrf.mxu1 }
 0x182   : > { %v1595_v11 = vadd.f32 %v1594_v4, %v1580_v10  ;;  %2100 = vmatpush.msra.mxu1 %v2075_v33 }
 0x183   : > { %v1625_v0 = vadd.f32 %v1593_v60, %v1377_v61 }
 0x185   : > { %v1629_v1 = vmax.f32 %v1625_v0, 0.0  ;;  %v1109_v26 = vpop.f32.mrf.mxu2 }
 0x186   : > { %v1346_v30 = vpop.f32.mrf.mxu3  ;;  %v1110_v49 = vadd.f32 %v1109_v26, %v4746_v44 }
 0x187   : > { %v4787_v52 = vpack.c.bf16 %v1629_v1, %v1629_v1  ;;  %v1347_v8 = vadd.f32 %v1346_v30, %v1332_v37 }
 0x188   : > { %v1120_v25 = vadd.f32 %v1114_v36, %v1110_v49 }
 0x189   : > { %v1379_v14 = vadd.f32 %v1347_v8, %v1119_v48  ;;  %1760 = vmatmul.bf16.vlgmr.msra.gmra.mxu2 %v4787_v52  ;;  %v1620_v38 = vpop.f32.mrf.mxu1  ;;  %v1813_v58 = vrot.slane %v4787_v52, 2  ;;  %v3553_v48 = vld [vmem:[%s4933_s6] ss:$0 sm:$0xff] }
 0x18a   : > { %2165 = vmatpush.msra.mxu2 %v2078_v28 }
 0x18b   : > { %v1627_v16 = vadd.f32 %v1595_v11, %v1379_v14 }
 0x18c   : > { %2166 = vmatpush.msra.mxu2 %v2077_v29 }
 0x18d   : > { %v1631_v18 = vmax.f32 %v1627_v16, 0.0  ;;  %v1358_v5 = vpop.f32.mrf.mxu2 }
 0x18e   : > { %v1372_v27 = vpop.f32.mrf.mxu3  ;;  %2167 = vmatpush.msra.mxu2 %v2076_v23 }
 0x18f   : > { %v1930_v6 = vpack.c.bf16 %v1631_v18, %v1631_v18  ;;  %v1373_v37 = vadd.f32 %v1372_v27, %v1358_v5 }
 0x190   : > { %2168 = vmatpush.msra.mxu2 %v2075_v33 }
 0x191   : > { %2056 = vmatmul.bf16.vlgmr.msrb.gmra.mxu3 %v1930_v6  ;;  %v1378_v45 = vadd.f32 %v1373_v37, %v1118_v39  ;;  %v1622_v54 = vpop.f32.mrf.mxu1  ;;  %v3554_v37 = vld [vmem:[%s4848_s26] ss:$0 sm:$0xff]  ;;  %s362_s26 = scalar_lea.vmem [#allocation2], %s361_s18 }
 0x192   : > { %s2371_s27 = sshll.u32 %s362_s26, 4  ;;  %s2372_s27 = int_to_ptr.vmem [resolvable:$true] %s2371_s27 }
 0x195   : > { %v1360_v47 = vpop.f32.mrf.mxu2 }
 0x196   : > { %v1374_v34 = vpop.f32.mrf.mxu3 }
 0x197   : > { %v1375_v51 = vadd.f32 %v1374_v34, %v1360_v47 }
 0x199   : > { %v1380_v32 = vadd.f32 %v1375_v51, %v1120_v25 }
 0x1aa   : > { %v1606_v42 = vpop.f32.mrf.mxu3 }
 0x1ab   : > { %v1621_v46 = vadd.f32 %v1620_v38, %v1606_v42 }
 0x1ad   : > { %v1626_v50 = vadd.f32 %v1621_v46, %v1378_v45 }
 0x1af   : > { %v1630_v53 = vmax.f32 %v1626_v50, 0.0 }
 0x1b1   : > { %v1635_v43 = vpack.c.bf16 %v1630_v53, %v1630_v53 }
 0x1b2   : > { %v1608_v55 = vpop.f32.mrf.mxu3 }
 0x1b3   : > { %v1814_v56 = vrot.slane %v1635_v43, 2  ;;  %v1623_v41 = vadd.f32 %v1622_v54, %v1608_v55  ;;  %3149 = vmatmul.msk.bf16.vlgmr.msra.gmra.mxu0 %vm1748_vm3, %v1635_v43 }
 0x1b4   : > { %2234 = vmatpush.msra.mxu0 %v2078_v28 }
 0x1b5   : > { %v1628_v57 = vadd.f32 %v1623_v41, %v1380_v32  ;;  %3234 = vmatmul.msk.bf16.vlgmr.msrb.gmra.mxu1 %vm1748_vm3, %v1814_v56 }
 0x1b6   : > { %2235 = vmatpush.msra.mxu0 %v2077_v29  ;;  %2303 = vmatpush.msrb.mxu1 %v2078_v28 }
 0x1b7   : > { %v1632_v44 = vmax.f32 %v1628_v57, 0.0 }
 0x1b8   : > { %2236 = vmatpush.msra.mxu0 %v2076_v23  ;;  %2304 = vmatpush.msrb.mxu1 %v2077_v29 }
 0x1b9   : > { %v1931_v40 = vpack.c.bf16 %v1632_v44, %v1632_v44 }
 0x1ba   : > { %2237 = vmatpush.msra.mxu0 %v2075_v33  ;;  %2305 = vmatpush.msrb.mxu1 %v2076_v23 }
 0x1bb   : > { %3319 = vmatmul.msk.bf16.vlgmr.msrb.gmra.mxu2 %vm1748_vm3, %v1931_v40 }
 0x1bc   : > { %2306 = vmatpush.msrb.mxu1 %v2075_v33 }
 0x1c3   : > { %1911 = vmatmul.bf16.vlgmr.msrb.gmra.mxu0 %v1813_v58 }
 0x1c5   : > { %3320 = vmatmul.msk.f32.vlgmr.msra.gmra.mxu1 %vm2081_vm4, %v2080_v59 }
 0x20c   : > { %v1761_v60 = vpop.f32.mrf.mxu2 }
 0x214   : > { %v1763_v61 = vpop.f32.mrf.mxu2  ;;  %v2057_v62 = vpop.f32.mrf.mxu3 }
 0x21c   : > { %v2059_v63 = vpop.f32.mrf.mxu3 }
 0x230   : > { %v1774_v0 = vpop.f32.mrf.mxu0 }
 0x231   : > { %v1775_v1 = vadd.f32 %v1774_v0, %v1761_v60 }
 0x232   : > { %v1925_v3 = vpop.f32.mrf.mxu1 }
 0x233   : > { %v1781_v10 = vadd.f32 %v3553_v48, %v1775_v1 }
 0x238   : > { %v1776_v4 = vpop.f32.mrf.mxu0 }
 0x23a   : > { %v1927_v30 = vpop.f32.mrf.mxu1 }
 0x23e   : > { %v2070_v8 = vpop.f32.mrf.mxu2 }
 0x23f   : > { %v2071_v52 = vadd.f32 %v2070_v8, %v2057_v62 }
 0x240   : > { %v1912_v7 = vpop.f32.mrf.mxu0 }
 0x241   : > { %v1926_v11 = vadd.f32 %v1925_v3, %v1912_v7 }
 0x242   : > { %v2102_v14 = vpop.f32.mrf.mxu1 }
 0x243   : > { %v1929_v15 = vadd.f32 %v1926_v11, %v1781_v10  ;;  %v2103_v12 = vadd.f32 %v2102_v14, %v4859_v9 }
 0x245   : > { %v4862_v16 = vadd.f32 %v2071_v52, %v1929_v15  ;;  %2126 = vrot.lane.b32.xlu0 %v2103_v12, %s3643_s30 }
 0x246   : > { %v2072_v2 = vpop.f32.mrf.mxu2 }
 0x247   : > { %v2105_v18 = vadd.f32 %v2103_v12, %v4862_v16 }
 0x248   : > { %v1914_v17 = vpop.f32.mrf.mxu0 }
 0x249   : > { %v3321_v19 = vmul.f32 -1.442695, %v2105_v18 }
 0x24b   : > { %3555 = vpow2.f32 %v3321_v19 }
 0x251   : > { %v3556_v6 = vpop.eup %3555 }
 0x252   : > { %v2109_v20 = vadd.f32 1.0, %v3556_v6 }
 0x254   : > { %3557 = vrcp.f32 %v2109_v20  ;;  %v2121_v28 = vand.u32 2147483648, %v2109_v20  ;;  %vm2115_vm6 = vweird.f32 %v2109_v20  ;;  %v2119_v29 = vand.u32 2147483647, %v2109_v20 }
 0x256   : > { %v2122_v23 = vor.u32 1.1754944e-38, %v2121_v28  ;;  %vm2120_vm8 = vcmp.eq.f32.partialorder %v2119_v29, 8.507059e+37 }
 0x25a   : > { %v3558_v21 = vpop.eup %3557 }
 0x25b   : > { %v2111_v22 = vmul.f32 %v3558_v21, %v2109_v20  ;;  %vm2116_vm5 = vweird.f32 %v3558_v21 }
 0x25c   : > { %vm2117_vm7 = vmor %vm2115_vm6, %vm2116_vm5  ;;  %vm2358_vm5 = vcmask 257027  }
 0x25d   : > { %v2112_v24 = vsub.f32 1.0, %v2111_v22 }
 0x25f   : > { %v2113_v26 = vmul.f32 %v3558_v21, %v2112_v24 }
 0x261   : > { %v2114_v27 = vadd.f32 %v3558_v21, %v2113_v26 }
 0x263   : > { %v2118_v13 = vsel %vm2117_vm7, %v3558_v21, %v2114_v27 }
 0x264   : > { %v2123_v33 = vsel %vm2120_vm8, %v2122_v23, %v2118_v13 }
 0x265   : > { %v2136_v39 = vsub.f32 1.0, %v2123_v33 }
 0x2b7   : > { %v2127_v31 = vpop.permute.xlu0 %2126 }
 0x2b8   : > { %v2129_v5 = vmul.f32 %v2127_v31, %v2123_v33 }
 0x2ba   : > { %2131 = vrot.lane.b32.xlu0 %v2129_v5, %s3643_s30 }
 0x32c   : > { %v2132_v34 = vpop.permute.xlu0 %2131 }
 0x32d   : > { %v2134_v35 = vadd.f32 %v2132_v34, %v4862_v16 }
 0x32f   : > { %3559 = vtanh.f32 %v2134_v35 }
 0x335   : > { %v3560_v36 = vpop.eup %3559 }
 0x336   : > { %2138 = vrot.lane.b32.xlu1 %v3560_v36, %s3644_s20 }
 0x33e   : > { %2143 = vrot.lane.b32.xlu1 %v3554_v37, %s3645_s12 }
 0x3a8   : > { %v2139_v38 = vpop.permute.xlu1 %2138 }
 0x3a9   : > { %v2141_v45 = vmul.f32 %v2139_v38, %v2136_v39 }
 0x3b0   : > { %v2144_v42 = vpop.permute.xlu1 %2143 }
 0x3b1   : > { %v2146_v46 = vmul.f32 %v2144_v42, %v2123_v33 }
 0x3b3   : > { %v2147_v47 = vadd.f32 %v2146_v46, %v2141_v45 }
 0x3b5   : > { %2149 = vrot.lane.b32.xlu2 %v2147_v47, %s3644_s20  ;;  %v2212_v60 = vrot.slane %v2147_v47, 7 }
 0x40f   : > { %v2150_v49 = vpop.permute.xlu2 %2149 }
 0x410   : > { %3322 = vmatmul.msk.f32.vlgmr.msra.gmra.mxu2 %vm2081_vm4, %v2150_v49 }
 0x493   : > { %v2170_v50 = vpop.f32.mrf.mxu2 }
 0x494   : > { %v2171_v51 = vadd.f32 %v2170_v50, %v4859_v9 }
 0x496   : > { %v2174_v53 = vrot.slane %v2171_v51, 7 }
 0x498   : > { %v2176_v25 = vadd.f32 %v2174_v53, %v4862_v16  ;;  %2196 = vrot.lane.b32.xlu2 %v2174_v53, %s3643_s30 }
 0x49a   : > { %v3323_v43 = vmul.f32 -1.442695, %v2176_v25 }
 0x49c   : > { %3561 = vpow2.f32 %v3323_v43 }
 0x4a2   : > { %v3562_v54 = vpop.eup %3561 }
 0x4a3   : > { %v2180_v55 = vadd.f32 1.0, %v3562_v54 }
 0x4a5   : > { %3563 = vrcp.f32 %v2180_v55  ;;  %v2192_v57 = vand.u32 2147483648, %v2180_v55  ;;  %v2190_v40 = vand.u32 2147483647, %v2180_v55  ;;  %vm2186_vm10 = vweird.f32 %v2180_v55 }
 0x4a7   : > { %v2193_v59 = vor.u32 1.1754944e-38, %v2192_v57  ;;  %vm2191_vm12 = vcmp.eq.f32.partialorder %v2190_v40, 8.507059e+37 }
 0x4ab   : > { %v3564_v32 = vpop.eup %3563 }
 0x4ac   : > { %v2182_v56 = vmul.f32 %v3564_v32, %v2180_v55  ;;  %vm2187_vm9 = vweird.f32 %v3564_v32 }
 0x4ad   : > { %vm2188_vm11 = vmor %vm2186_vm10, %vm2187_vm9 }
 0x4ae   : > { %v2183_v41 = vsub.f32 1.0, %v2182_v56 }
 0x4b0   : > { %v2184_v44 = vmul.f32 %v3564_v32, %v2183_v41 }
 0x4b2   : > { %v2185_v58 = vadd.f32 %v3564_v32, %v2184_v44 }
 0x4b4   : > { %v2189_v61 = vsel %vm2188_vm11, %v3564_v32, %v2185_v58 }
 0x4b5   : > { %v2194_v62 = vsel %vm2191_vm12, %v2193_v59, %v2189_v61 }
 0x4b6   : > { %v2214_v63 = vmul.f32 %v2212_v60, %v2194_v62  ;;  %v2206_v48 = vsub.f32 1.0, %v2194_v62 }
 0x4f2   : > { %v2197_v0 = vpop.permute.xlu2 %2196 }
 0x4f3   : > { %v2199_v1 = vmul.f32 %v2197_v0, %v2194_v62 }
 0x4f5   : > { %2201 = vrot.lane.b32.xlu0 %v2199_v1, %s3643_s30 }
 0x567   : > { %v2202_v3 = vpop.permute.xlu0 %2201 }
 0x568   : > { %v2204_v4 = vadd.f32 %v2202_v3, %v4862_v16 }
 0x56a   : > { %3565 = vtanh.f32 %v2204_v4 }
 0x570   : > { %v3566_v30 = vpop.eup %3565 }
 0x571   : > { %2208 = vrot.lane.b32.xlu1 %v3566_v30, %s3644_s20 }
 0x5e3   : > { %v2209_v8 = vpop.permute.xlu1 %2208 }
 0x5e4   : > { %v2211_v52 = vmul.f32 %v2209_v8, %v2206_v48 }
 0x5e6   : > { %v2215_v7 = vadd.f32 %v2214_v63, %v2211_v52 }
 0x5e8   : > { %v2217_v10 = vrot.slane %v2215_v7, 1  ;;  %v2281_v35 = vrot.slane %v2215_v7, 7 }
 0x5ea   : > { %2218 = vrot.lane.b32.xlu2 %v2217_v10, %s3644_s20 }
 0x644   : > { %v2219_v11 = vpop.permute.xlu2 %2218 }
 0x645   : > { %3324 = vmatmul.msk.f32.vlgmr.msra.gmra.mxu0 %vm2081_vm4, %v2219_v11 }
 0x6c2   : > { %v2239_v14 = vpop.f32.mrf.mxu0 }
 0x6c3   : > { %v2240_v15 = vadd.f32 %v2239_v14, %v4859_v9 }
 0x6c5   : > { %v2243_v12 = vrot.slane %v2240_v15, 6 }
 0x6c7   : > { %2265 = vrot.lane.b32.xlu0 %v2243_v12, %s3643_s30  ;;  %v2245_v2 = vadd.f32 %v2243_v12, %v4862_v16 }
 0x6c9   : > { %v3325_v17 = vmul.f32 -1.442695, %v2245_v2 }
 0x6cb   : > { %3567 = vpow2.f32 %v3325_v17 }
 0x6d1   : > { %v3568_v18 = vpop.eup %3567 }
 0x6d2   : > { %v2249_v19 = vadd.f32 1.0, %v3568_v18 }
 0x6d4   : > { %3569 = vrcp.f32 %v2249_v19  ;;  %v2261_v26 = vand.u32 2147483648, %v2249_v19  ;;  %vm2255_vm14 = vweird.f32 %v2249_v19  ;;  %v2259_v27 = vand.u32 2147483647, %v2249_v19 }
 0x6d6   : > { %v2262_v29 = vor.u32 1.1754944e-38, %v2261_v26  ;;  %vm2260_vm0 = vcmp.eq.f32.partialorder %v2259_v27, 8.507059e+37 }
 0x6da   : > { %v3570_v6 = vpop.eup %3569 }
 0x6db   : > { %v2251_v20 = vmul.f32 %v3570_v6, %v2249_v19  ;;  %vm2256_vm13 = vweird.f32 %v3570_v6 }
 0x6dc   : > { %vm2257_vm15 = vmor %vm2255_vm14, %vm2256_vm13 }
 0x6dd   : > { %v2252_v21 = vsub.f32 1.0, %v2251_v20 }
 0x6df   : > { %v2253_v22 = vmul.f32 %v3570_v6, %v2252_v21 }
 0x6e1   : > { %v2254_v24 = vadd.f32 %v3570_v6, %v2253_v22 }
 0x6e3   : > { %v2258_v28 = vsel %vm2257_vm15, %v3570_v6, %v2254_v24 }
 0x6e4   : > { %v2263_v23 = vsel %vm2260_vm0, %v2262_v29, %v2258_v28 }
 0x6e5   : > { %v2275_v36 = vsub.f32 1.0, %v2263_v23  ;;  %v2283_v38 = vmul.f32 %v2281_v35, %v2263_v23 }
 0x739   : > { %v2266_v13 = vpop.permute.xlu0 %2265 }
 0x73a   : > { %v2268_v31 = vmul.f32 %v2266_v13, %v2263_v23 }
 0x73c   : > { %2270 = vrot.lane.b32.xlu1 %v2268_v31, %s3643_s30 }
 0x7ae   : > { %v2271_v33 = vpop.permute.xlu1 %2270 }
 0x7af   : > { %v2273_v5 = vadd.f32 %v2271_v33, %v4862_v16 }
 0x7b1   : > { %3571 = vtanh.f32 %v2273_v5 }
 0x7b7   : > { %v3572_v34 = vpop.eup %3571 }
 0x7b8   : > { %2277 = vrot.lane.b32.xlu2 %v3572_v34, %s3644_s20 }
 0x812   : > { %v2278_v37 = vpop.permute.xlu2 %2277 }
 0x813   : > { %v2280_v39 = vmul.f32 %v2278_v37, %v2275_v36 }
 0x815   : > { %v2284_v42 = vadd.f32 %v2283_v38, %v2280_v39 }
 0x817   : > { %v2286_v45 = vrot.slane %v2284_v42, 2  ;;  %v2350_v0 = vrot.slane %v2284_v42, 7 }
 0x819   : > { %2287 = vrot.lane.b32.xlu0 %v2286_v45, %s3644_s20 }
 0x88b   : > { %v2288_v46 = vpop.permute.xlu0 %2287 }
 0x88c   : > { %3326 = vmatmul.msk.f32.vlgmr.msrb.gmra.mxu1 %vm2081_vm4, %v2288_v46 }
 0x909   : > { %v2308_v47 = vpop.f32.mrf.mxu1 }
 0x90a   : > { %v2309_v49 = vadd.f32 %v2308_v47, %v4859_v9 }
 0x90c   : > { %v2312_v50 = vrot.slane %v2309_v49, 5 }
 0x90e   : > { %2334 = vrot.lane.b32.xlu1 %v2312_v50, %s3643_s30  ;;  %v2314_v51 = vadd.f32 %v2312_v50, %v4862_v16 }
 0x910   : > { %v3327_v53 = vmul.f32 -1.442695, %v2314_v51 }
 0x912   : > { %3573 = vpow2.f32 %v3327_v53 }
 0x918   : > { %v3574_v25 = vpop.eup %3573 }
 0x919   : > { %v2318_v43 = vadd.f32 1.0, %v3574_v25 }
 0x91b   : > { %3575 = vrcp.f32 %v2318_v43  ;;  %v2330_v57 = vand.u32 2147483648, %v2318_v43  ;;  %vm2324_vm2 = vweird.f32 %v2318_v43  ;;  %v2328_v44 = vand.u32 2147483647, %v2318_v43 }
 0x91d   : > { %v2331_v40 = vor.u32 1.1754944e-38, %v2330_v57  ;;  %vm2329_vm4 = vcmp.eq.f32.partialorder %v2328_v44, 8.507059e+37 }
 0x921   : > { %v3576_v54 = vpop.eup %3575 }
 0x922   : > { %v2320_v55 = vmul.f32 %v3576_v54, %v2318_v43  ;;  %vm2325_vm1 = vweird.f32 %v3576_v54 }
 0x923   : > { %vm2326_vm3 = vmor %vm2324_vm2, %vm2325_vm1 }
 0x924   : > { %v2321_v32 = vsub.f32 1.0, %v2320_v55 }
 0x926   : > { %v2322_v56 = vmul.f32 %v3576_v54, %v2321_v32 }
 0x928   : > { %v2323_v41 = vadd.f32 %v3576_v54, %v2322_v56 }
 0x92a   : > { %v2327_v9 = vsel %vm2326_vm3, %v3576_v54, %v2323_v41 }
 0x92b   : > { %v2332_v59 = vsel %vm2329_vm4, %v2331_v40, %v2327_v9 }
 0x92c   : > { %v2344_v1 = vsub.f32 1.0, %v2332_v59  ;;  %v2352_v4 = vmul.f32 %v2350_v0, %v2332_v59 }
 0x980   : > { %v2335_v58 = vpop.permute.xlu1 %2334 }
 0x981   : > { %v2337_v60 = vmul.f32 %v2335_v58, %v2332_v59 }
 0x983   : > { %2339 = vrot.lane.b32.xlu2 %v2337_v60, %s3643_s30  ;;  %s3595_s30 = scalar_lea.hbm %s3594_s28, 1 }
 0x984   : > { %p3596_p11 = scmp.ne.s32.totalorder %s3594_s28, %s3595_s30  ;;  %p3601_p1 = scmp.lt.s32.totalorder %s3599_s17, %s3595_s30 }
 0x986   : > { %p3597_p12 = pnand %p3596_p11, %p3739_p5  ;;  %p3602_p2 = por %p3601_p1, %p3600_p0 }
 0x988   : > { %p3598_p13 = pneg %p3597_p12 }
 0x98a   : > { %p3603_p3 = pnand %p3602_p2, %p3598_p13 }
 0x9dd   : > { %v2340_v61 = vpop.permute.xlu2 %2339 }
 0x9de   : > { %v2342_v62 = vadd.f32 %v2340_v61, %v4862_v16 }
 0x9e0   : > { %3577 = vtanh.f32 %v2342_v62 }
 0x9e6   : > { %v3578_v63 = vpop.eup %3577 }
 0x9e7   : > { %2346 = vrot.lane.b32.xlu0 %v3578_v63, %s3644_s20 }
 0xa59   : > { %v2347_v3 = vpop.permute.xlu0 %2346 }
 0xa5a   : > { %v2349_v30 = vmul.f32 %v2347_v3, %v2344_v1 }
 0xa5c   : > { %v2353_v48 = vadd.f32 %v2352_v4, %v2349_v30 }
 0xa5e   : > { %2355 = vrot.lane.b32.xlu1 %v2353_v48, %s3644_s20 }
 0xad0   : > { %v2356_v16 = vpop.permute.xlu1 %2355 }
 0xad1   : > { %2359 = vst.msk [vmem:[%s362_s26 - $0x3] sm:$0x8] %vm2358_vm5, %v2356_v16 }
 0xad2   : > { %3606 = shalt.err (!%p3603_p3)
}
 0xad3   : > { %3511 = dma.vmem_to_hbm [thread:$0]  (%p3739_p5), %s2372_s27, 16, %s2374_s11, %s2361_s29  }
 0xad4 PF: > { %p3517_p4 = scmp.ge.s32.totalorder %s3641_s16, 2  ;;  %s2385_s18 = sand.u32 1, %s3629_s13  }
 0xad5   : > { %s2386_s25 = scalar_lea.sflag [#allocation3], %s2385_s18 }
 0xad6   : > { %p3514_p7 = pnand %p3517_p4, %p3743_p6 }
 0xad8   : > { %p3515_p8 = pneg %p3514_p7 }
 0xada   : > { %3624 = dma.done.wait (%p3515_p8), %s2386_s25, 16  }
 0xadb   : > { %3626 = vsyncadd (%p3515_p8), %s2386_s25, 4294967280  ;;  %s4941_s26 = sld [smem:[#allocation5_spill]]  ;;  %p20_p9 = scmp.ge.s32.totalorder %s3726_s19, 4  }
 0xadc   : > { %s4942_s13 = smov %s3633_s14  ;;  %s4943_s14 = smov %s3637_s15 }
 0xadd   : > { %s4945_s16 = smov %s3726_s19  ;;  %22 = sbr.rel (!%p20_p9) target bundleno = 3 (0x3), region = 104 }
 0xae1   : > { %s4944_s15 = smov %s4941_s26 }
 0xae2   :  { %2391 = vsyncpa [#allocation3], 1 }
 0xae3   :  { %2393 = vsyncpa [#allocation3 + $0x1], 1 }

</bundles_post_ra>
